<compile_context>
chip_gen: v6e
topology: v6e:2x2x1
jax: 0.10.0
libtpu: 0.0.40
codegen_flags: <defaults>
</compile_context>

<pallas_src>
import functools

import jax
import jax.numpy as jnp
from jax.experimental import pallas as pl
from jax.experimental.pallas import tpu as pltpu

_ACT_DTYPE = jnp.bfloat16
_MAX_TM = 256


def _round_up(x, m):
    return ((x + m - 1) // m) * m


# ----------------------------------------------------------------------------
# Pallas kernels
# ----------------------------------------------------------------------------
def _conv_fused_kernel(x_ref, w_ref, b_ref, o_ref, *, relu):
    # (tm, K) @ (K, O) on the MXU (bf16 operands, f32 accumulation) with the
    # folded-BN per-channel bias and optional ReLU fused as an epilogue.
    y = jnp.dot(x_ref[...], w_ref[...],
                preferred_element_type=jnp.float32) + b_ref[...]
    if relu:
        y = jnp.maximum(y, 0.0)
    o_ref[...] = y.astype(o_ref.dtype)


def _conv_fused_res_kernel(x_ref, w_ref, b_ref, r_ref, o_ref, *, relu):
    # Same as above, plus the residual add fused into the epilogue.
    y = (jnp.dot(x_ref[...], w_ref[...], preferred_element_type=jnp.float32)
         + b_ref[...] + r_ref[...].astype(jnp.float32))
    if relu:
        y = jnp.maximum(y, 0.0)
    o_ref[...] = y.astype(o_ref.dtype)


def _max_reduce_kernel(x_ref, o_ref):
    # x: (KK, tm, C) -> max over the leading window-tap axis -> (tm, C)
    acc = x_ref[0]
    for i in range(1, x_ref.shape[0]):
        acc = jnp.maximum(acc, x_ref[i])
    o_ref[...] = acc


def _avgpool_fc_kernel(x_ref, w_ref, b_ref, o_ref):
    # x: (N, H*W, C) -> global average pool -> (N, C) -> fc -> (N, classes)
    x = x_ref[...].astype(jnp.float32)
    pooled = jnp.sum(x, axis=1) * (1.0 / x_ref.shape[1])
    o_ref[...] = jnp.dot(pooled, w_ref[...],
                         preferred_element_type=jnp.float32) + b_ref[...]


# ----------------------------------------------------------------------------
# Layer wrappers (glue: padding / patch extraction / reshapes in plain JAX)
# ----------------------------------------------------------------------------
def _im2col(x_nhwc, kh, kw, stride, pad, pad_value=0.0):
    n, h, w, c = x_nhwc.shape
    ho = (h + 2 * pad - kh) // stride + 1
    wo = (w + 2 * pad - kw) // stride + 1
    xp = jnp.pad(x_nhwc, ((0, 0), (pad, pad), (pad, pad), (0, 0)),
                 constant_values=pad_value)
    cols = []
    for i in range(kh):
        for j in range(kw):
            cols.append(xp[:, i:i + stride * ho:stride,
                           j:j + stride * wo:stride, :])
    return cols, ho, wo


def conv_fused(x_nhwc, cp, *, stride, pad, relu, residual=None):
    """Conv2d (bias-free) with folded BN scale/bias (+ residual) (+ ReLU).

    im2col (wrapper glue) + one tiled Pallas MXU matmul whose epilogue applies
    bias / residual / ReLU, so each activation map is written to HBM once.
    """
    n, h, w, c = x_nhwc.shape
    w4 = cp["w"]                              # (kh, kw, C, O) bf16, BN-folded
    kh, kw, _, o = w4.shape
    k = kh * kw * c
    wmat = w4.reshape(k, o)
    bias = cp["bias"]                         # (1, O) f32

    cols, ho, wo = _im2col(x_nhwc, kh, kw, stride, pad)
    m = n * ho * wo
    patches = jnp.stack(cols, axis=3).reshape(m, k).astype(_ACT_DTYPE)
    # TODO(synk): the im2col slab is still materialized in HBM; turning the
    # kh*kw taps into an in-kernel reduction over element-offset index_maps
    # would cut conv input read traffic ~kh*kw-fold.

    tm = min(_MAX_TM, _round_up(m, 16))
    m_pad = _round_up(m, tm)
    patches = jnp.pad(patches, ((0, m_pad - m), (0, 0)))

    args = [patches, wmat, bias]
    in_specs = [
        pl.BlockSpec((tm, k), lambda i: (i, 0)),
        pl.BlockSpec((k, o), lambda i: (0, 0)),   # resident across the grid
        pl.BlockSpec((1, o), lambda i: (0, 0)),   # resident across the grid
    ]
    if residual is None:
        kernel = functools.partial(_conv_fused_kernel, relu=relu)
    else:
        r = residual.reshape(m, o).astype(_ACT_DTYPE)
        r = jnp.pad(r, ((0, m_pad - m), (0, 0)))
        args.append(r)
        in_specs.append(pl.BlockSpec((tm, o), lambda i: (i, 0)))
        kernel = functools.partial(_conv_fused_res_kernel, relu=relu)

    out = pl.pallas_call(
        kernel,
        out_shape=jax.ShapeDtypeStruct((m_pad, o), _ACT_DTYPE),
        grid=(m_pad // tm,),
        in_specs=in_specs,
        out_specs=pl.BlockSpec((tm, o), lambda i: (i, 0)),
        compiler_params=pltpu.CompilerParams(
            dimension_semantics=("parallel",)),
    )(*args)
    # TODO(synk): output channels (8..64) are below 128 lanes, so stores are
    # lane-masked; padding/re-packing to 128 lanes trades HBM bytes for store
    # density and was left out at these tiny widths.
    return out[:m].reshape(n, ho, wo, o)


def maxpool2d(x_nhwc, k=3, stride=2, pad=1):
    n, h, w, c = x_nhwc.shape
    cols, ho, wo = _im2col(x_nhwc, k, k, stride, pad, pad_value=-jnp.inf)
    m = n * ho * wo
    kk = k * k
    patches = jnp.stack(cols, axis=0).reshape(kk, m, c)
    tm = min(_MAX_TM, _round_up(m, 16))
    m_pad = _round_up(m, tm)
    patches = jnp.pad(patches, ((0, 0), (0, m_pad - m), (0, 0)))
    out = pl.pallas_call(
        _max_reduce_kernel,
        out_shape=jax.ShapeDtypeStruct((m_pad, c), x_nhwc.dtype),
        grid=(m_pad // tm,),
        in_specs=[pl.BlockSpec((kk, tm, c), lambda i: (0, i, 0))],
        out_specs=pl.BlockSpec((tm, c), lambda i: (i, 0)),
        compiler_params=pltpu.CompilerParams(
            dimension_semantics=("parallel",)),
    )(patches)
    return out[:m].reshape(n, ho, wo, c)


def avgpool_fc(x_nhwc, fc_w_t, fc_b):
    """Global average pool + flatten + Linear, fused into one kernel."""
    n, h, w, c = x_nhwc.shape
    x = x_nhwc.reshape(n, h * w, c)
    n_classes = fc_w_t.shape[1]
    vmem = pl.BlockSpec(memory_space=pltpu.MemorySpace.VMEM)
    return pl.pallas_call(
        _avgpool_fc_kernel,
        out_shape=jax.ShapeDtypeStruct((n, n_classes), jnp.float32),
        in_specs=[vmem, vmem, vmem],
        out_specs=vmem,
    )(x, fc_w_t, fc_b)


# ----------------------------------------------------------------------------
# Parameter construction: BN (inference stats) folded into conv weights/bias
# ----------------------------------------------------------------------------
def _fold_conv_bn(w_oihw, gamma, beta, mean, var, eps=1e-5):
    o, c, kh, kw = w_oihw.shape
    scale = gamma / jnp.sqrt(var + eps)                 # (O,)
    bias = beta - mean * scale                          # (O,)
    w4 = jnp.transpose(w_oihw, (2, 3, 1, 0)) * scale    # (kh, kw, C, O)
    return {"w": w4.astype(_ACT_DTYPE),
            "bias": bias.reshape(1, o).astype(jnp.float32)}


def init_params(key, *, in_channel=3, out_channel=8, kernel=7, n_classes=10,
                widths=(8, 16, 32, 64), blocks=(2, 2, 2, 2)):
    keys = iter(jax.random.split(key, 128))

    def conv_w(o, i, k):
        # kaiming_normal_(mode='fan_out', nonlinearity='relu')
        fan_out = o * k * k
        std = (2.0 / fan_out) ** 0.5
        return std * jax.random.normal(next(keys), (o, i, k, k), jnp.float32)

    def bn_stats(c):
        return (jnp.ones((c,), jnp.float32), jnp.zeros((c,), jnp.float32),
                jnp.zeros((c,), jnp.float32), jnp.ones((c,), jnp.float32))

    params = {"stem": _fold_conv_bn(conv_w(out_channel, in_channel, kernel),
                                    *bn_stats(out_channel))}
    layers = []
    in_c = out_channel
    for li, (w, nb) in enumerate(zip(widths, blocks)):
        layer = []
        for bi in range(nb):
            stride = 2 if (li > 0 and bi == 0) else 1
            blk = {"c1": _fold_conv_bn(conv_w(w, in_c, 3), *bn_stats(w)),
                   "c2": _fold_conv_bn(conv_w(w, w, 3), *bn_stats(w))}
            if stride != 1 or in_c != w:
                blk["down"] = _fold_conv_bn(conv_w(w, in_c, 1), *bn_stats(w))
            layer.append(blk)
            in_c = w
        layers.append(layer)
    params["layers"] = layers

    # fc = nn.Linear(in_features, n_classes), default PyTorch uniform init
    fan_in = in_c
    bound = 1.0 / (fan_in ** 0.5)
    fc_w = jax.random.uniform(next(keys), (n_classes, fan_in), jnp.float32,
                              -bound, bound)
    fc_b = jax.random.uniform(next(keys), (n_classes,), jnp.float32,
                              -bound, bound)
    params["fc_w_t"] = fc_w.T                      # (fan_in, n_classes)
    params["fc_b"] = fc_b.reshape(1, n_classes)
    return params


# ----------------------------------------------------------------------------
# Forward pass: conv1 -> bn1 -> relu -> maxpool -> layer1..4 -> avgpool ->
#               flatten -> fc   (same child ordering as the PyTorch module)
# ----------------------------------------------------------------------------
def forward(params, x_nchw, *, conv1_stride=2, conv1_pad=3, maxpool=True):
    x = jnp.transpose(x_nchw, (0, 2, 3, 1)).astype(_ACT_DTYPE)  # NCHW -> NHWC
    x = conv_fused(x, params["stem"], stride=conv1_stride, pad=conv1_pad,
                   relu=True)
    if maxpool:
        x = maxpool2d(x, k=3, stride=2, pad=1)
    for li, layer in enumerate(params["layers"]):
        for bi, blk in enumerate(layer):
            stride = 2 if (li > 0 and bi == 0) else 1
            identity = x
            out = conv_fused(x, blk["c1"], stride=stride, pad=1, relu=True)
            if "down" in blk:
                identity = conv_fused(x, blk["down"], stride=stride, pad=0,
                                      relu=False)
            x = conv_fused(out, blk["c2"], stride=1, pad=1, relu=True,
                           residual=identity)
    return avgpool_fc(x, params["fc_w_t"], params["fc_b"])


# TODO(synk): `backbone` string dispatch (resnet34/50 Bottleneck variants) is
# config glue; this script instantiates the resnet18-style BasicBlock backbone.

if __name__ == "__main__":
    key = jax.random.PRNGKey(0)
    pkey, xkey = jax.random.split(key)

    N_CLASSES = 10
    params = init_params(pkey, in_channel=3, out_channel=8, kernel=7,
                         n_classes=N_CLASSES, widths=(8, 16, 32, 64),
                         blocks=(2, 2, 2, 2))

    # small example input, NCHW like the PyTorch module expects
    x = jax.random.normal(xkey, (2, 3, 16, 16), jnp.float32)

    fwd = jax.jit(functools.partial(forward, maxpool=True))
    logits = fwd(params, x)
    logits = jax.block_until_ready(logits)

    assert logits.shape == (2, N_CLASSES), logits.shape
    assert bool(jnp.all(jnp.isfinite(logits)))
    print("KERNEL_OK")
</pallas_src>

<mosaic_0001>
module attributes {stable_mosaic.version = 11 : i64} {
  func.func @_conv_fused_kernel(%arg0: i32, %arg1: memref<128x147xbf16, #tpu.memory_space<vmem>>, %arg2: memref<147x8xbf16, #tpu.memory_space<vmem>>, %arg3: memref<1x8xf32, #tpu.memory_space<vmem>>, %arg4: memref<128x8xbf16, #tpu.memory_space<vmem>>) attributes {dimension_semantics = [#tpu.dimension_semantics<parallel>], iteration_bounds = array<i64: 1>, scalar_prefetch = 0 : i64, scratch_operands = 0 : i64, tpu.core_type = #tpu.core_type<tc>, window_params = [{transform_indices = @transform_0, window_bounds = array<i64: 128, 147>}, {pipeline_mode = #tpu.pipeline_mode<synchronous>, transform_indices = @transform_1, window_bounds = array<i64: 147, 8>}, {pipeline_mode = #tpu.pipeline_mode<synchronous>, transform_indices = @transform_2, window_bounds = array<i64: 1, 8>}, {transform_indices = @transform_3, window_bounds = array<i64: 128, 8>}]} {
    %c0 = arith.constant 0 : index
    %c0_0 = arith.constant 0 : index
    %0 = vector.load %arg1[%c0, %c0_0] : memref<128x147xbf16, #tpu.memory_space<vmem>>, vector<128x147xbf16>
    %c0_1 = arith.constant 0 : index
    %c0_2 = arith.constant 0 : index
    %1 = vector.load %arg2[%c0_1, %c0_2] : memref<147x8xbf16, #tpu.memory_space<vmem>>, vector<147x8xbf16>
    %cst = arith.constant dense<0.000000e+00> : vector<128x8xf32>
    %2 = tpu.matmul %0, %1, %cst {dimension_numbers = #tpu.dot_dimension_numbers<[1], [0], [0], [1], [0, 0, 1, 1], [], []>} : vector<128x147xbf16>, vector<147x8xbf16>, vector<128x8xf32> -> vector<128x8xf32>
    %c0_3 = arith.constant 0 : index
    %c0_4 = arith.constant 0 : index
    %3 = vector.load %arg3[%c0_3, %c0_4] : memref<1x8xf32, #tpu.memory_space<vmem>>, vector<1x8xf32>
    %4 = vector.broadcast %3 : vector<1x8xf32> to vector<128x8xf32>
    %5 = arith.addf %2, %4 : vector<128x8xf32>
    %cst_5 = arith.constant 0.000000e+00 : f32
    %6 = vector.broadcast %cst_5 : f32 to vector<128x8xf32>
    %7 = arith.maximumf %5, %6 : vector<128x8xf32>
    %8 = arith.truncf %7 : vector<128x8xf32> to vector<128x8xbf16>
    %c0_6 = arith.constant 0 : index
    %c0_7 = arith.constant 0 : index
    %9 = vector.load %arg4[%c0_6, %c0_7] : memref<128x8xbf16, #tpu.memory_space<vmem>>, vector<128x8xbf16>
    tpu.vector_store %arg4[%c0_6, %c0_7], %8 {strides = array<i32>} : memref<128x8xbf16, #tpu.memory_space<vmem>>, vector<128x8xbf16>,
    return
  }
  func.func @transform_0(%arg0: i32) -> (i32, i32) {
    %c0_i32 = arith.constant 0 : i32
    %c0_i32_0 = arith.constant 0 : i32
    return %arg0, %c0_i32 : i32, i32
  }
  func.func @transform_1(%arg0: i32) -> (i32, i32) {
    %c0_i32 = arith.constant 0 : i32
    %c0_i32_0 = arith.constant 0 : i32
    %c0_i32_1 = arith.constant 0 : i32
    return %c0_i32, %c0_i32_0 : i32, i32
  }
  func.func @transform_2(%arg0: i32) -> (i32, i32) {
    %c0_i32 = arith.constant 0 : i32
    %c0_i32_0 = arith.constant 0 : i32
    %c0_i32_1 = arith.constant 0 : i32
    return %c0_i32, %c0_i32_0 : i32, i32
  }
  func.func @transform_3(%arg0: i32) -> (i32, i32) {
    %c0_i32 = arith.constant 0 : i32
    %c0_i32_0 = arith.constant 0 : i32
    return %arg0, %c0_i32 : i32, i32
  }
}

module attributes {stable_mosaic.version = 11 : i64} {
  func.func @_max_reduce_kernel(%arg0: i32, %arg1: memref<9x32x8xbf16, #tpu.memory_space<vmem>>, %arg2: memref<32x8xbf16, #tpu.memory_space<vmem>>) attributes {dimension_semantics = [#tpu.dimension_semantics<parallel>], iteration_bounds = array<i64: 1>, scalar_prefetch = 0 : i64, scratch_operands = 0 : i64, tpu.core_type = #tpu.core_type<tc>, window_params = [{transform_indices = @transform_0, window_bounds = array<i64: 9, 32, 8>}, {transform_indices = @transform_1, window_bounds = array<i64: 32, 8>}]} {
    %c0 = arith.constant 0 : index
    %c0_0 = arith.constant 0 : index
    %c0_1 = arith.constant 0 : index
    %0 = vector.load %arg1[%c0, %c0_0, %c0_1] : memref<9x32x8xbf16, #tpu.memory_space<vmem>>, vector<1x32x8xbf16>
    %1 = vector.shape_cast %0 : vector<1x32x8xbf16> to vector<32x8xbf16>
    %c1 = arith.constant 1 : index
    %c0_2 = arith.constant 0 : index
    %c0_3 = arith.constant 0 : index
    %2 = vector.load %arg1[%c1, %c0_2, %c0_3] : memref<9x32x8xbf16, #tpu.memory_space<vmem>>, vector<1x32x8xbf16>
    %3 = vector.shape_cast %2 : vector<1x32x8xbf16> to vector<32x8xbf16>
    %4 = arith.maximumf %1, %3 : vector<32x8xbf16>
    %c2 = arith.constant 2 : index
    %c0_4 = arith.constant 0 : index
    %c0_5 = arith.constant 0 : index
    %5 = vector.load %arg1[%c2, %c0_4, %c0_5] : memref<9x32x8xbf16, #tpu.memory_space<vmem>>, vector<1x32x8xbf16>
    %6 = vector.shape_cast %5 : vector<1x32x8xbf16> to vector<32x8xbf16>
    %7 = arith.maximumf %4, %6 : vector<32x8xbf16>
    %c3 = arith.constant 3 : index
    %c0_6 = arith.constant 0 : index
    %c0_7 = arith.constant 0 : index
    %8 = vector.load %arg1[%c3, %c0_6, %c0_7] : memref<9x32x8xbf16, #tpu.memory_space<vmem>>, vector<1x32x8xbf16>
    %9 = vector.shape_cast %8 : vector<1x32x8xbf16> to vector<32x8xbf16>
    %10 = arith.maximumf %7, %9 : vector<32x8xbf16>
    %c4 = arith.constant 4 : index
    %c0_8 = arith.constant 0 : index
    %c0_9 = arith.constant 0 : index
    %11 = vector.load %arg1[%c4, %c0_8, %c0_9] : memref<9x32x8xbf16, #tpu.memory_space<vmem>>, vector<1x32x8xbf16>
    %12 = vector.shape_cast %11 : vector<1x32x8xbf16> to vector<32x8xbf16>
    %13 = arith.maximumf %10, %12 : vector<32x8xbf16>
    %c5 = arith.constant 5 : index
    %c0_10 = arith.constant 0 : index
    %c0_11 = arith.constant 0 : index
    %14 = vector.load %arg1[%c5, %c0_10, %c0_11] : memref<9x32x8xbf16, #tpu.memory_space<vmem>>, vector<1x32x8xbf16>
    %15 = vector.shape_cast %14 : vector<1x32x8xbf16> to vector<32x8xbf16>
    %16 = arith.maximumf %13, %15 : vector<32x8xbf16>
    %c6 = arith.constant 6 : index
    %c0_12 = arith.constant 0 : index
    %c0_13 = arith.constant 0 : index
    %17 = vector.load %arg1[%c6, %c0_12, %c0_13] : memref<9x32x8xbf16, #tpu.memory_space<vmem>>, vector<1x32x8xbf16>
    %18 = vector.shape_cast %17 : vector<1x32x8xbf16> to vector<32x8xbf16>
    %19 = arith.maximumf %16, %18 : vector<32x8xbf16>
    %c7 = arith.constant 7 : index
    %c0_14 = arith.constant 0 : index
    %c0_15 = arith.constant 0 : index
    %20 = vector.load %arg1[%c7, %c0_14, %c0_15] : memref<9x32x8xbf16, #tpu.memory_space<vmem>>, vector<1x32x8xbf16>
    %21 = vector.shape_cast %20 : vector<1x32x8xbf16> to vector<32x8xbf16>
    %22 = arith.maximumf %19, %21 : vector<32x8xbf16>
    %c8 = arith.constant 8 : index
    %c0_16 = arith.constant 0 : index
    %c0_17 = arith.constant 0 : index
    %23 = vector.load %arg1[%c8, %c0_16, %c0_17] : memref<9x32x8xbf16, #tpu.memory_space<vmem>>, vector<1x32x8xbf16>
    %24 = vector.shape_cast %23 : vector<1x32x8xbf16> to vector<32x8xbf16>
    %25 = arith.maximumf %22, %24 : vector<32x8xbf16>
    %c0_18 = arith.constant 0 : index
    %c0_19 = arith.constant 0 : index
    %26 = vector.load %arg2[%c0_18, %c0_19] : memref<32x8xbf16, #tpu.memory_space<vmem>>, vector<32x8xbf16>
    tpu.vector_store %arg2[%c0_18, %c0_19], %25 {strides = array<i32>} : memref<32x8xbf16, #tpu.memory_space<vmem>>, vector<32x8xbf16>,
    return
  }
  func.func @transform_0(%arg0: i32) -> (i32, i32, i32) {
    %c0_i32 = arith.constant 0 : i32
    %c0_i32_0 = arith.constant 0 : i32
    %c0_i32_1 = arith.constant 0 : i32
    return %c0_i32, %arg0, %c0_i32_0 : i32, i32, i32
  }
  func.func @transform_1(%arg0: i32) -> (i32, i32) {
    %c0_i32 = arith.constant 0 : i32
    %c0_i32_0 = arith.constant 0 : i32
    return %arg0, %c0_i32 : i32, i32
  }
}

module attributes {stable_mosaic.version = 11 : i64} {
  func.func @_conv_fused_kernel(%arg0: i32, %arg1: memref<32x72xbf16, #tpu.memory_space<vmem>>, %arg2: memref<72x8xbf16, #tpu.memory_space<vmem>>, %arg3: memref<1x8xf32, #tpu.memory_space<vmem>>, %arg4: memref<32x8xbf16, #tpu.memory_space<vmem>>) attributes {dimension_semantics = [#tpu.dimension_semantics<parallel>], iteration_bounds = array<i64: 1>, scalar_prefetch = 0 : i64, scratch_operands = 0 : i64, tpu.core_type = #tpu.core_type<tc>, window_params = [{transform_indices = @transform_0, window_bounds = array<i64: 32, 72>}, {pipeline_mode = #tpu.pipeline_mode<synchronous>, transform_indices = @transform_1, window_bounds = array<i64: 72, 8>}, {pipeline_mode = #tpu.pipeline_mode<synchronous>, transform_indices = @transform_2, window_bounds = array<i64: 1, 8>}, {transform_indices = @transform_3, window_bounds = array<i64: 32, 8>}]} {
    %c0 = arith.constant 0 : index
    %c0_0 = arith.constant 0 : index
    %0 = vector.load %arg1[%c0, %c0_0] : memref<32x72xbf16, #tpu.memory_space<vmem>>, vector<32x72xbf16>
    %c0_1 = arith.constant 0 : index
    %c0_2 = arith.constant 0 : index
    %1 = vector.load %arg2[%c0_1, %c0_2] : memref<72x8xbf16, #tpu.memory_space<vmem>>, vector<72x8xbf16>
    %cst = arith.constant dense<0.000000e+00> : vector<32x8xf32>
    %2 = tpu.matmul %0, %1, %cst {dimension_numbers = #tpu.dot_dimension_numbers<[1], [0], [0], [1], [0, 0, 1, 1], [], []>} : vector<32x72xbf16>, vector<72x8xbf16>, vector<32x8xf32> -> vector<32x8xf32>
    %c0_3 = arith.constant 0 : index
    %c0_4 = arith.constant 0 : index
    %3 = vector.load %arg3[%c0_3, %c0_4] : memref<1x8xf32, #tpu.memory_space<vmem>>, vector<1x8xf32>
    %4 = vector.broadcast %3 : vector<1x8xf32> to vector<32x8xf32>
    %5 = arith.addf %2, %4 : vector<32x8xf32>
    %cst_5 = arith.constant 0.000000e+00 : f32
    %6 = vector.broadcast %cst_5 : f32 to vector<32x8xf32>
    %7 = arith.maximumf %5, %6 : vector<32x8xf32>
    %8 = arith.truncf %7 : vector<32x8xf32> to vector<32x8xbf16>
    %c0_6 = arith.constant 0 : index
    %c0_7 = arith.constant 0 : index
    %9 = vector.load %arg4[%c0_6, %c0_7] : memref<32x8xbf16, #tpu.memory_space<vmem>>, vector<32x8xbf16>
    tpu.vector_store %arg4[%c0_6, %c0_7], %8 {strides = array<i32>} : memref<32x8xbf16, #tpu.memory_space<vmem>>, vector<32x8xbf16>,
    return
  }
  func.func @transform_0(%arg0: i32) -> (i32, i32) {
    %c0_i32 = arith.constant 0 : i32
    %c0_i32_0 = arith.constant 0 : i32
    return %arg0, %c0_i32 : i32, i32
  }
  func.func @transform_1(%arg0: i32) -> (i32, i32) {
    %c0_i32 = arith.constant 0 : i32
    %c0_i32_0 = arith.constant 0 : i32
    %c0_i32_1 = arith.constant 0 : i32
    return %c0_i32, %c0_i32_0 : i32, i32
  }
  func.func @transform_2(%arg0: i32) -> (i32, i32) {
    %c0_i32 = arith.constant 0 : i32
    %c0_i32_0 = arith.constant 0 : i32
    %c0_i32_1 = arith.constant 0 : i32
    return %c0_i32, %c0_i32_0 : i32, i32
  }
  func.func @transform_3(%arg0: i32) -> (i32, i32) {
    %c0_i32 = arith.constant 0 : i32
    %c0_i32_0 = arith.constant 0 : i32
    return %arg0, %c0_i32 : i32, i32
  }
}

module attributes {stable_mosaic.version = 11 : i64} {
  func.func @_conv_fused_res_kernel(%arg0: i32, %arg1: memref<32x72xbf16, #tpu.memory_space<vmem>>, %arg2: memref<72x8xbf16, #tpu.memory_space<vmem>>, %arg3: memref<1x8xf32, #tpu.memory_space<vmem>>, %arg4: memref<32x8xbf16, #tpu.memory_space<vmem>>, %arg5: memref<32x8xbf16, #tpu.memory_space<vmem>>) attributes {dimension_semantics = [#tpu.dimension_semantics<parallel>], iteration_bounds = array<i64: 1>, scalar_prefetch = 0 : i64, scratch_operands = 0 : i64, tpu.core_type = #tpu.core_type<tc>, window_params = [{transform_indices = @transform_0, window_bounds = array<i64: 32, 72>}, {pipeline_mode = #tpu.pipeline_mode<synchronous>, transform_indices = @transform_1, window_bounds = array<i64: 72, 8>}, {pipeline_mode = #tpu.pipeline_mode<synchronous>, transform_indices = @transform_2, window_bounds = array<i64: 1, 8>}, {transform_indices = @transform_3, window_bounds = array<i64: 32, 8>}, {transform_indices = @transform_4, window_bounds = array<i64: 32, 8>}]} {
    %c0 = arith.constant 0 : index
    %c0_0 = arith.constant 0 : index
    %0 = vector.load %arg1[%c0, %c0_0] : memref<32x72xbf16, #tpu.memory_space<vmem>>, vector<32x72xbf16>
    %c0_1 = arith.constant 0 : index
    %c0_2 = arith.constant 0 : index
    %1 = vector.load %arg2[%c0_1, %c0_2] : memref<72x8xbf16, #tpu.memory_space<vmem>>, vector<72x8xbf16>
    %cst = arith.constant dense<0.000000e+00> : vector<32x8xf32>
    %2 = tpu.matmul %0, %1, %cst {dimension_numbers = #tpu.dot_dimension_numbers<[1], [0], [0], [1], [0, 0, 1, 1], [], []>} : vector<32x72xbf16>, vector<72x8xbf16>, vector<32x8xf32> -> vector<32x8xf32>
    %c0_3 = arith.constant 0 : index
    %c0_4 = arith.constant 0 : index
    %3 = vector.load %arg3[%c0_3, %c0_4] : memref<1x8xf32, #tpu.memory_space<vmem>>, vector<1x8xf32>
    %4 = vector.broadcast %3 : vector<1x8xf32> to vector<32x8xf32>
    %5 = arith.addf %2, %4 : vector<32x8xf32>
    %c0_5 = arith.constant 0 : index
    %c0_6 = arith.constant 0 : index
    %6 = vector.load %arg4[%c0_5, %c0_6] : memref<32x8xbf16, #tpu.memory_space<vmem>>, vector<32x8xbf16>
    %7 = arith.extf %6 : vector<32x8xbf16> to vector<32x8xf32>
    %8 = arith.addf %5, %7 : vector<32x8xf32>
    %cst_7 = arith.constant 0.000000e+00 : f32
    %9 = vector.broadcast %cst_7 : f32 to vector<32x8xf32>
    %10 = arith.maximumf %8, %9 : vector<32x8xf32>
    %11 = arith.truncf %10 : vector<32x8xf32> to vector<32x8xbf16>
    %c0_8 = arith.constant 0 : index
    %c0_9 = arith.constant 0 : index
    %12 = vector.load %arg5[%c0_8, %c0_9] : memref<32x8xbf16, #tpu.memory_space<vmem>>, vector<32x8xbf16>
    tpu.vector_store %arg5[%c0_8, %c0_9], %11 {strides = array<i32>} : memref<32x8xbf16, #tpu.memory_space<vmem>>, vector<32x8xbf16>,
    return
  }
  func.func @transform_0(%arg0: i32) -> (i32, i32) {
    %c0_i32 = arith.constant 0 : i32
    %c0_i32_0 = arith.constant 0 : i32
    return %arg0, %c0_i32 : i32, i32
  }
  func.func @transform_1(%arg0: i32) -> (i32, i32) {
    %c0_i32 = arith.constant 0 : i32
    %c0_i32_0 = arith.constant 0 : i32
    %c0_i32_1 = arith.constant 0 : i32
    return %c0_i32, %c0_i32_0 : i32, i32
  }
  func.func @transform_2(%arg0: i32) -> (i32, i32) {
    %c0_i32 = arith.constant 0 : i32
    %c0_i32_0 = arith.constant 0 : i32
    %c0_i32_1 = arith.constant 0 : i32
    return %c0_i32, %c0_i32_0 : i32, i32
  }
  func.func @transform_3(%arg0: i32) -> (i32, i32) {
    %c0_i32 = arith.constant 0 : i32
    %c0_i32_0 = arith.constant 0 : i32
    return %arg0, %c0_i32 : i32, i32
  }
  func.func @transform_4(%arg0: i32) -> (i32, i32) {
    %c0_i32 = arith.constant 0 : i32
    %c0_i32_0 = arith.constant 0 : i32
    return %arg0, %c0_i32 : i32, i32
  }
}

module attributes {stable_mosaic.version = 11 : i64} {
  func.func @_conv_fused_kernel(%arg0: i32, %arg1: memref<16x72xbf16, #tpu.memory_space<vmem>>, %arg2: memref<72x16xbf16, #tpu.memory_space<vmem>>, %arg3: memref<1x16xf32, #tpu.memory_space<vmem>>, %arg4: memref<16x16xbf16, #tpu.memory_space<vmem>>) attributes {dimension_semantics = [#tpu.dimension_semantics<parallel>], iteration_bounds = array<i64: 1>, scalar_prefetch = 0 : i64, scratch_operands = 0 : i64, tpu.core_type = #tpu.core_type<tc>, window_params = [{transform_indices = @transform_0, window_bounds = array<i64: 16, 72>}, {pipeline_mode = #tpu.pipeline_mode<synchronous>, transform_indices = @transform_1, window_bounds = array<i64: 72, 16>}, {pipeline_mode = #tpu.pipeline_mode<synchronous>, transform_indices = @transform_2, window_bounds = array<i64: 1, 16>}, {transform_indices = @transform_3, window_bounds = array<i64: 16, 16>}]} {
    %c0 = arith.constant 0 : index
    %c0_0 = arith.constant 0 : index
    %0 = vector.load %arg1[%c0, %c0_0] : memref<16x72xbf16, #tpu.memory_space<vmem>>, vector<16x72xbf16>
    %c0_1 = arith.constant 0 : index
    %c0_2 = arith.constant 0 : index
    %1 = vector.load %arg2[%c0_1, %c0_2] : memref<72x16xbf16, #tpu.memory_space<vmem>>, vector<72x16xbf16>
    %cst = arith.constant dense<0.000000e+00> : vector<16x16xf32>
    %2 = tpu.matmul %0, %1, %cst {dimension_numbers = #tpu.dot_dimension_numbers<[1], [0], [0], [1], [0, 0, 1, 1], [], []>} : vector<16x72xbf16>, vector<72x16xbf16>, vector<16x16xf32> -> vector<16x16xf32>
    %c0_3 = arith.constant 0 : index
    %c0_4 = arith.constant 0 : index
    %3 = vector.load %arg3[%c0_3, %c0_4] : memref<1x16xf32, #tpu.memory_space<vmem>>, vector<1x16xf32>
    %4 = vector.broadcast %3 : vector<1x16xf32> to vector<16x16xf32>
    %5 = arith.addf %2, %4 : vector<16x16xf32>
    %cst_5 = arith.constant 0.000000e+00 : f32
    %6 = vector.broadcast %cst_5 : f32 to vector<16x16xf32>
    %7 = arith.maximumf %5, %6 : vector<16x16xf32>
    %8 = arith.truncf %7 : vector<16x16xf32> to vector<16x16xbf16>
    %c0_6 = arith.constant 0 : index
    %c0_7 = arith.constant 0 : index
    %9 = vector.load %arg4[%c0_6, %c0_7] : memref<16x16xbf16, #tpu.memory_space<vmem>>, vector<16x16xbf16>
    tpu.vector_store %arg4[%c0_6, %c0_7], %8 {strides = array<i32>} : memref<16x16xbf16, #tpu.memory_space<vmem>>, vector<16x16xbf16>,
    return
  }
  func.func @transform_0(%arg0: i32) -> (i32, i32) {
    %c0_i32 = arith.constant 0 : i32
    %c0_i32_0 = arith.constant 0 : i32
    return %arg0, %c0_i32 : i32, i32
  }
  func.func @transform_1(%arg0: i32) -> (i32, i32) {
    %c0_i32 = arith.constant 0 : i32
    %c0_i32_0 = arith.constant 0 : i32
    %c0_i32_1 = arith.constant 0 : i32
    return %c0_i32, %c0_i32_0 : i32, i32
  }
  func.func @transform_2(%arg0: i32) -> (i32, i32) {
    %c0_i32 = arith.constant 0 : i32
    %c0_i32_0 = arith.constant 0 : i32
    %c0_i32_1 = arith.constant 0 : i32
    return %c0_i32, %c0_i32_0 : i32, i32
  }
  func.func @transform_3(%arg0: i32) -> (i32, i32) {
    %c0_i32 = arith.constant 0 : i32
    %c0_i32_0 = arith.constant 0 : i32
    return %arg0, %c0_i32 : i32, i32
  }
}

module attributes {stable_mosaic.version = 11 : i64} {
  func.func @_conv_fused_kernel(%arg0: i32, %arg1: memref<16x8xbf16, #tpu.memory_space<vmem>>, %arg2: memref<8x16xbf16, #tpu.memory_space<vmem>>, %arg3: memref<1x16xf32, #tpu.memory_space<vmem>>, %arg4: memref<16x16xbf16, #tpu.memory_space<vmem>>) attributes {dimension_semantics = [#tpu.dimension_semantics<parallel>], iteration_bounds = array<i64: 1>, scalar_prefetch = 0 : i64, scratch_operands = 0 : i64, tpu.core_type = #tpu.core_type<tc>, window_params = [{transform_indices = @transform_0, window_bounds = array<i64: 16, 8>}, {pipeline_mode = #tpu.pipeline_mode<synchronous>, transform_indices = @transform_1, window_bounds = array<i64: 8, 16>}, {pipeline_mode = #tpu.pipeline_mode<synchronous>, transform_indices = @transform_2, window_bounds = array<i64: 1, 16>}, {transform_indices = @transform_3, window_bounds = array<i64: 16, 16>}]} {
    %c0 = arith.constant 0 : index
    %c0_0 = arith.constant 0 : index
    %0 = vector.load %arg1[%c0, %c0_0] : memref<16x8xbf16, #tpu.memory_space<vmem>>, vector<16x8xbf16>
    %c0_1 = arith.constant 0 : index
    %c0_2 = arith.constant 0 : index
    %1 = vector.load %arg2[%c0_1, %c0_2] : memref<8x16xbf16, #tpu.memory_space<vmem>>, vector<8x16xbf16>
    %cst = arith.constant dense<0.000000e+00> : vector<16x16xf32>
    %2 = tpu.matmul %0, %1, %cst {dimension_numbers = #tpu.dot_dimension_numbers<[1], [0], [0], [1], [0, 0, 1, 1], [], []>} : vector<16x8xbf16>, vector<8x16xbf16>, vector<16x16xf32> -> vector<16x16xf32>
    %c0_3 = arith.constant 0 : index
    %c0_4 = arith.constant 0 : index
    %3 = vector.load %arg3[%c0_3, %c0_4] : memref<1x16xf32, #tpu.memory_space<vmem>>, vector<1x16xf32>
    %4 = vector.broadcast %3 : vector<1x16xf32> to vector<16x16xf32>
    %5 = arith.addf %2, %4 : vector<16x16xf32>
    %6 = arith.truncf %5 : vector<16x16xf32> to vector<16x16xbf16>
    %c0_5 = arith.constant 0 : index
    %c0_6 = arith.constant 0 : index
    %7 = vector.load %arg4[%c0_5, %c0_6] : memref<16x16xbf16, #tpu.memory_space<vmem>>, vector<16x16xbf16>
    tpu.vector_store %arg4[%c0_5, %c0_6], %6 {strides = array<i32>} : memref<16x16xbf16, #tpu.memory_space<vmem>>, vector<16x16xbf16>,
    return
  }
  func.func @transform_0(%arg0: i32) -> (i32, i32) {
    %c0_i32 = arith.constant 0 : i32
    %c0_i32_0 = arith.constant 0 : i32
    return %arg0, %c0_i32 : i32, i32
  }
  func.func @transform_1(%arg0: i32) -> (i32, i32) {
    %c0_i32 = arith.constant 0 : i32
    %c0_i32_0 = arith.constant 0 : i32
    %c0_i32_1 = arith.constant 0 : i32
    return %c0_i32, %c0_i32_0 : i32, i32
  }
  func.func @transform_2(%arg0: i32) -> (i32, i32) {
    %c0_i32 = arith.constant 0 : i32
    %c0_i32_0 = arith.constant 0 : i32
    %c0_i32_1 = arith.constant 0 : i32
    return %c0_i32, %c0_i32_0 : i32, i32
  }
  func.func @transform_3(%arg0: i32) -> (i32, i32) {
    %c0_i32 = arith.constant 0 : i32
    %c0_i32_0 = arith.constant 0 : i32
    return %arg0, %c0_i32 : i32, i32
  }
}

module attributes {stable_mosaic.version = 11 : i64} {
  func.func @_conv_fused_kernel(%arg0: i32, %arg1: memref<16x144xbf16, #tpu.memory_space<vmem>>, %arg2: memref<144x16xbf16, #tpu.memory_space<vmem>>, %arg3: memref<1x16xf32, #tpu.memory_space<vmem>>, %arg4: memref<16x16xbf16, #tpu.memory_space<vmem>>) attributes {dimension_semantics = [#tpu.dimension_semantics<parallel>], iteration_bounds = array<i64: 1>, scalar_prefetch = 0 : i64, scratch_operands = 0 : i64, tpu.core_type = #tpu.core_type<tc>, window_params = [{transform_indices = @transform_0, window_bounds = array<i64: 16, 144>}, {pipeline_mode = #tpu.pipeline_mode<synchronous>, transform_indices = @transform_1, window_bounds = array<i64: 144, 16>}, {pipeline_mode = #tpu.pipeline_mode<synchronous>, transform_indices = @transform_2, window_bounds = array<i64: 1, 16>}, {transform_indices = @transform_3, window_bounds = array<i64: 16, 16>}]} {
    %c0 = arith.constant 0 : index
    %c0_0 = arith.constant 0 : index
    %0 = vector.load %arg1[%c0, %c0_0] : memref<16x144xbf16, #tpu.memory_space<vmem>>, vector<16x144xbf16>
    %c0_1 = arith.constant 0 : index
    %c0_2 = arith.constant 0 : index
    %1 = vector.load %arg2[%c0_1, %c0_2] : memref<144x16xbf16, #tpu.memory_space<vmem>>, vector<144x16xbf16>
    %cst = arith.constant dense<0.000000e+00> : vector<16x16xf32>
    %2 = tpu.matmul %0, %1, %cst {dimension_numbers = #tpu.dot_dimension_numbers<[1], [0], [0], [1], [0, 0, 1, 1], [], []>} : vector<16x144xbf16>, vector<144x16xbf16>, vector<16x16xf32> -> vector<16x16xf32>
    %c0_3 = arith.constant 0 : index
    %c0_4 = arith.constant 0 : index
    %3 = vector.load %arg3[%c0_3, %c0_4] : memref<1x16xf32, #tpu.memory_space<vmem>>, vector<1x16xf32>
    %4 = vector.broadcast %3 : vector<1x16xf32> to vector<16x16xf32>
    %5 = arith.addf %2, %4 : vector<16x16xf32>
    %cst_5 = arith.constant 0.000000e+00 : f32
    %6 = vector.broadcast %cst_5 : f32 to vector<16x16xf32>
    %7 = arith.maximumf %5, %6 : vector<16x16xf32>
    %8 = arith.truncf %7 : vector<16x16xf32> to vector<16x16xbf16>
    %c0_6 = arith.constant 0 : index
    %c0_7 = arith.constant 0 : index
    %9 = vector.load %arg4[%c0_6, %c0_7] : memref<16x16xbf16, #tpu.memory_space<vmem>>, vector<16x16xbf16>
    tpu.vector_store %arg4[%c0_6, %c0_7], %8 {strides = array<i32>} : memref<16x16xbf16, #tpu.memory_space<vmem>>, vector<16x16xbf16>,
    return
  }
  func.func @transform_0(%arg0: i32) -> (i32, i32) {
    %c0_i32 = arith.constant 0 : i32
    %c0_i32_0 = arith.constant 0 : i32
    return %arg0, %c0_i32 : i32, i32
  }
  func.func @transform_1(%arg0: i32) -> (i32, i32) {
    %c0_i32 = arith.constant 0 : i32
    %c0_i32_0 = arith.constant 0 : i32
    %c0_i32_1 = arith.constant 0 : i32
    return %c0_i32, %c0_i32_0 : i32, i32
  }
  func.func @transform_2(%arg0: i32) -> (i32, i32) {
    %c0_i32 = arith.constant 0 : i32
    %c0_i32_0 = arith.constant 0 : i32
    %c0_i32_1 = arith.constant 0 : i32
    return %c0_i32, %c0_i32_0 : i32, i32
  }
  func.func @transform_3(%arg0: i32) -> (i32, i32) {
    %c0_i32 = arith.constant 0 : i32
    %c0_i32_0 = arith.constant 0 : i32
    return %arg0, %c0_i32 : i32, i32
  }
}

module attributes {stable_mosaic.version = 11 : i64} {
  func.func @_conv_fused_res_kernel(%arg0: i32, %arg1: memref<16x144xbf16, #tpu.memory_space<vmem>>, %arg2: memref<144x16xbf16, #tpu.memory_space<vmem>>, %arg3: memref<1x16xf32, #tpu.memory_space<vmem>>, %arg4: memref<16x16xbf16, #tpu.memory_space<vmem>>, %arg5: memref<16x16xbf16, #tpu.memory_space<vmem>>) attributes {dimension_semantics = [#tpu.dimension_semantics<parallel>], iteration_bounds = array<i64: 1>, scalar_prefetch = 0 : i64, scratch_operands = 0 : i64, tpu.core_type = #tpu.core_type<tc>, window_params = [{transform_indices = @transform_0, window_bounds = array<i64: 16, 144>}, {pipeline_mode = #tpu.pipeline_mode<synchronous>, transform_indices = @transform_1, window_bounds = array<i64: 144, 16>}, {pipeline_mode = #tpu.pipeline_mode<synchronous>, transform_indices = @transform_2, window_bounds = array<i64: 1, 16>}, {transform_indices = @transform_3, window_bounds = array<i64: 16, 16>}, {transform_indices = @transform_4, window_bounds = array<i64: 16, 16>}]} {
    %c0 = arith.constant 0 : index
    %c0_0 = arith.constant 0 : index
    %0 = vector.load %arg1[%c0, %c0_0] : memref<16x144xbf16, #tpu.memory_space<vmem>>, vector<16x144xbf16>
    %c0_1 = arith.constant 0 : index
    %c0_2 = arith.constant 0 : index
    %1 = vector.load %arg2[%c0_1, %c0_2] : memref<144x16xbf16, #tpu.memory_space<vmem>>, vector<144x16xbf16>
    %cst = arith.constant dense<0.000000e+00> : vector<16x16xf32>
    %2 = tpu.matmul %0, %1, %cst {dimension_numbers = #tpu.dot_dimension_numbers<[1], [0], [0], [1], [0, 0, 1, 1], [], []>} : vector<16x144xbf16>, vector<144x16xbf16>, vector<16x16xf32> -> vector<16x16xf32>
    %c0_3 = arith.constant 0 : index
    %c0_4 = arith.constant 0 : index
    %3 = vector.load %arg3[%c0_3, %c0_4] : memref<1x16xf32, #tpu.memory_space<vmem>>, vector<1x16xf32>
    %4 = vector.broadcast %3 : vector<1x16xf32> to vector<16x16xf32>
    %5 = arith.addf %2, %4 : vector<16x16xf32>
    %c0_5 = arith.constant 0 : index
    %c0_6 = arith.constant 0 : index
    %6 = vector.load %arg4[%c0_5, %c0_6] : memref<16x16xbf16, #tpu.memory_space<vmem>>, vector<16x16xbf16>
    %7 = arith.extf %6 : vector<16x16xbf16> to vector<16x16xf32>
    %8 = arith.addf %5, %7 : vector<16x16xf32>
    %cst_7 = arith.constant 0.000000e+00 : f32
    %9 = vector.broadcast %cst_7 : f32 to vector<16x16xf32>
    %10 = arith.maximumf %8, %9 : vector<16x16xf32>
    %11 = arith.truncf %10 : vector<16x16xf32> to vector<16x16xbf16>
    %c0_8 = arith.constant 0 : index
    %c0_9 = arith.constant 0 : index
    %12 = vector.load %arg5[%c0_8, %c0_9] : memref<16x16xbf16, #tpu.memory_space<vmem>>, vector<16x16xbf16>
    tpu.vector_store %arg5[%c0_8, %c0_9], %11 {strides = array<i32>} : memref<16x16xbf16, #tpu.memory_space<vmem>>, vector<16x16xbf16>,
    return
  }
  func.func @transform_0(%arg0: i32) -> (i32, i32) {
    %c0_i32 = arith.constant 0 : i32
    %c0_i32_0 = arith.constant 0 : i32
    return %arg0, %c0_i32 : i32, i32
  }
  func.func @transform_1(%arg0: i32) -> (i32, i32) {
    %c0_i32 = arith.constant 0 : i32
    %c0_i32_0 = arith.constant 0 : i32
    %c0_i32_1 = arith.constant 0 : i32
    return %c0_i32, %c0_i32_0 : i32, i32
  }
  func.func @transform_2(%arg0: i32) -> (i32, i32) {
    %c0_i32 = arith.constant 0 : i32
    %c0_i32_0 = arith.constant 0 : i32
    %c0_i32_1 = arith.constant 0 : i32
    return %c0_i32, %c0_i32_0 : i32, i32
  }
  func.func @transform_3(%arg0: i32) -> (i32, i32) {
    %c0_i32 = arith.constant 0 : i32
    %c0_i32_0 = arith.constant 0 : i32
    return %arg0, %c0_i32 : i32, i32
  }
  func.func @transform_4(%arg0: i32) -> (i32, i32) {
    %c0_i32 = arith.constant 0 : i32
    %c0_i32_0 = arith.constant 0 : i32
    return %arg0, %c0_i32 : i32, i32
  }
}

module attributes {stable_mosaic.version = 11 : i64} {
  func.func @_conv_fused_kernel(%arg0: i32, %arg1: memref<16x144xbf16, #tpu.memory_space<vmem>>, %arg2: memref<144x32xbf16, #tpu.memory_space<vmem>>, %arg3: memref<1x32xf32, #tpu.memory_space<vmem>>, %arg4: memref<16x32xbf16, #tpu.memory_space<vmem>>) attributes {dimension_semantics = [#tpu.dimension_semantics<parallel>], iteration_bounds = array<i64: 1>, scalar_prefetch = 0 : i64, scratch_operands = 0 : i64, tpu.core_type = #tpu.core_type<tc>, window_params = [{transform_indices = @transform_0, window_bounds = array<i64: 16, 144>}, {pipeline_mode = #tpu.pipeline_mode<synchronous>, transform_indices = @transform_1, window_bounds = array<i64: 144, 32>}, {pipeline_mode = #tpu.pipeline_mode<synchronous>, transform_indices = @transform_2, window_bounds = array<i64: 1, 32>}, {transform_indices = @transform_3, window_bounds = array<i64: 16, 32>}]} {
    %c0 = arith.constant 0 : index
    %c0_0 = arith.constant 0 : index
    %0 = vector.load %arg1[%c0, %c0_0] : memref<16x144xbf16, #tpu.memory_space<vmem>>, vector<16x144xbf16>
    %c0_1 = arith.constant 0 : index
    %c0_2 = arith.constant 0 : index
    %1 = vector.load %arg2[%c0_1, %c0_2] : memref<144x32xbf16, #tpu.memory_space<vmem>>, vector<144x32xbf16>
    %cst = arith.constant dense<0.000000e+00> : vector<16x32xf32>
    %2 = tpu.matmul %0, %1, %cst {dimension_numbers = #tpu.dot_dimension_numbers<[1], [0], [0], [1], [0, 0, 1, 1], [], []>} : vector<16x144xbf16>, vector<144x32xbf16>, vector<16x32xf32> -> vector<16x32xf32>
    %c0_3 = arith.constant 0 : index
    %c0_4 = arith.constant 0 : index
    %3 = vector.load %arg3[%c0_3, %c0_4] : memref<1x32xf32, #tpu.memory_space<vmem>>, vector<1x32xf32>
    %4 = vector.broadcast %3 : vector<1x32xf32> to vector<16x32xf32>
    %5 = arith.addf %2, %4 : vector<16x32xf32>
    %cst_5 = arith.constant 0.000000e+00 : f32
    %6 = vector.broadcast %cst_5 : f32 to vector<16x32xf32>
    %7 = arith.maximumf %5, %6 : vector<16x32xf32>
    %8 = arith.truncf %7 : vector<16x32xf32> to vector<16x32xbf16>
    %c0_6 = arith.constant 0 : index
    %c0_7 = arith.constant 0 : index
    %9 = vector.load %arg4[%c0_6, %c0_7] : memref<16x32xbf16, #tpu.memory_space<vmem>>, vector<16x32xbf16>
    tpu.vector_store %arg4[%c0_6, %c0_7], %8 {strides = array<i32>} : memref<16x32xbf16, #tpu.memory_space<vmem>>, vector<16x32xbf16>,
    return
  }
  func.func @transform_0(%arg0: i32) -> (i32, i32) {
    %c0_i32 = arith.constant 0 : i32
    %c0_i32_0 = arith.constant 0 : i32
    return %arg0, %c0_i32 : i32, i32
  }
  func.func @transform_1(%arg0: i32) -> (i32, i32) {
    %c0_i32 = arith.constant 0 : i32
    %c0_i32_0 = arith.constant 0 : i32
    %c0_i32_1 = arith.constant 0 : i32
    return %c0_i32, %c0_i32_0 : i32, i32
  }
  func.func @transform_2(%arg0: i32) -> (i32, i32) {
    %c0_i32 = arith.constant 0 : i32
    %c0_i32_0 = arith.constant 0 : i32
    %c0_i32_1 = arith.constant 0 : i32
    return %c0_i32, %c0_i32_0 : i32, i32
  }
  func.func @transform_3(%arg0: i32) -> (i32, i32) {
    %c0_i32 = arith.constant 0 : i32
    %c0_i32_0 = arith.constant 0 : i32
    return %arg0, %c0_i32 : i32, i32
  }
}

module attributes {stable_mosaic.version = 11 : i64} {
  func.func @_conv_fused_kernel(%arg0: i32, %arg1: memref<16x16xbf16, #tpu.memory_space<vmem>>, %arg2: memref<16x32xbf16, #tpu.memory_space<vmem>>, %arg3: memref<1x32xf32, #tpu.memory_space<vmem>>, %arg4: memref<16x32xbf16, #tpu.memory_space<vmem>>) attributes {dimension_semantics = [#tpu.dimension_semantics<parallel>], iteration_bounds = array<i64: 1>, scalar_prefetch = 0 : i64, scratch_operands = 0 : i64, tpu.core_type = #tpu.core_type<tc>, window_params = [{transform_indices = @transform_0, window_bounds = array<i64: 16, 16>}, {pipeline_mode = #tpu.pipeline_mode<synchronous>, transform_indices = @transform_1, window_bounds = array<i64: 16, 32>}, {pipeline_mode = #tpu.pipeline_mode<synchronous>, transform_indices = @transform_2, window_bounds = array<i64: 1, 32>}, {transform_indices = @transform_3, window_bounds = array<i64: 16, 32>}]} {
    %c0 = arith.constant 0 : index
    %c0_0 = arith.constant 0 : index
    %0 = vector.load %arg1[%c0, %c0_0] : memref<16x16xbf16, #tpu.memory_space<vmem>>, vector<16x16xbf16>
    %c0_1 = arith.constant 0 : index
    %c0_2 = arith.constant 0 : index
    %1 = vector.load %arg2[%c0_1, %c0_2] : memref<16x32xbf16, #tpu.memory_space<vmem>>, vector<16x32xbf16>
    %cst = arith.constant dense<0.000000e+00> : vector<16x32xf32>
    %2 = tpu.matmul %0, %1, %cst {dimension_numbers = #tpu.dot_dimension_numbers<[1], [0], [0], [1], [0, 0, 1, 1], [], []>} : vector<16x16xbf16>, vector<16x32xbf16>, vector<16x32xf32> -> vector<16x32xf32>
    %c0_3 = arith.constant 0 : index
    %c0_4 = arith.constant 0 : index
    %3 = vector.load %arg3[%c0_3, %c0_4] : memref<1x32xf32, #tpu.memory_space<vmem>>, vector<1x32xf32>
    %4 = vector.broadcast %3 : vector<1x32xf32> to vector<16x32xf32>
    %5 = arith.addf %2, %4 : vector<16x32xf32>
    %6 = arith.truncf %5 : vector<16x32xf32> to vector<16x32xbf16>
    %c0_5 = arith.constant 0 : index
    %c0_6 = arith.constant 0 : index
    %7 = vector.load %arg4[%c0_5, %c0_6] : memref<16x32xbf16, #tpu.memory_space<vmem>>, vector<16x32xbf16>
    tpu.vector_store %arg4[%c0_5, %c0_6], %6 {strides = array<i32>} : memref<16x32xbf16, #tpu.memory_space<vmem>>, vector<16x32xbf16>,
    return
  }
  func.func @transform_0(%arg0: i32) -> (i32, i32) {
    %c0_i32 = arith.constant 0 : i32
    %c0_i32_0 = arith.constant 0 : i32
    return %arg0, %c0_i32 : i32, i32
  }
  func.func @transform_1(%arg0: i32) -> (i32, i32) {
    %c0_i32 = arith.constant 0 : i32
    %c0_i32_0 = arith.constant 0 : i32
    %c0_i32_1 = arith.constant 0 : i32
    return %c0_i32, %c0_i32_0 : i32, i32
  }
  func.func @transform_2(%arg0: i32) -> (i32, i32) {
    %c0_i32 = arith.constant 0 : i32
    %c0_i32_0 = arith.constant 0 : i32
    %c0_i32_1 = arith.constant 0 : i32
    return %c0_i32, %c0_i32_0 : i32, i32
  }
  func.func @transform_3(%arg0: i32) -> (i32, i32) {
    %c0_i32 = arith.constant 0 : i32
    %c0_i32_0 = arith.constant 0 : i32
    return %arg0, %c0_i32 : i32, i32
  }
}

module attributes {stable_mosaic.version = 11 : i64} {
  func.func @_conv_fused_res_kernel(%arg0: i32, %arg1: memref<16x288xbf16, #tpu.memory_space<vmem>>, %arg2: memref<288x32xbf16, #tpu.memory_space<vmem>>, %arg3: memref<1x32xf32, #tpu.memory_space<vmem>>, %arg4: memref<16x32xbf16, #tpu.memory_space<vmem>>, %arg5: memref<16x32xbf16, #tpu.memory_space<vmem>>) attributes {dimension_semantics = [#tpu.dimension_semantics<parallel>], iteration_bounds = array<i64: 1>, scalar_prefetch = 0 : i64, scratch_operands = 0 : i64, tpu.core_type = #tpu.core_type<tc>, window_params = [{transform_indices = @transform_0, window_bounds = array<i64: 16, 288>}, {pipeline_mode = #tpu.pipeline_mode<synchronous>, transform_indices = @transform_1, window_bounds = array<i64: 288, 32>}, {pipeline_mode = #tpu.pipeline_mode<synchronous>, transform_indices = @transform_2, window_bounds = array<i64: 1, 32>}, {transform_indices = @transform_3, window_bounds = array<i64: 16, 32>}, {transform_indices = @transform_4, window_bounds = array<i64: 16, 32>}]} {
    %c0 = arith.constant 0 : index
    %c0_0 = arith.constant 0 : index
    %0 = vector.load %arg1[%c0, %c0_0] : memref<16x288xbf16, #tpu.memory_space<vmem>>, vector<16x288xbf16>
    %c0_1 = arith.constant 0 : index
    %c0_2 = arith.constant 0 : index
    %1 = vector.load %arg2[%c0_1, %c0_2] : memref<288x32xbf16, #tpu.memory_space<vmem>>, vector<288x32xbf16>
    %cst = arith.constant dense<0.000000e+00> : vector<16x32xf32>
    %2 = tpu.matmul %0, %1, %cst {dimension_numbers = #tpu.dot_dimension_numbers<[1], [0], [0], [1], [0, 0, 1, 1], [], []>} : vector<16x288xbf16>, vector<288x32xbf16>, vector<16x32xf32> -> vector<16x32xf32>
    %c0_3 = arith.constant 0 : index
    %c0_4 = arith.constant 0 : index
    %3 = vector.load %arg3[%c0_3, %c0_4] : memref<1x32xf32, #tpu.memory_space<vmem>>, vector<1x32xf32>
    %4 = vector.broadcast %3 : vector<1x32xf32> to vector<16x32xf32>
    %5 = arith.addf %2, %4 : vector<16x32xf32>
    %c0_5 = arith.constant 0 : index
    %c0_6 = arith.constant 0 : index
    %6 = vector.load %arg4[%c0_5, %c0_6] : memref<16x32xbf16, #tpu.memory_space<vmem>>, vector<16x32xbf16>
    %7 = arith.extf %6 : vector<16x32xbf16> to vector<16x32xf32>
    %8 = arith.addf %5, %7 : vector<16x32xf32>
    %cst_7 = arith.constant 0.000000e+00 : f32
    %9 = vector.broadcast %cst_7 : f32 to vector<16x32xf32>
    %10 = arith.maximumf %8, %9 : vector<16x32xf32>
    %11 = arith.truncf %10 : vector<16x32xf32> to vector<16x32xbf16>
    %c0_8 = arith.constant 0 : index
    %c0_9 = arith.constant 0 : index
    %12 = vector.load %arg5[%c0_8, %c0_9] : memref<16x32xbf16, #tpu.memory_space<vmem>>, vector<16x32xbf16>
    tpu.vector_store %arg5[%c0_8, %c0_9], %11 {strides = array<i32>} : memref<16x32xbf16, #tpu.memory_space<vmem>>, vector<16x32xbf16>,
    return
  }
  func.func @transform_0(%arg0: i32) -> (i32, i32) {
    %c0_i32 = arith.constant 0 : i32
    %c0_i32_0 = arith.constant 0 : i32
    return %arg0, %c0_i32 : i32, i32
  }
  func.func @transform_1(%arg0: i32) -> (i32, i32) {
    %c0_i32 = arith.constant 0 : i32
    %c0_i32_0 = arith.constant 0 : i32
    %c0_i32_1 = arith.constant 0 : i32
    return %c0_i32, %c0_i32_0 : i32, i32
  }
  func.func @transform_2(%arg0: i32) -> (i32, i32) {
    %c0_i32 = arith.constant 0 : i32
    %c0_i32_0 = arith.constant 0 : i32
    %c0_i32_1 = arith.constant 0 : i32
    return %c0_i32, %c0_i32_0 : i32, i32
  }
  func.func @transform_3(%arg0: i32) -> (i32, i32) {
    %c0_i32 = arith.constant 0 : i32
    %c0_i32_0 = arith.constant 0 : i32
    return %arg0, %c0_i32 : i32, i32
  }
  func.func @transform_4(%arg0: i32) -> (i32, i32) {
    %c0_i32 = arith.constant 0 : i32
    %c0_i32_0 = arith.constant 0 : i32
    return %arg0, %c0_i32 : i32, i32
  }
}

module attributes {stable_mosaic.version = 11 : i64} {
  func.func @_conv_fused_kernel(%arg0: i32, %arg1: memref<16x288xbf16, #tpu.memory_space<vmem>>, %arg2: memref<288x32xbf16, #tpu.memory_space<vmem>>, %arg3: memref<1x32xf32, #tpu.memory_space<vmem>>, %arg4: memref<16x32xbf16, #tpu.memory_space<vmem>>) attributes {dimension_semantics = [#tpu.dimension_semantics<parallel>], iteration_bounds = array<i64: 1>, scalar_prefetch = 0 : i64, scratch_operands = 0 : i64, tpu.core_type = #tpu.core_type<tc>, window_params = [{transform_indices = @transform_0, window_bounds = array<i64: 16, 288>}, {pipeline_mode = #tpu.pipeline_mode<synchronous>, transform_indices = @transform_1, window_bounds = array<i64: 288, 32>}, {pipeline_mode = #tpu.pipeline_mode<synchronous>, transform_indices = @transform_2, window_bounds = array<i64: 1, 32>}, {transform_indices = @transform_3, window_bounds = array<i64: 16, 32>}]} {
    %c0 = arith.constant 0 : index
    %c0_0 = arith.constant 0 : index
    %0 = vector.load %arg1[%c0, %c0_0] : memref<16x288xbf16, #tpu.memory_space<vmem>>, vector<16x288xbf16>
    %c0_1 = arith.constant 0 : index
    %c0_2 = arith.constant 0 : index
    %1 = vector.load %arg2[%c0_1, %c0_2] : memref<288x32xbf16, #tpu.memory_space<vmem>>, vector<288x32xbf16>
    %cst = arith.constant dense<0.000000e+00> : vector<16x32xf32>
    %2 = tpu.matmul %0, %1, %cst {dimension_numbers = #tpu.dot_dimension_numbers<[1], [0], [0], [1], [0, 0, 1, 1], [], []>} : vector<16x288xbf16>, vector<288x32xbf16>, vector<16x32xf32> -> vector<16x32xf32>
    %c0_3 = arith.constant 0 : index
    %c0_4 = arith.constant 0 : index
    %3 = vector.load %arg3[%c0_3, %c0_4] : memref<1x32xf32, #tpu.memory_space<vmem>>, vector<1x32xf32>
    %4 = vector.broadcast %3 : vector<1x32xf32> to vector<16x32xf32>
    %5 = arith.addf %2, %4 : vector<16x32xf32>
    %cst_5 = arith.constant 0.000000e+00 : f32
    %6 = vector.broadcast %cst_5 : f32 to vector<16x32xf32>
    %7 = arith.maximumf %5, %6 : vector<16x32xf32>
    %8 = arith.truncf %7 : vector<16x32xf32> to vector<16x32xbf16>
    %c0_6 = arith.constant 0 : index
    %c0_7 = arith.constant 0 : index
    %9 = vector.load %arg4[%c0_6, %c0_7] : memref<16x32xbf16, #tpu.memory_space<vmem>>, vector<16x32xbf16>
    tpu.vector_store %arg4[%c0_6, %c0_7], %8 {strides = array<i32>} : memref<16x32xbf16, #tpu.memory_space<vmem>>, vector<16x32xbf16>,
    return
  }
  func.func @transform_0(%arg0: i32) -> (i32, i32) {
    %c0_i32 = arith.constant 0 : i32
    %c0_i32_0 = arith.constant 0 : i32
    return %arg0, %c0_i32 : i32, i32
  }
  func.func @transform_1(%arg0: i32) -> (i32, i32) {
    %c0_i32 = arith.constant 0 : i32
    %c0_i32_0 = arith.constant 0 : i32
    %c0_i32_1 = arith.constant 0 : i32
    return %c0_i32, %c0_i32_0 : i32, i32
  }
  func.func @transform_2(%arg0: i32) -> (i32, i32) {
    %c0_i32 = arith.constant 0 : i32
    %c0_i32_0 = arith.constant 0 : i32
    %c0_i32_1 = arith.constant 0 : i32
    return %c0_i32, %c0_i32_0 : i32, i32
  }
  func.func @transform_3(%arg0: i32) -> (i32, i32) {
    %c0_i32 = arith.constant 0 : i32
    %c0_i32_0 = arith.constant 0 : i32
    return %arg0, %c0_i32 : i32, i32
  }
}

module attributes {stable_mosaic.version = 11 : i64} {
  func.func @_conv_fused_kernel(%arg0: i32, %arg1: memref<16x288xbf16, #tpu.memory_space<vmem>>, %arg2: memref<288x64xbf16, #tpu.memory_space<vmem>>, %arg3: memref<1x64xf32, #tpu.memory_space<vmem>>, %arg4: memref<16x64xbf16, #tpu.memory_space<vmem>>) attributes {dimension_semantics = [#tpu.dimension_semantics<parallel>], iteration_bounds = array<i64: 1>, scalar_prefetch = 0 : i64, scratch_operands = 0 : i64, tpu.core_type = #tpu.core_type<tc>, window_params = [{transform_indices = @transform_0, window_bounds = array<i64: 16, 288>}, {pipeline_mode = #tpu.pipeline_mode<synchronous>, transform_indices = @transform_1, window_bounds = array<i64: 288, 64>}, {pipeline_mode = #tpu.pipeline_mode<synchronous>, transform_indices = @transform_2, window_bounds = array<i64: 1, 64>}, {transform_indices = @transform_3, window_bounds = array<i64: 16, 64>}]} {
    %c0 = arith.constant 0 : index
    %c0_0 = arith.constant 0 : index
    %0 = vector.load %arg1[%c0, %c0_0] : memref<16x288xbf16, #tpu.memory_space<vmem>>, vector<16x288xbf16>
    %c0_1 = arith.constant 0 : index
    %c0_2 = arith.constant 0 : index
    %1 = vector.load %arg2[%c0_1, %c0_2] : memref<288x64xbf16, #tpu.memory_space<vmem>>, vector<288x64xbf16>
    %cst = arith.constant dense<0.000000e+00> : vector<16x64xf32>
    %2 = tpu.matmul %0, %1, %cst {dimension_numbers = #tpu.dot_dimension_numbers<[1], [0], [0], [1], [0, 0, 1, 1], [], []>} : vector<16x288xbf16>, vector<288x64xbf16>, vector<16x64xf32> -> vector<16x64xf32>
    %c0_3 = arith.constant 0 : index
    %c0_4 = arith.constant 0 : index
    %3 = vector.load %arg3[%c0_3, %c0_4] : memref<1x64xf32, #tpu.memory_space<vmem>>, vector<1x64xf32>
    %4 = vector.broadcast %3 : vector<1x64xf32> to vector<16x64xf32>
    %5 = arith.addf %2, %4 : vector<16x64xf32>
    %cst_5 = arith.constant 0.000000e+00 : f32
    %6 = vector.broadcast %cst_5 : f32 to vector<16x64xf32>
    %7 = arith.maximumf %5, %6 : vector<16x64xf32>
    %8 = arith.truncf %7 : vector<16x64xf32> to vector<16x64xbf16>
    %c0_6 = arith.constant 0 : index
    %c0_7 = arith.constant 0 : index
    %9 = vector.load %arg4[%c0_6, %c0_7] : memref<16x64xbf16, #tpu.memory_space<vmem>>, vector<16x64xbf16>
    tpu.vector_store %arg4[%c0_6, %c0_7], %8 {strides = array<i32>} : memref<16x64xbf16, #tpu.memory_space<vmem>>, vector<16x64xbf16>,
    return
  }
  func.func @transform_0(%arg0: i32) -> (i32, i32) {
    %c0_i32 = arith.constant 0 : i32
    %c0_i32_0 = arith.constant 0 : i32
    return %arg0, %c0_i32 : i32, i32
  }
  func.func @transform_1(%arg0: i32) -> (i32, i32) {
    %c0_i32 = arith.constant 0 : i32
    %c0_i32_0 = arith.constant 0 : i32
    %c0_i32_1 = arith.constant 0 : i32
    return %c0_i32, %c0_i32_0 : i32, i32
  }
  func.func @transform_2(%arg0: i32) -> (i32, i32) {
    %c0_i32 = arith.constant 0 : i32
    %c0_i32_0 = arith.constant 0 : i32
    %c0_i32_1 = arith.constant 0 : i32
    return %c0_i32, %c0_i32_0 : i32, i32
  }
  func.func @transform_3(%arg0: i32) -> (i32, i32) {
    %c0_i32 = arith.constant 0 : i32
    %c0_i32_0 = arith.constant 0 : i32
    return %arg0, %c0_i32 : i32, i32
  }
}

module attributes {stable_mosaic.version = 11 : i64} {
  func.func @_conv_fused_res_kernel(%arg0: i32, %arg1: memref<16x576xbf16, #tpu.memory_space<vmem>>, %arg2: memref<576x64xbf16, #tpu.memory_space<vmem>>, %arg3: memref<1x64xf32, #tpu.memory_space<vmem>>, %arg4: memref<16x64xbf16, #tpu.memory_space<vmem>>, %arg5: memref<16x64xbf16, #tpu.memory_space<vmem>>) attributes {dimension_semantics = [#tpu.dimension_semantics<parallel>], iteration_bounds = array<i64: 1>, scalar_prefetch = 0 : i64, scratch_operands = 0 : i64, tpu.core_type = #tpu.core_type<tc>, window_params = [{transform_indices = @transform_0, window_bounds = array<i64: 16, 576>}, {pipeline_mode = #tpu.pipeline_mode<synchronous>, transform_indices = @transform_1, window_bounds = array<i64: 576, 64>}, {pipeline_mode = #tpu.pipeline_mode<synchronous>, transform_indices = @transform_2, window_bounds = array<i64: 1, 64>}, {transform_indices = @transform_3, window_bounds = array<i64: 16, 64>}, {transform_indices = @transform_4, window_bounds = array<i64: 16, 64>}]} {
    %c0 = arith.constant 0 : index
    %c0_0 = arith.constant 0 : index
    %0 = vector.load %arg1[%c0, %c0_0] : memref<16x576xbf16, #tpu.memory_space<vmem>>, vector<16x576xbf16>
    %c0_1 = arith.constant 0 : index
    %c0_2 = arith.constant 0 : index
    %1 = vector.load %arg2[%c0_1, %c0_2] : memref<576x64xbf16, #tpu.memory_space<vmem>>, vector<576x64xbf16>
    %cst = arith.constant dense<0.000000e+00> : vector<16x64xf32>
    %2 = tpu.matmul %0, %1, %cst {dimension_numbers = #tpu.dot_dimension_numbers<[1], [0], [0], [1], [0, 0, 1, 1], [], []>} : vector<16x576xbf16>, vector<576x64xbf16>, vector<16x64xf32> -> vector<16x64xf32>
    %c0_3 = arith.constant 0 : index
    %c0_4 = arith.constant 0 : index
    %3 = vector.load %arg3[%c0_3, %c0_4] : memref<1x64xf32, #tpu.memory_space<vmem>>, vector<1x64xf32>
    %4 = vector.broadcast %3 : vector<1x64xf32> to vector<16x64xf32>
    %5 = arith.addf %2, %4 : vector<16x64xf32>
    %c0_5 = arith.constant 0 : index
    %c0_6 = arith.constant 0 : index
    %6 = vector.load %arg4[%c0_5, %c0_6] : memref<16x64xbf16, #tpu.memory_space<vmem>>, vector<16x64xbf16>
    %7 = arith.extf %6 : vector<16x64xbf16> to vector<16x64xf32>
    %8 = arith.addf %5, %7 : vector<16x64xf32>
    %cst_7 = arith.constant 0.000000e+00 : f32
    %9 = vector.broadcast %cst_7 : f32 to vector<16x64xf32>
    %10 = arith.maximumf %8, %9 : vector<16x64xf32>
    %11 = arith.truncf %10 : vector<16x64xf32> to vector<16x64xbf16>
    %c0_8 = arith.constant 0 : index
    %c0_9 = arith.constant 0 : index
    %12 = vector.load %arg5[%c0_8, %c0_9] : memref<16x64xbf16, #tpu.memory_space<vmem>>, vector<16x64xbf16>
    tpu.vector_store %arg5[%c0_8, %c0_9], %11 {strides = array<i32>} : memref<16x64xbf16, #tpu.memory_space<vmem>>, vector<16x64xbf16>,
    return
  }
  func.func @transform_0(%arg0: i32) -> (i32, i32) {
    %c0_i32 = arith.constant 0 : i32
    %c0_i32_0 = arith.constant 0 : i32
    return %arg0, %c0_i32 : i32, i32
  }
  func.func @transform_1(%arg0: i32) -> (i32, i32) {
    %c0_i32 = arith.constant 0 : i32
    %c0_i32_0 = arith.constant 0 : i32
    %c0_i32_1 = arith.constant 0 : i32
    return %c0_i32, %c0_i32_0 : i32, i32
  }
  func.func @transform_2(%arg0: i32) -> (i32, i32) {
    %c0_i32 = arith.constant 0 : i32
    %c0_i32_0 = arith.constant 0 : i32
    %c0_i32_1 = arith.constant 0 : i32
    return %c0_i32, %c0_i32_0 : i32, i32
  }
  func.func @transform_3(%arg0: i32) -> (i32, i32) {
    %c0_i32 = arith.constant 0 : i32
    %c0_i32_0 = arith.constant 0 : i32
    return %arg0, %c0_i32 : i32, i32
  }
  func.func @transform_4(%arg0: i32) -> (i32, i32) {
    %c0_i32 = arith.constant 0 : i32
    %c0_i32_0 = arith.constant 0 : i32
    return %arg0, %c0_i32 : i32, i32
  }
}

module attributes {stable_mosaic.version = 11 : i64} {
  func.func @_conv_fused_kernel(%arg0: i32, %arg1: memref<16x32xbf16, #tpu.memory_space<vmem>>, %arg2: memref<32x64xbf16, #tpu.memory_space<vmem>>, %arg3: memref<1x64xf32, #tpu.memory_space<vmem>>, %arg4: memref<16x64xbf16, #tpu.memory_space<vmem>>) attributes {dimension_semantics = [#tpu.dimension_semantics<parallel>], iteration_bounds = array<i64: 1>, scalar_prefetch = 0 : i64, scratch_operands = 0 : i64, tpu.core_type = #tpu.core_type<tc>, window_params = [{transform_indices = @transform_0, window_bounds = array<i64: 16, 32>}, {pipeline_mode = #tpu.pipeline_mode<synchronous>, transform_indices = @transform_1, window_bounds = array<i64: 32, 64>}, {pipeline_mode = #tpu.pipeline_mode<synchronous>, transform_indices = @transform_2, window_bounds = array<i64: 1, 64>}, {transform_indices = @transform_3, window_bounds = array<i64: 16, 64>}]} {
    %c0 = arith.constant 0 : index
    %c0_0 = arith.constant 0 : index
    %0 = vector.load %arg1[%c0, %c0_0] : memref<16x32xbf16, #tpu.memory_space<vmem>>, vector<16x32xbf16>
    %c0_1 = arith.constant 0 : index
    %c0_2 = arith.constant 0 : index
    %1 = vector.load %arg2[%c0_1, %c0_2] : memref<32x64xbf16, #tpu.memory_space<vmem>>, vector<32x64xbf16>
    %cst = arith.constant dense<0.000000e+00> : vector<16x64xf32>
    %2 = tpu.matmul %0, %1, %cst {dimension_numbers = #tpu.dot_dimension_numbers<[1], [0], [0], [1], [0, 0, 1, 1], [], []>} : vector<16x32xbf16>, vector<32x64xbf16>, vector<16x64xf32> -> vector<16x64xf32>
    %c0_3 = arith.constant 0 : index
    %c0_4 = arith.constant 0 : index
    %3 = vector.load %arg3[%c0_3, %c0_4] : memref<1x64xf32, #tpu.memory_space<vmem>>, vector<1x64xf32>
    %4 = vector.broadcast %3 : vector<1x64xf32> to vector<16x64xf32>
    %5 = arith.addf %2, %4 : vector<16x64xf32>
    %6 = arith.truncf %5 : vector<16x64xf32> to vector<16x64xbf16>
    %c0_5 = arith.constant 0 : index
    %c0_6 = arith.constant 0 : index
    %7 = vector.load %arg4[%c0_5, %c0_6] : memref<16x64xbf16, #tpu.memory_space<vmem>>, vector<16x64xbf16>
    tpu.vector_store %arg4[%c0_5, %c0_6], %6 {strides = array<i32>} : memref<16x64xbf16, #tpu.memory_space<vmem>>, vector<16x64xbf16>,
    return
  }
  func.func @transform_0(%arg0: i32) -> (i32, i32) {
    %c0_i32 = arith.constant 0 : i32
    %c0_i32_0 = arith.constant 0 : i32
    return %arg0, %c0_i32 : i32, i32
  }
  func.func @transform_1(%arg0: i32) -> (i32, i32) {
    %c0_i32 = arith.constant 0 : i32
    %c0_i32_0 = arith.constant 0 : i32
    %c0_i32_1 = arith.constant 0 : i32
    return %c0_i32, %c0_i32_0 : i32, i32
  }
  func.func @transform_2(%arg0: i32) -> (i32, i32) {
    %c0_i32 = arith.constant 0 : i32
    %c0_i32_0 = arith.constant 0 : i32
    %c0_i32_1 = arith.constant 0 : i32
    return %c0_i32, %c0_i32_0 : i32, i32
  }
  func.func @transform_3(%arg0: i32) -> (i32, i32) {
    %c0_i32 = arith.constant 0 : i32
    %c0_i32_0 = arith.constant 0 : i32
    return %arg0, %c0_i32 : i32, i32
  }
}

module attributes {stable_mosaic.version = 11 : i64} {
  func.func @_conv_fused_kernel(%arg0: i32, %arg1: memref<16x576xbf16, #tpu.memory_space<vmem>>, %arg2: memref<576x64xbf16, #tpu.memory_space<vmem>>, %arg3: memref<1x64xf32, #tpu.memory_space<vmem>>, %arg4: memref<16x64xbf16, #tpu.memory_space<vmem>>) attributes {dimension_semantics = [#tpu.dimension_semantics<parallel>], iteration_bounds = array<i64: 1>, scalar_prefetch = 0 : i64, scratch_operands = 0 : i64, tpu.core_type = #tpu.core_type<tc>, window_params = [{transform_indices = @transform_0, window_bounds = array<i64: 16, 576>}, {pipeline_mode = #tpu.pipeline_mode<synchronous>, transform_indices = @transform_1, window_bounds = array<i64: 576, 64>}, {pipeline_mode = #tpu.pipeline_mode<synchronous>, transform_indices = @transform_2, window_bounds = array<i64: 1, 64>}, {transform_indices = @transform_3, window_bounds = array<i64: 16, 64>}]} {
    %c0 = arith.constant 0 : index
    %c0_0 = arith.constant 0 : index
    %0 = vector.load %arg1[%c0, %c0_0] : memref<16x576xbf16, #tpu.memory_space<vmem>>, vector<16x576xbf16>
    %c0_1 = arith.constant 0 : index
    %c0_2 = arith.constant 0 : index
    %1 = vector.load %arg2[%c0_1, %c0_2] : memref<576x64xbf16, #tpu.memory_space<vmem>>, vector<576x64xbf16>
    %cst = arith.constant dense<0.000000e+00> : vector<16x64xf32>
    %2 = tpu.matmul %0, %1, %cst {dimension_numbers = #tpu.dot_dimension_numbers<[1], [0], [0], [1], [0, 0, 1, 1], [], []>} : vector<16x576xbf16>, vector<576x64xbf16>, vector<16x64xf32> -> vector<16x64xf32>
    %c0_3 = arith.constant 0 : index
    %c0_4 = arith.constant 0 : index
    %3 = vector.load %arg3[%c0_3, %c0_4] : memref<1x64xf32, #tpu.memory_space<vmem>>, vector<1x64xf32>
    %4 = vector.broadcast %3 : vector<1x64xf32> to vector<16x64xf32>
    %5 = arith.addf %2, %4 : vector<16x64xf32>
    %cst_5 = arith.constant 0.000000e+00 : f32
    %6 = vector.broadcast %cst_5 : f32 to vector<16x64xf32>
    %7 = arith.maximumf %5, %6 : vector<16x64xf32>
    %8 = arith.truncf %7 : vector<16x64xf32> to vector<16x64xbf16>
    %c0_6 = arith.constant 0 : index
    %c0_7 = arith.constant 0 : index
    %9 = vector.load %arg4[%c0_6, %c0_7] : memref<16x64xbf16, #tpu.memory_space<vmem>>, vector<16x64xbf16>
    tpu.vector_store %arg4[%c0_6, %c0_7], %8 {strides = array<i32>} : memref<16x64xbf16, #tpu.memory_space<vmem>>, vector<16x64xbf16>,
    return
  }
  func.func @transform_0(%arg0: i32) -> (i32, i32) {
    %c0_i32 = arith.constant 0 : i32
    %c0_i32_0 = arith.constant 0 : i32
    return %arg0, %c0_i32 : i32, i32
  }
  func.func @transform_1(%arg0: i32) -> (i32, i32) {
    %c0_i32 = arith.constant 0 : i32
    %c0_i32_0 = arith.constant 0 : i32
    %c0_i32_1 = arith.constant 0 : i32
    return %c0_i32, %c0_i32_0 : i32, i32
  }
  func.func @transform_2(%arg0: i32) -> (i32, i32) {
    %c0_i32 = arith.constant 0 : i32
    %c0_i32_0 = arith.constant 0 : i32
    %c0_i32_1 = arith.constant 0 : i32
    return %c0_i32, %c0_i32_0 : i32, i32
  }
  func.func @transform_3(%arg0: i32) -> (i32, i32) {
    %c0_i32 = arith.constant 0 : i32
    %c0_i32_0 = arith.constant 0 : i32
    return %arg0, %c0_i32 : i32, i32
  }
}

module attributes {stable_mosaic.version = 11 : i64} {
  func.func @_avgpool_fc_kernel(%arg0: memref<2x1x64xbf16, #tpu.memory_space<vmem>>, %arg1: memref<64x10xf32, #tpu.memory_space<vmem>>, %arg2: memref<1x10xf32, #tpu.memory_space<vmem>>, %arg3: memref<2x10xf32, #tpu.memory_space<vmem>>) attributes {dimension_semantics = [], scalar_prefetch = 0 : i64, scratch_operands = 0 : i64, tpu.core_type = #tpu.core_type<tc>} {
    %c0 = arith.constant 0 : index
    %c0_0 = arith.constant 0 : index
    %c0_1 = arith.constant 0 : index
    %0 = vector.load %arg0[%c0, %c0_0, %c0_1] : memref<2x1x64xbf16, #tpu.memory_space<vmem>>, vector<2x1x64xbf16>
    %1 = arith.extf %0 : vector<2x1x64xbf16> to vector<2x1x64xf32>
    %cst = arith.constant dense<0.000000e+00> : vector<2x64xf32>
    %2 = vector.multi_reduction <add>, %1, %cst [1] : vector<2x1x64xf32> to vector<2x64xf32>
    %cst_2 = arith.constant 1.000000e+00 : f32
    %3 = vector.broadcast %cst_2 : f32 to vector<2x64xf32>
    %4 = arith.mulf %2, %3 : vector<2x64xf32>
    %c0_3 = arith.constant 0 : index
    %c0_4 = arith.constant 0 : index
    %5 = vector.load %arg1[%c0_3, %c0_4] : memref<64x10xf32, #tpu.memory_space<vmem>>, vector<64x10xf32>
    %cst_5 = arith.constant dense<0.000000e+00> : vector<2x10xf32>
    %6 = tpu.matmul %4, %5, %cst_5 {dimension_numbers = #tpu.dot_dimension_numbers<[1], [0], [0], [1], [0, 0, 1, 1], [], []>} : vector<2x64xf32>, vector<64x10xf32>, vector<2x10xf32> -> vector<2x10xf32>
    %c0_6 = arith.constant 0 : index
    %c0_7 = arith.constant 0 : index
    %7 = vector.load %arg2[%c0_6, %c0_7] : memref<1x10xf32, #tpu.memory_space<vmem>>, vector<1x10xf32>
    %8 = vector.broadcast %7 : vector<1x10xf32> to vector<2x10xf32>
    %9 = arith.addf %6, %8 : vector<2x10xf32>
    %c0_8 = arith.constant 0 : index
    %c0_9 = arith.constant 0 : index
    %10 = vector.load %arg3[%c0_8, %c0_9] : memref<2x10xf32, #tpu.memory_space<vmem>>, vector<2x10xf32>
    tpu.vector_store %arg3[%c0_8, %c0_9], %9 {strides = array<i32>} : memref<2x10xf32, #tpu.memory_space<vmem>>, vector<2x10xf32>,
    return
  }
}

</mosaic_0001>

<bundles_post_ra>
// kernel: forward.22
= control target key start
LH: loop header
LB: loop body
LE: loop exit
PB: predicated region body
PF: predicated region fallthrough
CT: control target
= control target key end

     0   :  { %v539_v0 = vmov 0   ;;  %vm186_vm0 = vcmask 154624   ;;  %vm211_vm1 = vcmask 1040384   ;;  %vm212_vm2 = vcmask 1041408   ;;  %s732_s1 = inlined_call_operand.vmem [shape: bf16[147,8], index: 1, kind: input, shape index: {}]   ;;  %s733_s0 = inlined_call_operand.vmem [shape: bf16[128,147], index: 0, kind: input, shape index: {}]   ;;  %s734_s2 = inlined_call_operand.vmem [shape: f32[1,8], index: 2, kind: input, shape index: {}]   ;;  %s735_s3 = inlined_call_operand.vmem [shape: bf16[128,8], index: 3, kind: output, shape index: {}]  }
   0x1   :  { %218 = vmatprep.subr.bf16.mxu0 %v539_v0  ;;  %483 = vmatprep.subr.bf16.mxu1 %v539_v0  ;;  %v505_v1 = vld [vmem:[%s732_s1 + $0x38] sm:$0xff]   ;;  %v506_v2 = vld [vmem:[%s732_s1 + $0x30] sm:$0xff]   ;;  %v507_v3 = vld [vmem:[%s732_s1 + $0x28] sm:$0xff]   ;;  %v540_v10 = vmov 65535   ;;  %vm395_vm3 = vcmask 60416  }
   0x2   :  { %219 = vmatpush1.bf16.msra.mxu0 %v505_v1  ;;  %493 = vmatpush1.bf16.msra.mxu1 %v505_v1  ;;  %v508_v4 = vld [vmem:[%s732_s1 + $0x20] sm:$0xff]   ;;  %v509_v7 = vld [vmem:[%s732_s1 + $0x18] sm:$0xff]   ;;  %v510_v8 = vld [vmem:[%s732_s1 + $0x10] sm:$0xff]   ;;  %v213_v11 = vsel %vm211_vm1, 4294967295, %v540_v10 }
   0x3   :  { %220 = vmatprep.subr.bf16.mxu0 %v539_v0  ;;  %484 = vmatprep.subr.bf16.mxu1 %v539_v0  ;;  %v517_v5 = vld [vmem:[%s733_s0 + $0x4] ss:$8 sps:$4 sm:$0xff]   ;;  %v513_v13 = vld [vmem:[%s732_s1 + $0x48] ss:$0 sps:$4 sm:$0x33]   ;;  %v214_v14 = vsel %vm212_vm2, %v213_v11, 0 }
   0x4   :  { %443 = vmatprep.mubr.msk.bf16.mxu0 %vm186_vm0, %v517_v5  ;;  %v520_v6 = vld [vmem:[%s733_s0 + $0x44] ss:$8 sps:$4 sm:$0xff]   ;;  %v216_v15 = vand.u32 %v513_v13, %v214_v14  ;;  %v515_v17 = vld [vmem:[%s733_s0] ss:$8 sps:$4 sm:$0xff]   ;;  %v521_v19 = vld [vmem:[%s733_s0 + $0x14] ss:$8 sps:$4 sm:$0xff]  }
   0x5   :  { %447 = vmatprep.mubr.msk.bf16.mxu1 %vm186_vm0, %v520_v6  ;;  %v511_v9 = vld [vmem:[%s732_s1 + $0x8] sm:$0xff]   ;;  %v512_v12 = vld [vmem:[%s732_s1] sm:$0xff]   ;;  %v523_v20 = vld [vmem:[%s733_s0 + $0x54] ss:$8 sps:$4 sm:$0xff]  }
   0x6   :  { %221 = vmatpush1.bf16.msra.mxu0 %v506_v2  ;;  %494 = vmatpush1.bf16.msra.mxu1 %v506_v2  ;;  %v514_v16 = vld [vmem:[%s732_s1 + $0x40] sm:$0xff]   ;;  %v525_v21 = vld [vmem:[%s733_s0 + $0x10] ss:$8 sps:$4 sm:$0xff]   ;;  %v533_v27 = vld [vmem:[%s733_s0 + $0x34] ss:$8 sps:$4 sm:$0xff]  }
   0x7   :  { %222 = vmatprep.subr.bf16.mxu0 %v539_v0  ;;  %485 = vmatprep.subr.bf16.mxu1 %v539_v0  ;;  %v518_v18 = vld [vmem:[%s733_s0 + $0x40] ss:$8 sps:$4 sm:$0xff]   ;;  %v526_v22 = vld [vmem:[%s733_s0 + $0x50] ss:$8 sps:$4 sm:$0xff]   ;;  %v527_v23 = vld [vmem:[%s733_s0 + $0x24] ss:$8 sps:$4 sm:$0xff]  }
   0x8   :  { %v529_v24 = vld [vmem:[%s733_s0 + $0x64] ss:$8 sps:$4 sm:$0xff]   ;;  %v531_v25 = vld [vmem:[%s733_s0 + $0x20] ss:$8 sps:$4 sm:$0xff]   ;;  %v535_v28 = vld [vmem:[%s733_s0 + $0x74] ss:$8 sps:$4 sm:$0xff]  }
   0x9   :  { %v532_v26 = vld [vmem:[%s733_s0 + $0x60] ss:$8 sps:$4 sm:$0xff]   ;;  %v537_v29 = vld [vmem:[%s733_s0 + $0x30] ss:$8 sps:$4 sm:$0xff]  }
   0xa   :  { %223 = vmatpush1.bf16.msra.mxu0 %v507_v3  ;;  %495 = vmatpush1.bf16.msra.mxu1 %v507_v3  ;;  %v538_v30 = vld [vmem:[%s733_s0 + $0x70] ss:$8 sps:$4 sm:$0xff]   ;;  %v650_v31 = vld [vmem:[%s734_s2] ss:$0 sm:$0xff] }
   0xb   :  { %224 = vmatprep.subr.bf16.mxu0 %v539_v0  ;;  %486 = vmatprep.subr.bf16.mxu1 %v539_v0 }
   0xe   :  { %225 = vmatpush1.bf16.msra.mxu0 %v508_v4  ;;  %496 = vmatpush1.bf16.msra.mxu1 %v508_v4 }
   0xf   :  { %226 = vmatprep.subr.bf16.mxu0 %v539_v0  ;;  %487 = vmatprep.subr.bf16.mxu1 %v539_v0 }
  0x12   :  { %227 = vmatpush1.bf16.msra.mxu0 %v509_v7  ;;  %497 = vmatpush1.bf16.msra.mxu1 %v509_v7 }
  0x13   :  { %228 = vmatprep.subr.bf16.mxu0 %v539_v0  ;;  %488 = vmatprep.subr.bf16.mxu1 %v539_v0 }
  0x16   :  { %229 = vmatpush1.bf16.msra.mxu0 %v510_v8  ;;  %498 = vmatpush1.bf16.msra.mxu1 %v510_v8 }
  0x17   :  { %230 = vmatprep.subr.bf16.mxu0 %v539_v0  ;;  %489 = vmatprep.subr.bf16.mxu1 %v539_v0 }
  0x1a   :  { %231 = vmatpush1.bf16.msra.mxu0 %v511_v9  ;;  %499 = vmatpush1.bf16.msra.mxu1 %v511_v9 }
  0x1b   :  { %232 = vmatprep.subr.bf16.mxu0 %v539_v0  ;;  %490 = vmatprep.subr.bf16.mxu1 %v539_v0 }
  0x1e   :  { %233 = vmatpush1.bf16.msra.mxu0 %v512_v12  ;;  %500 = vmatpush1.bf16.msra.mxu1 %v512_v12 }
  0x1f   :  { %246 = vmatprep.subr.bf16.mxu0 %v539_v0  ;;  %491 = vmatprep.subr.bf16.mxu1 %v539_v0 }
  0x22   :  { %247 = vmatpush2.bf16.msra.mxu0 %v216_v15  ;;  %501 = vmatpush2.bf16.msra.mxu1 %v216_v15 }
  0x23   :  { %248 = vmatprep.subr.bf16.mxu0 %v539_v0  ;;  %492 = vmatprep.subr.bf16.mxu1 %v539_v0 }
  0x26   :  { %249 = vmatpush2.bf16.msra.mxu0 %v514_v16  ;;  %502 = vmatpush2.bf16.msra.mxu1 %v514_v16 }
  0x29   :  { %251 = vmatmul.mubr.bf16.vlgmr.msra.gmra.mxu0 %v515_v17  ;;  %283 = vmatmul.mubr.bf16.vlgmr.msra.gmra.mxu1 %v518_v18 }
  0x2a   :  { %444 = vmatprep.mubr.msk.bf16.mxu0 %vm186_vm0, %v521_v19  ;;  %448 = vmatprep.mubr.msk.bf16.mxu1 %vm186_vm0, %v523_v20 }
  0x31   :  { %259 = vmatmul.mubr.bf16.gmra.mxu0 %v525_v21  ;;  %291 = vmatmul.mubr.bf16.gmra.mxu1 %v526_v22 }
  0x32   :  { %445 = vmatprep.mubr.msk.bf16.mxu0 %vm186_vm0, %v527_v23  ;;  %449 = vmatprep.mubr.msk.bf16.mxu1 %vm186_vm0, %v529_v24 }
  0x39   :  { %267 = vmatmul.mubr.bf16.gmra.mxu0 %v531_v25  ;;  %299 = vmatmul.mubr.bf16.gmra.mxu1 %v532_v26 }
  0x3a   :  { %446 = vmatprep.mubr.msk.bf16.mxu0 %vm186_vm0, %v533_v27  ;;  %450 = vmatprep.mubr.msk.bf16.mxu1 %vm186_vm0, %v535_v28 }
  0x41   :  { %275 = vmatmul.mubr.bf16.gmra.mxu0 %v537_v29  ;;  %307 = vmatmul.mubr.bf16.gmra.mxu1 %v538_v30 }
  0xe9   :  { %v252_v32 = vpop.f32.mrf.mxu0  ;;  %v284_v33 = vpop.f32.mrf.mxu1 }
  0xea   :  { %v253_v34 = vadd.f32 %v650_v31, %v252_v32  ;;  %v285_v35 = vadd.f32 %v650_v31, %v284_v33 }
  0xeb   :  { %v254_v36 = vpop.f32.mrf.mxu0  ;;  %v286_v37 = vpop.f32.mrf.mxu1 }
  0xec   :  { %v315_v38 = vmax.f32 %v253_v34, 0.0  ;;  %v323_v39 = vmax.f32 %v285_v35, 0.0 }
  0xed   :  { %v255_v40 = vpop.f32.mrf.mxu0  ;;  %v287_v41 = vpop.f32.mrf.mxu1 }
  0xee   :  { %v467_v42 = vpack.c.bf16 %v315_v38, %v315_v38  ;;  %v475_v43 = vpack.c.bf16 %v323_v39, %v323_v39  ;;  %v256_v44 = vadd.f32 %v650_v31, %v255_v40  ;;  %v288_v45 = vadd.f32 %v650_v31, %v287_v41 }
  0xef   :  { %v257_v46 = vpop.f32.mrf.mxu0  ;;  %v289_v47 = vpop.f32.mrf.mxu1 }
  0xf0   :  { %396 = vst.msk [vmem:[%s735_s3] sm:$0xf] %vm395_vm3, %v467_v42  ;;  %404 = vst.msk [vmem:[%s735_s3 + $0x20] sm:$0xf] %vm395_vm3, %v475_v43  ;;  %v316_v48 = vmax.f32 %v256_v44, 0.0  ;;  %v324_v49 = vmax.f32 %v288_v45, 0.0 }
  0xf1   :  { %v260_v50 = vpop.f32.mrf.mxu0  ;;  %v292_v51 = vpop.f32.mrf.mxu1 }
  0xf2   :  { %v468_v52 = vpack.c.bf16 %v316_v48, %v316_v48  ;;  %v476_v53 = vpack.c.bf16 %v324_v49, %v324_v49  ;;  %v261_v54 = vadd.f32 %v650_v31, %v260_v50  ;;  %v293_v55 = vadd.f32 %v650_v31, %v292_v51 }
  0xf3   :  { %v262_v56 = vpop.f32.mrf.mxu0  ;;  %v294_v57 = vpop.f32.mrf.mxu1 }
  0xf4   :  { %397 = vst.msk [vmem:[%s735_s3 + $0x4] sm:$0xf] %vm395_vm3, %v468_v52  ;;  %405 = vst.msk [vmem:[%s735_s3 + $0x24] sm:$0xf] %vm395_vm3, %v476_v53  ;;  %v317_v58 = vmax.f32 %v261_v54, 0.0  ;;  %v325_v59 = vmax.f32 %v293_v55, 0.0 }
  0xf5   :  { %v263_v60 = vpop.f32.mrf.mxu0  ;;  %v295_v61 = vpop.f32.mrf.mxu1 }
  0xf6   :  { %v469_v62 = vpack.c.bf16 %v317_v58, %v317_v58  ;;  %v477_v63 = vpack.c.bf16 %v325_v59, %v325_v59  ;;  %v264_v0 = vadd.f32 %v650_v31, %v263_v60  ;;  %v296_v1 = vadd.f32 %v650_v31, %v295_v61 }
  0xf7   :  { %v265_v2 = vpop.f32.mrf.mxu0  ;;  %v297_v3 = vpop.f32.mrf.mxu1 }
  0xf8   :  { %398 = vst.msk [vmem:[%s735_s3 + $0x8] sm:$0xf] %vm395_vm3, %v469_v62  ;;  %406 = vst.msk [vmem:[%s735_s3 + $0x28] sm:$0xf] %vm395_vm3, %v477_v63  ;;  %v318_v4 = vmax.f32 %v264_v0, 0.0  ;;  %v326_v5 = vmax.f32 %v296_v1, 0.0 }
  0xf9   :  { %v268_v6 = vpop.f32.mrf.mxu0  ;;  %v300_v7 = vpop.f32.mrf.mxu1 }
  0xfa   :  { %v470_v8 = vpack.c.bf16 %v318_v4, %v318_v4  ;;  %v478_v9 = vpack.c.bf16 %v326_v5, %v326_v5  ;;  %v269_v10 = vadd.f32 %v650_v31, %v268_v6  ;;  %v301_v11 = vadd.f32 %v650_v31, %v300_v7 }
  0xfb   :  { %v270_v12 = vpop.f32.mrf.mxu0  ;;  %v302_v13 = vpop.f32.mrf.mxu1 }
  0xfc   :  { %399 = vst.msk [vmem:[%s735_s3 + $0xc] sm:$0xf] %vm395_vm3, %v470_v8  ;;  %407 = vst.msk [vmem:[%s735_s3 + $0x2c] sm:$0xf] %vm395_vm3, %v478_v9  ;;  %v319_v14 = vmax.f32 %v269_v10, 0.0  ;;  %v327_v15 = vmax.f32 %v301_v11, 0.0 }
  0xfd   :  { %v271_v16 = vpop.f32.mrf.mxu0  ;;  %v303_v17 = vpop.f32.mrf.mxu1 }
  0xfe   :  { %v471_v18 = vpack.c.bf16 %v319_v14, %v319_v14  ;;  %v479_v19 = vpack.c.bf16 %v327_v15, %v327_v15  ;;  %v272_v20 = vadd.f32 %v650_v31, %v271_v16  ;;  %v304_v21 = vadd.f32 %v650_v31, %v303_v17 }
  0xff   :  { %v273_v22 = vpop.f32.mrf.mxu0  ;;  %v305_v23 = vpop.f32.mrf.mxu1 }
 0x100   :  { %400 = vst.msk [vmem:[%s735_s3 + $0x10] sm:$0xf] %vm395_vm3, %v471_v18  ;;  %408 = vst.msk [vmem:[%s735_s3 + $0x30] sm:$0xf] %vm395_vm3, %v479_v19  ;;  %v320_v24 = vmax.f32 %v272_v20, 0.0  ;;  %v328_v25 = vmax.f32 %v304_v21, 0.0 }
 0x101   :  { %v276_v26 = vpop.f32.mrf.mxu0  ;;  %v308_v27 = vpop.f32.mrf.mxu1 }
 0x102   :  { %v472_v28 = vpack.c.bf16 %v320_v24, %v320_v24  ;;  %v480_v29 = vpack.c.bf16 %v328_v25, %v328_v25  ;;  %v277_v30 = vadd.f32 %v650_v31, %v276_v26  ;;  %v309_v32 = vadd.f32 %v650_v31, %v308_v27 }
 0x103   :  { %v278_v33 = vpop.f32.mrf.mxu0  ;;  %v310_v34 = vpop.f32.mrf.mxu1 }
 0x104   :  { %401 = vst.msk [vmem:[%s735_s3 + $0x14] sm:$0xf] %vm395_vm3, %v472_v28  ;;  %409 = vst.msk [vmem:[%s735_s3 + $0x34] sm:$0xf] %vm395_vm3, %v480_v29  ;;  %v321_v35 = vmax.f32 %v277_v30, 0.0  ;;  %v329_v36 = vmax.f32 %v309_v32, 0.0 }
 0x105   :  { %v279_v37 = vpop.f32.mrf.mxu0  ;;  %v311_v38 = vpop.f32.mrf.mxu1 }
 0x106   :  { %v473_v39 = vpack.c.bf16 %v321_v35, %v321_v35  ;;  %v481_v40 = vpack.c.bf16 %v329_v36, %v329_v36  ;;  %v280_v41 = vadd.f32 %v650_v31, %v279_v37  ;;  %v312_v42 = vadd.f32 %v650_v31, %v311_v38 }
 0x107   :  { %v281_v43 = vpop.f32.mrf.mxu0  ;;  %v313_v44 = vpop.f32.mrf.mxu1 }
 0x108   :  { %402 = vst.msk [vmem:[%s735_s3 + $0x18] sm:$0xf] %vm395_vm3, %v473_v39  ;;  %410 = vst.msk [vmem:[%s735_s3 + $0x38] sm:$0xf] %vm395_vm3, %v481_v40  ;;  %v322_v45 = vmax.f32 %v280_v41, 0.0  ;;  %v330_v46 = vmax.f32 %v312_v42, 0.0 }
 0x10a   :  { %v474_v47 = vpack.c.bf16 %v322_v45, %v322_v45  ;;  %v482_v48 = vpack.c.bf16 %v330_v46, %v330_v46 }
 0x10c   :  { %403 = vst.msk [vmem:[%s735_s3 + $0x1c] sm:$0xf] %vm395_vm3, %v474_v47  ;;  %411 = vst.msk [vmem:[%s735_s3 + $0x3c] sm:$0xf] %vm395_vm3, %v482_v48 }

// kernel: forward.23
= control target key start
LH: loop header
LB: loop body
LE: loop exit
PB: predicated region body
PF: predicated region fallthrough
CT: control target
= control target key end

     0   :  { %vm84_vm0 = vcmask 60416   ;;  %s259_s0 = inlined_call_operand.vmem [shape: bf16[9,32,8], index: 0, kind: input, shape index: {}]   ;;  %s260_s1 = inlined_call_operand.vmem [shape: bf16[32,8], index: 1, kind: output, shape index: {}]  }
   0x1   :  { %v8_v0 = vld [vmem:[%s259_s0] sm:$0xf]  ;;  %v93_v1 = vld [vmem:[%s259_s0 + $0x10] sm:$0xf]  ;;  %v9_v6 = vld [vmem:[%s259_s0 + $0x4] sm:$0xf] }
   0x2   :  { %v97_v2 = vld [vmem:[%s259_s0 + $0x20] sm:$0xf]  ;;  %v17_v3 = vmax.bf16 %v93_v1, %v8_v0  ;;  %v101_v4 = vld [vmem:[%s259_s0 + $0x30] sm:$0xf]  ;;  %v94_v7 = vld [vmem:[%s259_s0 + $0x14] sm:$0xf] }
   0x3   :  { %v98_v8 = vld [vmem:[%s259_s0 + $0x24] sm:$0xf]  ;;  %v105_v9 = vld [vmem:[%s259_s0 + $0x40] sm:$0xf]  ;;  %v18_v10 = vmax.bf16 %v94_v7, %v9_v6  ;;  %v109_v12 = vld [vmem:[%s259_s0 + $0x50] sm:$0xf] }
   0x4   :  { %v26_v5 = vmax.bf16 %v97_v2, %v17_v3  ;;  %v102_v13 = vld [vmem:[%s259_s0 + $0x34] sm:$0xf]  ;;  %v10_v15 = vld [vmem:[%s259_s0 + $0x8] sm:$0xf]  ;;  %v95_v16 = vld [vmem:[%s259_s0 + $0x18] sm:$0xf] }
   0x5   :  { %v27_v14 = vmax.bf16 %v98_v8, %v18_v10  ;;  %v99_v17 = vld [vmem:[%s259_s0 + $0x28] sm:$0xf]  ;;  %v106_v19 = vld [vmem:[%s259_s0 + $0x44] sm:$0xf]  ;;  %v19_v20 = vmax.bf16 %v95_v16, %v10_v15  ;;  %v113_v21 = vld [vmem:[%s259_s0 + $0x60] sm:$0xf] }
   0x6   :  { %v35_v11 = vmax.bf16 %v101_v4, %v26_v5  ;;  %v110_v23 = vld [vmem:[%s259_s0 + $0x54] sm:$0xf]  ;;  %v103_v24 = vld [vmem:[%s259_s0 + $0x38] sm:$0xf]  ;;  %v11_v27 = vld [vmem:[%s259_s0 + $0xc] sm:$0xf] }
   0x7   :  { %v36_v22 = vmax.bf16 %v102_v13, %v27_v14  ;;  %v28_v26 = vmax.bf16 %v99_v17, %v19_v20  ;;  %v96_v28 = vld [vmem:[%s259_s0 + $0x1c] sm:$0xf]  ;;  %v100_v29 = vld [vmem:[%s259_s0 + $0x2c] sm:$0xf]  ;;  %v117_v30 = vld [vmem:[%s259_s0 + $0x70] sm:$0xf] }
   0x8   :  { %v44_v18 = vmax.bf16 %v105_v9, %v35_v11  ;;  %v107_v32 = vld [vmem:[%s259_s0 + $0x48] sm:$0xf]  ;;  %v20_v33 = vmax.bf16 %v96_v28, %v11_v27  ;;  %v114_v35 = vld [vmem:[%s259_s0 + $0x64] sm:$0xf]  ;;  %v104_v37 = vld [vmem:[%s259_s0 + $0x3c] sm:$0xf] }
   0x9   :  { %v45_v31 = vmax.bf16 %v106_v19, %v36_v22  ;;  %v37_v36 = vmax.bf16 %v103_v24, %v28_v26  ;;  %v121_v38 = vld [vmem:[%s259_s0 + $0x80] sm:$0xf]  ;;  %v111_v40 = vld [vmem:[%s259_s0 + $0x58] sm:$0xf]  ;;  %v118_v43 = vld [vmem:[%s259_s0 + $0x74] sm:$0xf] }
   0xa   :  { %v53_v25 = vmax.bf16 %v109_v12, %v44_v18  ;;  %v29_v41 = vmax.bf16 %v100_v29, %v20_v33  ;;  %v108_v45 = vld [vmem:[%s259_s0 + $0x4c] sm:$0xf]  ;;  %v115_v47 = vld [vmem:[%s259_s0 + $0x68] sm:$0xf]  ;;  %v122_v50 = vld [vmem:[%s259_s0 + $0x84] sm:$0xf] }
   0xb   :  { %v54_v39 = vmax.bf16 %v110_v23, %v45_v31  ;;  %v46_v44 = vmax.bf16 %v107_v32, %v37_v36  ;;  %v112_v52 = vld [vmem:[%s259_s0 + $0x5c] sm:$0xf]  ;;  %v119_v54 = vld [vmem:[%s259_s0 + $0x78] sm:$0xf]  ;;  %v116_v57 = vld [vmem:[%s259_s0 + $0x6c] sm:$0xf] }
   0xc   :  { %v62_v34 = vmax.bf16 %v113_v21, %v53_v25  ;;  %v38_v48 = vmax.bf16 %v104_v37, %v29_v41  ;;  %v123_v59 = vld [vmem:[%s259_s0 + $0x88] sm:$0xf]  ;;  %v120_v62 = vld [vmem:[%s259_s0 + $0x7c] sm:$0xf]  ;;  %v124_v1 = vld [vmem:[%s259_s0 + $0x8c] sm:$0xf] }
   0xd   :  { %v63_v46 = vmax.bf16 %v114_v35, %v54_v39  ;;  %v55_v51 = vmax.bf16 %v111_v40, %v46_v44 }
   0xe   :  { %v71_v42 = vmax.bf16 %v117_v30, %v62_v34  ;;  %v47_v55 = vmax.bf16 %v108_v45, %v38_v48 }
   0xf   :  { %v72_v53 = vmax.bf16 %v118_v43, %v63_v46  ;;  %v64_v56 = vmax.bf16 %v115_v47, %v55_v51 }
  0x10   :  { %v80_v49 = vmax.bf16 %v121_v38, %v71_v42  ;;  %v56_v60 = vmax.bf16 %v112_v52, %v47_v55 }
  0x11   :  { %v81_v58 = vmax.bf16 %v122_v50, %v72_v53  ;;  %v73_v61 = vmax.bf16 %v119_v54, %v64_v56 }
  0x12   :  { %85 = vst.msk [vmem:[%s260_s1] sm:$0xf] %vm84_vm0, %v80_v49  ;;  %v65_v63 = vmax.bf16 %v116_v57, %v56_v60 }
  0x13   :  { %86 = vst.msk [vmem:[%s260_s1 + $0x4] sm:$0xf] %vm84_vm0, %v81_v58  ;;  %v82_v0 = vmax.bf16 %v123_v59, %v73_v61 }
  0x14   :  { %v74_v2 = vmax.bf16 %v120_v62, %v65_v63 }
  0x15   :  { %87 = vst.msk [vmem:[%s260_s1 + $0x8] sm:$0xf] %vm84_vm0, %v82_v0 }
  0x16   :  { %v83_v3 = vmax.bf16 %v124_v1, %v74_v2 }
  0x18   :  { %88 = vst.msk [vmem:[%s260_s1 + $0xc] sm:$0xf] %vm84_vm0, %v83_v3 }

// kernel: forward.24
= control target key start
LH: loop header
LB: loop body
LE: loop exit
PB: predicated region body
PF: predicated region fallthrough
CT: control target
= control target key end

     0   :  { %vm79_vm0 = vcmask 1043456   ;;  %vm72_vm1 = vcmask 588800   ;;  %vm152_vm2 = vcmask 60416   ;;  %s264_s1 = inlined_call_operand.vmem [shape: bf16[72,8], index: 1, kind: input, shape index: {}]   ;;  %s265_s0 = inlined_call_operand.vmem [shape: bf16[32,72], index: 0, kind: input, shape index: {}]   ;;  %s266_s2 = inlined_call_operand.vmem [shape: f32[1,8], index: 2, kind: input, shape index: {}]   ;;  %s267_s3 = inlined_call_operand.vmem [shape: bf16[32,8], index: 3, kind: output, shape index: {}]  }
   0x1   :  { %v201_v0 = vld [vmem:[%s264_s1 + $0x20] ss:$0 sps:$4 sm:$0xff]   ;;  %v202_v1 = vld [vmem:[%s264_s1 + $0x18] sm:$0xff]   ;;  %v203_v3 = vld [vmem:[%s264_s1 + $0x10] sm:$0xff]  }
   0x2   :  { %200 = vmatprep.subr.msk.bf16.mxu0 %vm79_vm0, %v201_v0  ;;  %v81_v2 = vsel %vm79_vm0, %v201_v0, 0  ;;  %v206_v4 = vld [vmem:[%s265_s0] sm:$0xff]   ;;  %v204_v5 = vld [vmem:[%s264_s1 + $0x8] sm:$0xff]  }
   0x3   :  { %187 = vmatpush3.bf16.msra.mxu0 %v81_v2  ;;  %196 = vmatprep.mubr.msk.bf16.mxu0 %vm72_vm1, %v206_v4  ;;  %v205_v6 = vld [vmem:[%s264_s1] sm:$0xff]   ;;  %v207_v7 = vld [vmem:[%s265_s0 + $0x8] sm:$0xff]  }
   0x4   :  { %188 = vmatprep.subr.bf16.mxu0 %v202_v1  ;;  %v161_v8 = vld [vmem:[%s266_s2] ss:$0 sm:$0xff] }
   0x7   :  { %189 = vmatpush3.bf16.msra.mxu0 %v202_v1 }
   0x8   :  { %190 = vmatprep.subr.bf16.mxu0 %v203_v3 }
   0xb   :  { %191 = vmatpush3.bf16.msra.mxu0 %v203_v3 }
   0xc   :  { %192 = vmatprep.subr.bf16.mxu0 %v204_v5 }
   0xf   :  { %193 = vmatpush3.bf16.msra.mxu0 %v204_v5 }
  0x10   :  { %194 = vmatprep.subr.bf16.mxu0 %v205_v6 }
  0x13   :  { %195 = vmatpush3.bf16.msra.mxu0 %v205_v6 }
  0x16   :  { %197 = vmatmul.mubr.msk.bf16.vlgmr.msra.gmra.mxu0 %vm72_vm1, %v207_v7 }
  0xd6   :  { %v198_v9 = vpop.f32.mrf.mxu0 }
  0xd7   :  { %v126_v10 = vadd.f32 %v198_v9, %v161_v8 }
  0xd8   :  { %v117_v11 = vpop.f32.mrf.mxu0 }
  0xd9   :  { %v134_v12 = vmax.f32 %v126_v10, 0.0  ;;  %v118_v13 = vadd.f32 %v161_v8, %v117_v11 }
  0xda   :  { %v199_v14 = vpop.f32.mrf.mxu0 }
  0xdb   :  { %v177_v15 = vpack.c.bf16 %v134_v12, %v134_v12  ;;  %v132_v16 = vmax.f32 %v118_v13, 0.0  ;;  %v129_v17 = vadd.f32 %v199_v14, %v161_v8 }
  0xdc   :  { %v120_v18 = vpop.f32.mrf.mxu0 }
  0xdd   :  { %155 = vst.msk [vmem:[%s267_s3 + $0x8] sm:$0xf] %vm152_vm2, %v177_v15  ;;  %v175_v19 = vpack.c.bf16 %v132_v16, %v132_v16  ;;  %v135_v20 = vmax.f32 %v129_v17, 0.0  ;;  %v121_v21 = vadd.f32 %v161_v8, %v120_v18 }
  0xdf   :  { %153 = vst.msk [vmem:[%s267_s3] sm:$0xf] %vm152_vm2, %v175_v19  ;;  %v178_v22 = vpack.c.bf16 %v135_v20, %v135_v20  ;;  %v133_v23 = vmax.f32 %v121_v21, 0.0 }
  0xe1   :  { %156 = vst.msk [vmem:[%s267_s3 + $0xc] sm:$0xf] %vm152_vm2, %v178_v22  ;;  %v176_v24 = vpack.c.bf16 %v133_v23, %v133_v23 }
  0xe3   :  { %154 = vst.msk [vmem:[%s267_s3 + $0x4] sm:$0xf] %vm152_vm2, %v176_v24 }

// kernel: forward.25
= control target key start
LH: loop header
LB: loop body
LE: loop exit
PB: predicated region body
PF: predicated region fallthrough
CT: control target
= control target key end

     0   :  { %vm82_vm0 = vcmask 1043456   ;;  %vm75_vm1 = vcmask 588800   ;;  %vm167_vm2 = vcmask 60416   ;;  %s299_s1 = inlined_call_operand.vmem [shape: bf16[72,8], index: 1, kind: input, shape index: {}]   ;;  %s300_s0 = inlined_call_operand.vmem [shape: bf16[32,72], index: 0, kind: input, shape index: {}]   ;;  %s301_s3 = inlined_call_operand.vmem [shape: bf16[32,8], index: 3, kind: input, shape index: {}]   ;;  %s302_s2 = inlined_call_operand.vmem [shape: f32[1,8], index: 2, kind: input, shape index: {}]   ;;  %s303_s4 = inlined_call_operand.vmem [shape: bf16[32,8], index: 4, kind: output, shape index: {}]  }
   0x1   :  { %v225_v0 = vld [vmem:[%s299_s1 + $0x20] ss:$0 sps:$4 sm:$0xff]   ;;  %v226_v1 = vld [vmem:[%s299_s1 + $0x18] sm:$0xff]   ;;  %v227_v3 = vld [vmem:[%s299_s1 + $0x10] sm:$0xff]  }
   0x2   :  { %224 = vmatprep.subr.msk.bf16.mxu0 %vm82_vm0, %v225_v0  ;;  %v84_v2 = vsel %vm82_vm0, %v225_v0, 0  ;;  %v230_v4 = vld [vmem:[%s300_s0] sm:$0xff]   ;;  %v228_v5 = vld [vmem:[%s299_s1 + $0x8] sm:$0xff]  }
   0x3   :  { %211 = vmatpush3.bf16.msra.mxu0 %v84_v2  ;;  %220 = vmatprep.mubr.msk.bf16.mxu0 %vm75_vm1, %v230_v4  ;;  %v229_v6 = vld [vmem:[%s299_s1] sm:$0xff]   ;;  %v231_v7 = vld [vmem:[%s300_s0 + $0x8] sm:$0xff]  }
   0x4   :  { %212 = vmatprep.subr.bf16.mxu0 %v226_v1  ;;  %v202_v8 = vld [vmem:[%s301_s3 + $0x8] sm:$0xff]   ;;  %v176_v9 = vld [vmem:[%s302_s2] ss:$0 sm:$0xff] }
   0x5   :  { %v195_v10 = vld [vmem:[%s301_s3] sm:$0xff]   ;;  %v200_v11 = vunpack.c.l.bf16 %v202_v8  ;;  %v201_v18 = vunpack.c.h.bf16 %v202_v8 }
   0x6   :  { %v196_v14 = vunpack.c.l.bf16 %v195_v10  ;;  %v197_v23 = vunpack.c.h.bf16 %v195_v10 }
   0x7   :  { %213 = vmatpush3.bf16.msra.mxu0 %v226_v1 }
   0x8   :  { %214 = vmatprep.subr.bf16.mxu0 %v227_v3 }
   0xb   :  { %215 = vmatpush3.bf16.msra.mxu0 %v227_v3 }
   0xc   :  { %216 = vmatprep.subr.bf16.mxu0 %v228_v5 }
   0xf   :  { %217 = vmatpush3.bf16.msra.mxu0 %v228_v5 }
  0x10   :  { %218 = vmatprep.subr.bf16.mxu0 %v229_v6 }
  0x13   :  { %219 = vmatpush3.bf16.msra.mxu0 %v229_v6 }
  0x16   :  { %221 = vmatmul.mubr.msk.bf16.vlgmr.msra.gmra.mxu0 %vm75_vm1, %v231_v7 }
  0xd6   :  { %v222_v12 = vpop.f32.mrf.mxu0 }
  0xd7   :  { %v129_v13 = vadd.f32 %v222_v12, %v176_v9 }
  0xd8   :  { %v120_v15 = vpop.f32.mrf.mxu0 }
  0xd9   :  { %v145_v16 = vadd.f32 %v200_v11, %v129_v13  ;;  %v121_v17 = vadd.f32 %v176_v9, %v120_v15 }
  0xda   :  { %v223_v19 = vpop.f32.mrf.mxu0 }
  0xdb   :  { %v149_v20 = vmax.f32 %v145_v16, 0.0  ;;  %v143_v21 = vadd.f32 %v196_v14, %v121_v17  ;;  %v132_v22 = vadd.f32 %v223_v19, %v176_v9 }
  0xdc   :  { %v123_v24 = vpop.f32.mrf.mxu0 }
  0xdd   :  { %v192_v25 = vpack.c.bf16 %v149_v20, %v149_v20  ;;  %v147_v26 = vmax.f32 %v143_v21, 0.0  ;;  %v146_v27 = vadd.f32 %v201_v18, %v132_v22  ;;  %v124_v28 = vadd.f32 %v176_v9, %v123_v24 }
  0xdf   :  { %170 = vst.msk [vmem:[%s303_s4 + $0x8] sm:$0xf] %vm167_vm2, %v192_v25  ;;  %v190_v29 = vpack.c.bf16 %v147_v26, %v147_v26  ;;  %v150_v30 = vmax.f32 %v146_v27, 0.0  ;;  %v144_v31 = vadd.f32 %v197_v23, %v124_v28 }
  0xe1   :  { %168 = vst.msk [vmem:[%s303_s4] sm:$0xf] %vm167_vm2, %v190_v29  ;;  %v193_v32 = vpack.c.bf16 %v150_v30, %v150_v30  ;;  %v148_v33 = vmax.f32 %v144_v31, 0.0 }
  0xe3   :  { %171 = vst.msk [vmem:[%s303_s4 + $0xc] sm:$0xf] %vm167_vm2, %v193_v32  ;;  %v191_v34 = vpack.c.bf16 %v148_v33, %v148_v33 }
  0xe5   :  { %169 = vst.msk [vmem:[%s303_s4 + $0x4] sm:$0xf] %vm167_vm2, %v191_v34 }

// kernel: forward.28
= control target key start
LH: loop header
LB: loop body
LE: loop exit
PB: predicated region body
PF: predicated region fallthrough
CT: control target
= control target key end

     0   :  { %vm69_vm0 = vcmask 1043456   ;;  %v171_v0 = vmov 0.0   ;;  %vm172_vm1 = vmmov 0   ;;  %vm65_vm2 = vcmask 588800   ;;  %s220_s1 = inlined_call_operand.vmem [shape: bf16[72,16], index: 1, kind: input, shape index: {}]   ;;  %s221_s0 = inlined_call_operand.vmem [shape: bf16[16,72], index: 0, kind: input, shape index: {}]   ;;  %s222_s2 = inlined_call_operand.vmem [shape: f32[1,16], index: 2, kind: input, shape index: {}]   ;;  %s223_s3 = inlined_call_operand.vmem [shape: bf16[16,16], index: 3, kind: output, shape index: {}]  }
   0x1   :  { %149 = vmatprep.subr.bf16.mxu0 %v171_v0  ;;  %v165_v1 = vld [vmem:[%s220_s1 + $0x20] ss:$0 sps:$4 sm:$0xff]   ;;  %159 = vmatprep.mubr.msk.bf16.mxu0 %vm172_vm1, %v171_v0  ;;  %v166_v3 = vld [vmem:[%s220_s1 + $0x18] sm:$0xff]   ;;  %v167_v4 = vld [vmem:[%s220_s1 + $0x10] sm:$0xff]   ;;  %vm124_vm3 = vcmask 125952  }
   0x2   :  { %v71_v2 = vsel %vm69_vm0, %v165_v1, 0  ;;  %v168_v5 = vld [vmem:[%s220_s1 + $0x8] sm:$0xff]   ;;  %v169_v6 = vld [vmem:[%s220_s1] sm:$0xff]  }
   0x3   :  { %150 = vmatpush3.bf16.msra.mxu0 %v71_v2  ;;  %v170_v7 = vld [vmem:[%s221_s0] sm:$0xff]  }
   0x4   :  { %151 = vmatprep.subr.bf16.mxu0 %v171_v0  ;;  %v131_v8 = vld [vmem:[%s222_s2] ss:$0 sm:$0xff] }
   0x7   :  { %152 = vmatpush3.bf16.msra.mxu0 %v166_v3 }
   0x8   :  { %153 = vmatprep.subr.bf16.mxu0 %v171_v0 }
   0xb   :  { %154 = vmatpush3.bf16.msra.mxu0 %v167_v4 }
   0xc   :  { %155 = vmatprep.subr.bf16.mxu0 %v171_v0 }
   0xf   :  { %156 = vmatpush3.bf16.msra.mxu0 %v168_v5 }
  0x10   :  { %157 = vmatprep.subr.bf16.mxu0 %v171_v0 }
  0x13   :  { %158 = vmatpush3.bf16.msra.mxu0 %v169_v6 }
  0x16   :  { %160 = vmatmul.mubr.msk.bf16.vlgmr.msra.gmra.mxu0 %vm65_vm2, %v170_v7 }
  0xd6   :  { %v107_v9 = vpop.f32.mrf.mxu0 }
  0xd7   :  { %v108_v10 = vadd.f32 %v131_v8, %v107_v9 }
  0xd8   :  { %v161_v11 = vpop.f32.mrf.mxu0 }
  0xd9   :  { %v114_v12 = vmax.f32 %v108_v10, 0.0 }
  0xda   :  { %v110_v13 = vpop.f32.mrf.mxu0 }
  0xdb   :  { %v141_v14 = vpack.c.bf16 %v114_v12, %v114_v12  ;;  %v111_v15 = vadd.f32 %v131_v8, %v110_v13 }
  0xdc   :  { %v162_v16 = vpop.f32.mrf.mxu0 }
  0xdd   :  { %125 = vst.msk [vmem:[%s223_s3] sm:$0xf] %vm124_vm3, %v141_v14  ;;  %v115_v17 = vmax.f32 %v111_v15, 0.0 }
  0xdf   :  { %v142_v18 = vpack.c.bf16 %v115_v17, %v115_v17 }
  0xe1   :  { %126 = vst.msk [vmem:[%s223_s3 + $0x4] sm:$0xf] %vm124_vm3, %v142_v18 }

// kernel: forward.29
= control target key start
LH: loop header
LB: loop body
LE: loop exit
PB: predicated region body
PF: predicated region fallthrough
CT: control target
= control target key end

     0   :  { %vm34_vm0 = vcmask 1043456   ;;  %v112_v0 = vmov 0.0   ;;  %vm113_vm1 = vmmov 0   ;;  %vm30_vm2 = vcmask 64512   ;;  %s149_s1 = inlined_call_operand.vmem [shape: bf16[8,16], index: 1, kind: input, shape index: {}]   ;;  %s150_s0 = inlined_call_operand.vmem [shape: bf16[16,8], index: 0, kind: input, shape index: {}]   ;;  %s151_s2 = inlined_call_operand.vmem [shape: f32[1,16], index: 2, kind: input, shape index: {}]   ;;  %s152_s3 = inlined_call_operand.vmem [shape: bf16[16,16], index: 3, kind: output, shape index: {}]  }
   0x1   :  { %103 = vmatprep.subr.bf16.mxu0 %v112_v0  ;;  %v17_v1 = vld [vmem:[%s149_s1] sm:$0xf]  ;;  %105 = vmatprep.mubr.msk.bf16.mxu0 %vm113_vm1, %v112_v0  ;;  %vm87_vm3 = vcmask 125952  }
   0x2   :  { %v36_v2 = vsel %vm34_vm0, %v17_v1, 0  ;;  %v111_v3 = vld [vmem:[%s150_s0] sm:$0xff]  }
   0x3   :  { %104 = vmatpush3.bf16.msra.mxu0 %v36_v2  ;;  %v94_v4 = vld [vmem:[%s151_s2] ss:$0 sm:$0xff] }
   0x6   :  { %106 = vmatmul.mubr.msk.bf16.vlgmr.msra.gmra.mxu0 %vm30_vm2, %v111_v3 }
  0xc6   :  { %v72_v5 = vpop.f32.mrf.mxu0 }
  0xc7   :  { %v73_v6 = vadd.f32 %v94_v4, %v72_v5 }
  0xc8   :  { %v107_v7 = vpop.f32.mrf.mxu0 }
  0xc9   :  { %v99_v8 = vpack.c.bf16 %v73_v6, %v73_v6 }
  0xca   :  { %v75_v9 = vpop.f32.mrf.mxu0 }
  0xcb   :  { %88 = vst.msk [vmem:[%s152_s3] sm:$0xf] %vm87_vm3, %v99_v8  ;;  %v76_v10 = vadd.f32 %v94_v4, %v75_v9 }
  0xcc   :  { %v108_v11 = vpop.f32.mrf.mxu0 }
  0xcd   :  { %v100_v12 = vpack.c.bf16 %v76_v10, %v76_v10 }
  0xcf   :  { %89 = vst.msk [vmem:[%s152_s3 + $0x4] sm:$0xf] %vm87_vm3, %v100_v12 }

// kernel: forward.31
= control target key start
LH: loop header
LB: loop body
LE: loop exit
PB: predicated region body
PF: predicated region fallthrough
CT: control target
= control target key end

     0   :  { %v197_v0 = vmov 0   ;;  %vm105_vm0 = vcmask 130048   ;;  %vm160_vm1 = vcmask 125952   ;;  %s260_s1 = inlined_call_operand.vmem [shape: bf16[144,16], index: 1, kind: input, shape index: {}]   ;;  %s261_s0 = inlined_call_operand.vmem [shape: bf16[16,144], index: 0, kind: input, shape index: {}]   ;;  %s262_s2 = inlined_call_operand.vmem [shape: f32[1,16], index: 2, kind: input, shape index: {}]   ;;  %s263_s3 = inlined_call_operand.vmem [shape: bf16[16,16], index: 3, kind: output, shape index: {}]  }
   0x1   :  { %109 = vmatprep.subr.bf16.mxu0 %v197_v0  ;;  %v185_v1 = vld [vmem:[%s260_s1 + $0x38] sm:$0xff]   ;;  %v186_v2 = vld [vmem:[%s260_s1 + $0x30] sm:$0xff]   ;;  %v187_v3 = vld [vmem:[%s260_s1 + $0x28] sm:$0xff]  }
   0x2   :  { %110 = vmatpush1.bf16.msra.mxu0 %v185_v1  ;;  %v188_v4 = vld [vmem:[%s260_s1 + $0x20] sm:$0xff]   ;;  %v189_v6 = vld [vmem:[%s260_s1 + $0x18] sm:$0xff]   ;;  %v190_v7 = vld [vmem:[%s260_s1 + $0x10] sm:$0xff]  }
   0x3   :  { %111 = vmatprep.subr.bf16.mxu0 %v197_v0  ;;  %v196_v5 = vld [vmem:[%s261_s0 + $0x4] ss:$8 sps:$4 sm:$0xff]   ;;  %v194_v11 = vld [vmem:[%s261_s0] ss:$8 sps:$4 sm:$0xff]  }
   0x4   :  { %179 = vmatprep.mubr.msk.bf16.mxu0 %vm105_vm0, %v196_v5  ;;  %v191_v8 = vld [vmem:[%s260_s1 + $0x8] sm:$0xff]   ;;  %v192_v9 = vld [vmem:[%s260_s1] sm:$0xff]  }
   0x5   :  { %v193_v10 = vld [vmem:[%s260_s1 + $0x40] sm:$0xff]  }
   0x6   :  { %112 = vmatpush1.bf16.msra.mxu0 %v186_v2  ;;  %v167_v12 = vld [vmem:[%s262_s2] ss:$0 sm:$0xff] }
   0x7   :  { %113 = vmatprep.subr.bf16.mxu0 %v197_v0 }
   0xa   :  { %114 = vmatpush1.bf16.msra.mxu0 %v187_v3 }
   0xb   :  { %115 = vmatprep.subr.bf16.mxu0 %v197_v0 }
   0xe   :  { %116 = vmatpush1.bf16.msra.mxu0 %v188_v4 }
   0xf   :  { %117 = vmatprep.subr.bf16.mxu0 %v197_v0 }
  0x12   :  { %118 = vmatpush1.bf16.msra.mxu0 %v189_v6 }
  0x13   :  { %119 = vmatprep.subr.bf16.mxu0 %v197_v0 }
  0x16   :  { %120 = vmatpush1.bf16.msra.mxu0 %v190_v7 }
  0x17   :  { %121 = vmatprep.subr.bf16.mxu0 %v197_v0 }
  0x1a   :  { %122 = vmatpush1.bf16.msra.mxu0 %v191_v8 }
  0x1b   :  { %123 = vmatprep.subr.bf16.mxu0 %v197_v0 }
  0x1e   :  { %124 = vmatpush1.bf16.msra.mxu0 %v192_v9 }
  0x1f   :  { %139 = vmatprep.subr.bf16.mxu0 %v197_v0 }
  0x22   :  { %140 = vmatpush2.bf16.msra.mxu0 %v193_v10 }
  0x25   :  { %142 = vmatmul.mubr.bf16.vlgmr.msra.gmra.mxu0 %v194_v11 }
  0xe5   :  { %v143_v13 = vpop.f32.mrf.mxu0 }
  0xe6   :  { %v144_v14 = vadd.f32 %v167_v12, %v143_v13 }
  0xe7   :  { %v145_v15 = vpop.f32.mrf.mxu0 }
  0xe8   :  { %v150_v16 = vmax.f32 %v144_v14, 0.0 }
  0xe9   :  { %v146_v17 = vpop.f32.mrf.mxu0 }
  0xea   :  { %v182_v18 = vpack.c.bf16 %v150_v16, %v150_v16  ;;  %v147_v19 = vadd.f32 %v167_v12, %v146_v17 }
  0xeb   :  { %v148_v20 = vpop.f32.mrf.mxu0 }
  0xec   :  { %161 = vst.msk [vmem:[%s263_s3] sm:$0xf] %vm160_vm1, %v182_v18  ;;  %v151_v21 = vmax.f32 %v147_v19, 0.0 }
  0xee   :  { %v183_v22 = vpack.c.bf16 %v151_v21, %v151_v21 }
  0xf0   :  { %162 = vst.msk [vmem:[%s263_s3 + $0x4] sm:$0xf] %vm160_vm1, %v183_v22 }

// kernel: forward.30
= control target key start
LH: loop header
LB: loop body
LE: loop exit
PB: predicated region body
PF: predicated region fallthrough
CT: control target
= control target key end

     0   :  { %v210_v0 = vmov 0   ;;  %vm108_vm0 = vcmask 130048   ;;  %vm169_vm1 = vcmask 125952   ;;  %s281_s1 = inlined_call_operand.vmem [shape: bf16[144,16], index: 1, kind: input, shape index: {}]   ;;  %s282_s0 = inlined_call_operand.vmem [shape: bf16[16,144], index: 0, kind: input, shape index: {}]   ;;  %s283_s3 = inlined_call_operand.vmem [shape: bf16[16,16], index: 3, kind: input, shape index: {}]   ;;  %s284_s2 = inlined_call_operand.vmem [shape: f32[1,16], index: 2, kind: input, shape index: {}]   ;;  %s285_s4 = inlined_call_operand.vmem [shape: bf16[16,16], index: 4, kind: output, shape index: {}]  }
   0x1   :  { %112 = vmatprep.subr.bf16.mxu0 %v210_v0  ;;  %v198_v1 = vld [vmem:[%s281_s1 + $0x38] sm:$0xff]   ;;  %v199_v2 = vld [vmem:[%s281_s1 + $0x30] sm:$0xff]   ;;  %v200_v3 = vld [vmem:[%s281_s1 + $0x28] sm:$0xff]  }
   0x2   :  { %113 = vmatpush1.bf16.msra.mxu0 %v198_v1  ;;  %v201_v4 = vld [vmem:[%s281_s1 + $0x20] sm:$0xff]   ;;  %v202_v6 = vld [vmem:[%s281_s1 + $0x18] sm:$0xff]   ;;  %v203_v7 = vld [vmem:[%s281_s1 + $0x10] sm:$0xff]  }
   0x3   :  { %114 = vmatprep.subr.bf16.mxu0 %v210_v0  ;;  %v209_v5 = vld [vmem:[%s282_s0 + $0x4] ss:$8 sps:$4 sm:$0xff]   ;;  %v207_v11 = vld [vmem:[%s282_s0] ss:$8 sps:$4 sm:$0xff]  }
   0x4   :  { %188 = vmatprep.mubr.msk.bf16.mxu0 %vm108_vm0, %v209_v5  ;;  %v204_v8 = vld [vmem:[%s281_s1 + $0x8] sm:$0xff]   ;;  %v205_v9 = vld [vmem:[%s281_s1] sm:$0xff]  }
   0x5   :  { %v206_v10 = vld [vmem:[%s281_s1 + $0x40] sm:$0xff]  }
   0x6   :  { %115 = vmatpush1.bf16.msra.mxu0 %v199_v2  ;;  %v194_v12 = vld [vmem:[%s283_s3] sm:$0xff]  }
   0x7   :  { %116 = vmatprep.subr.bf16.mxu0 %v210_v0  ;;  %v176_v13 = vld [vmem:[%s284_s2] ss:$0 sm:$0xff]  ;;  %v195_v14 = vunpack.c.l.bf16 %v194_v12  ;;  %v196_v19 = vunpack.c.h.bf16 %v194_v12 }
   0xa   :  { %117 = vmatpush1.bf16.msra.mxu0 %v200_v3 }
   0xb   :  { %118 = vmatprep.subr.bf16.mxu0 %v210_v0 }
   0xe   :  { %119 = vmatpush1.bf16.msra.mxu0 %v201_v4 }
   0xf   :  { %120 = vmatprep.subr.bf16.mxu0 %v210_v0 }
  0x12   :  { %121 = vmatpush1.bf16.msra.mxu0 %v202_v6 }
  0x13   :  { %122 = vmatprep.subr.bf16.mxu0 %v210_v0 }
  0x16   :  { %123 = vmatpush1.bf16.msra.mxu0 %v203_v7 }
  0x17   :  { %124 = vmatprep.subr.bf16.mxu0 %v210_v0 }
  0x1a   :  { %125 = vmatpush1.bf16.msra.mxu0 %v204_v8 }
  0x1b   :  { %126 = vmatprep.subr.bf16.mxu0 %v210_v0 }
  0x1e   :  { %127 = vmatpush1.bf16.msra.mxu0 %v205_v9 }
  0x1f   :  { %142 = vmatprep.subr.bf16.mxu0 %v210_v0 }
  0x22   :  { %143 = vmatpush2.bf16.msra.mxu0 %v206_v10 }
  0x25   :  { %145 = vmatmul.mubr.bf16.vlgmr.msra.gmra.mxu0 %v207_v11 }
  0xe5   :  { %v146_v15 = vpop.f32.mrf.mxu0 }
  0xe6   :  { %v147_v16 = vadd.f32 %v176_v13, %v146_v15 }
  0xe7   :  { %v148_v17 = vpop.f32.mrf.mxu0 }
  0xe8   :  { %v157_v18 = vadd.f32 %v195_v14, %v147_v16 }
  0xe9   :  { %v149_v20 = vpop.f32.mrf.mxu0 }
  0xea   :  { %v159_v21 = vmax.f32 %v157_v18, 0.0  ;;  %v150_v22 = vadd.f32 %v176_v13, %v149_v20 }
  0xeb   :  { %v151_v23 = vpop.f32.mrf.mxu0 }
  0xec   :  { %v191_v24 = vpack.c.bf16 %v159_v21, %v159_v21  ;;  %v158_v25 = vadd.f32 %v196_v19, %v150_v22 }
  0xee   :  { %170 = vst.msk [vmem:[%s285_s4] sm:$0xf] %vm169_vm1, %v191_v24  ;;  %v160_v26 = vmax.f32 %v158_v25, 0.0 }
  0xf0   :  { %v192_v27 = vpack.c.bf16 %v160_v26, %v160_v26 }
  0xf2   :  { %171 = vst.msk [vmem:[%s285_s4 + $0x4] sm:$0xf] %vm169_vm1, %v192_v27 }

// kernel: forward.33
= control target key start
LH: loop header
LB: loop body
LE: loop exit
PB: predicated region body
PF: predicated region fallthrough
CT: control target
= control target key end

     0   :  { %v197_v0 = vmov 0   ;;  %vm105_vm0 = vcmask 130048   ;;  %vm160_vm1 = vcmask 257024   ;;  %s260_s1 = inlined_call_operand.vmem [shape: bf16[144,32], index: 1, kind: input, shape index: {}]   ;;  %s261_s0 = inlined_call_operand.vmem [shape: bf16[16,144], index: 0, kind: input, shape index: {}]   ;;  %s262_s2 = inlined_call_operand.vmem [shape: f32[1,32], index: 2, kind: input, shape index: {}]   ;;  %s263_s3 = inlined_call_operand.vmem [shape: bf16[16,32], index: 3, kind: output, shape index: {}]  }
   0x1   :  { %109 = vmatprep.subr.bf16.mxu0 %v197_v0  ;;  %v185_v1 = vld [vmem:[%s260_s1 + $0x38] sm:$0xff]   ;;  %v186_v2 = vld [vmem:[%s260_s1 + $0x30] sm:$0xff]   ;;  %v187_v3 = vld [vmem:[%s260_s1 + $0x28] sm:$0xff]  }
   0x2   :  { %110 = vmatpush1.bf16.msra.mxu0 %v185_v1  ;;  %v188_v4 = vld [vmem:[%s260_s1 + $0x20] sm:$0xff]   ;;  %v189_v6 = vld [vmem:[%s260_s1 + $0x18] sm:$0xff]   ;;  %v190_v7 = vld [vmem:[%s260_s1 + $0x10] sm:$0xff]  }
   0x3   :  { %111 = vmatprep.subr.bf16.mxu0 %v197_v0  ;;  %v196_v5 = vld [vmem:[%s261_s0 + $0x4] ss:$8 sps:$4 sm:$0xff]   ;;  %v194_v11 = vld [vmem:[%s261_s0] ss:$8 sps:$4 sm:$0xff]  }
   0x4   :  { %179 = vmatprep.mubr.msk.bf16.mxu0 %vm105_vm0, %v196_v5  ;;  %v191_v8 = vld [vmem:[%s260_s1 + $0x8] sm:$0xff]   ;;  %v192_v9 = vld [vmem:[%s260_s1] sm:$0xff]  }
   0x5   :  { %v193_v10 = vld [vmem:[%s260_s1 + $0x40] sm:$0xff]  }
   0x6   :  { %112 = vmatpush1.bf16.msra.mxu0 %v186_v2  ;;  %v167_v12 = vld [vmem:[%s262_s2] ss:$0 sm:$0xff] }
   0x7   :  { %113 = vmatprep.subr.bf16.mxu0 %v197_v0 }
   0xa   :  { %114 = vmatpush1.bf16.msra.mxu0 %v187_v3 }
   0xb   :  { %115 = vmatprep.subr.bf16.mxu0 %v197_v0 }
   0xe   :  { %116 = vmatpush1.bf16.msra.mxu0 %v188_v4 }
   0xf   :  { %117 = vmatprep.subr.bf16.mxu0 %v197_v0 }
  0x12   :  { %118 = vmatpush1.bf16.msra.mxu0 %v189_v6 }
  0x13   :  { %119 = vmatprep.subr.bf16.mxu0 %v197_v0 }
  0x16   :  { %120 = vmatpush1.bf16.msra.mxu0 %v190_v7 }
  0x17   :  { %121 = vmatprep.subr.bf16.mxu0 %v197_v0 }
  0x1a   :  { %122 = vmatpush1.bf16.msra.mxu0 %v191_v8 }
  0x1b   :  { %123 = vmatprep.subr.bf16.mxu0 %v197_v0 }
  0x1e   :  { %124 = vmatpush1.bf16.msra.mxu0 %v192_v9 }
  0x1f   :  { %139 = vmatprep.subr.bf16.mxu0 %v197_v0 }
  0x22   :  { %140 = vmatpush2.bf16.msra.mxu0 %v193_v10 }
  0x25   :  { %142 = vmatmul.mubr.bf16.vlgmr.msra.gmra.mxu0 %v194_v11 }
  0xe5   :  { %v143_v13 = vpop.f32.mrf.mxu0 }
  0xe6   :  { %v144_v14 = vadd.f32 %v167_v12, %v143_v13 }
  0xe7   :  { %v145_v15 = vpop.f32.mrf.mxu0 }
  0xe8   :  { %v150_v16 = vmax.f32 %v144_v14, 0.0 }
  0xe9   :  { %v146_v17 = vpop.f32.mrf.mxu0 }
  0xea   :  { %v182_v18 = vpack.c.bf16 %v150_v16, %v150_v16  ;;  %v147_v19 = vadd.f32 %v167_v12, %v146_v17 }
  0xeb   :  { %v148_v20 = vpop.f32.mrf.mxu0 }
  0xec   :  { %161 = vst.msk [vmem:[%s263_s3] sm:$0xf] %vm160_vm1, %v182_v18  ;;  %v151_v21 = vmax.f32 %v147_v19, 0.0 }
  0xee   :  { %v183_v22 = vpack.c.bf16 %v151_v21, %v151_v21 }
  0xf0   :  { %162 = vst.msk [vmem:[%s263_s3 + $0x4] sm:$0xf] %vm160_vm1, %v183_v22 }

// kernel: forward.34
= control target key start
LH: loop header
LB: loop body
LE: loop exit
PB: predicated region body
PF: predicated region fallthrough
CT: control target
= control target key end

     0   :  { %v117_v0 = vmov 0.0   ;;  %vm118_vm0 = vmmov 0   ;;  %vm37_vm1 = vcmask 130048   ;;  %vm90_vm2 = vcmask 257024   ;;  %s154_s1 = inlined_call_operand.vmem [shape: bf16[16,32], index: 1, kind: input, shape index: {}]   ;;  %s155_s0 = inlined_call_operand.vmem [shape: bf16[16,16], index: 0, kind: input, shape index: {}]   ;;  %s156_s2 = inlined_call_operand.vmem [shape: f32[1,32], index: 2, kind: input, shape index: {}]   ;;  %s157_s3 = inlined_call_operand.vmem [shape: bf16[16,32], index: 3, kind: output, shape index: {}]  }
   0x1   :  { %107 = vmatprep.subr.bf16.mxu0 %v117_v0  ;;  %v115_v1 = vld [vmem:[%s154_s1] sm:$0xff]   ;;  %109 = vmatprep.mubr.msk.bf16.mxu0 %vm118_vm0, %v117_v0 }
   0x2   :  { %v116_v2 = vld [vmem:[%s155_s0] sm:$0xff]   ;;  %108 = vmatpush3.bf16.msra.mxu0 %v115_v1 }
   0x3   :  { %v97_v3 = vld [vmem:[%s156_s2] ss:$0 sm:$0xff] }
   0x5   :  { %110 = vmatmul.mubr.msk.bf16.vlgmr.msra.gmra.mxu0 %vm37_vm1, %v116_v2 }
  0xc5   :  { %v75_v4 = vpop.f32.mrf.mxu0 }
  0xc6   :  { %v76_v5 = vadd.f32 %v97_v3, %v75_v4 }
  0xc7   :  { %v111_v6 = vpop.f32.mrf.mxu0 }
  0xc8   :  { %v103_v7 = vpack.c.bf16 %v76_v5, %v76_v5 }
  0xc9   :  { %v78_v8 = vpop.f32.mrf.mxu0 }
  0xca   :  { %91 = vst.msk [vmem:[%s157_s3] sm:$0xf] %vm90_vm2, %v103_v7  ;;  %v79_v9 = vadd.f32 %v97_v3, %v78_v8 }
  0xcb   :  { %v112_v10 = vpop.f32.mrf.mxu0 }
  0xcc   :  { %v104_v11 = vpack.c.bf16 %v79_v9, %v79_v9 }
  0xce   :  { %92 = vst.msk [vmem:[%s157_s3 + $0x4] sm:$0xf] %vm90_vm2, %v104_v11 }

// kernel: forward.35
= control target key start
LH: loop header
LB: loop body
LE: loop exit
PB: predicated region body
PF: predicated region fallthrough
CT: control target
= control target key end

     0   :  { %v385_v1 = vmov 0.0   ;;  %vm386_vm0 = vmmov 0   ;;  %vm188_vm1 = vcmask 261120   ;;  %vm290_vm2 = vcmask 257024   ;;  %s487_s1 = inlined_call_operand.vmem [shape: bf16[288,32], index: 1, kind: input, shape index: {}]   ;;  %s488_s0 = inlined_call_operand.vmem [shape: bf16[16,288], index: 0, kind: input, shape index: {}]   ;;  %s489_s2 = inlined_call_operand.vmem [shape: f32[1,32], index: 2, kind: input, shape index: {}]   ;;  %s490_s3 = inlined_call_operand.vmem [shape: bf16[16,32], index: 3, kind: input, shape index: {}]   ;;  %s491_s4 = inlined_call_operand.vmem [shape: bf16[16,32], index: 4, kind: output, shape index: {}]  }
   0x1   :  { %v363_v0 = vld [vmem:[%s487_s1 + $0x78] sm:$0xff]   ;;  %353 = vmatprep.subr.bf16.mxu1 %v385_v1  ;;  %357 = vmatprep.mubr.msk.bf16.mxu1 %vm386_vm0, %v385_v1  ;;  %v365_v3 = vld [vmem:[%s487_s1 + $0x70] sm:$0xff]   ;;  %v367_v5 = vld [vmem:[%s487_s1 + $0x68] sm:$0xff]  }
   0x2   :  { %v364_v2 = vld [vmem:[%s487_s1 + $0x38] sm:$0xff]   ;;  %328 = vmatprep.subr.bf16.mxu0 %v363_v0  ;;  %v366_v4 = vld [vmem:[%s487_s1 + $0x30] sm:$0xff]   ;;  %v368_v6 = vld [vmem:[%s487_s1 + $0x28] sm:$0xff]  }
   0x3   :  { %329 = vmatpush3.bf16.msra.mxu0 %v364_v2  ;;  %v369_v7 = vld [vmem:[%s487_s1 + $0x60] sm:$0xff]   ;;  %v371_v9 = vld [vmem:[%s487_s1 + $0x58] sm:$0xff]   ;;  %v377_v10 = vld [vmem:[%s487_s1 + $0x88] sm:$0xff]  }
   0x4   :  { %330 = vmatprep.subr.bf16.mxu0 %v365_v3  ;;  %v370_v8 = vld [vmem:[%s487_s1 + $0x20] sm:$0xff]   ;;  %v372_v11 = vld [vmem:[%s487_s1 + $0x18] sm:$0xff]   ;;  %v373_v12 = vld [vmem:[%s487_s1 + $0x50] sm:$0xff]   ;;  %354 = vmatpush3.bf16.msra.mxu1 %v377_v10 }
   0x5   :  { %355 = vmatprep.subr.bf16.mxu1 %v385_v1  ;;  %v380_v13 = vld [vmem:[%s487_s1 + $0x80] sm:$0xff]   ;;  %v374_v14 = vld [vmem:[%s487_s1 + $0x10] sm:$0xff]   ;;  %v375_v16 = vld [vmem:[%s487_s1 + $0x48] sm:$0xff]  }
   0x6   :  { %v383_v15 = vld [vmem:[%s488_s0 + $0x4] ss:$12 sps:$4 sm:$0xff]   ;;  %v384_v17 = vld [vmem:[%s488_s0 + $0x8] ss:$12 sps:$4 sm:$0xff]   ;;  %v381_v21 = vld [vmem:[%s488_s0] ss:$12 sps:$4 sm:$0xff]  }
   0x7   :  { %331 = vmatpush3.bf16.msra.mxu0 %v366_v4  ;;  %224 = vmatprep.mubr.bf16.mxu0 %v383_v15  ;;  %v376_v18 = vld [vmem:[%s487_s1 + $0x8] sm:$0xff]   ;;  %v378_v19 = vld [vmem:[%s487_s1 + $0x40] sm:$0xff]  }
   0x8   :  { %332 = vmatprep.subr.bf16.mxu0 %v367_v5  ;;  %356 = vmatpush3.bf16.msra.mxu1 %v380_v13  ;;  %v379_v20 = vld [vmem:[%s487_s1] sm:$0xff]  }
   0x9   :  { %v297_v27 = vld [vmem:[%s489_s2] ss:$0 sm:$0xff] }
   0xa   :  { %v325_v29 = vld [vmem:[%s490_s3] sm:$0xff]  }
   0xb   :  { %333 = vmatpush3.bf16.msra.mxu0 %v368_v6  ;;  %358 = vmatmul.mubr.msk.bf16.vlgmr.msra.gmra.mxu1 %vm188_vm1, %v384_v17  ;;  %v326_v33 = vunpack.c.l.bf16 %v325_v29  ;;  %v327_v39 = vunpack.c.h.bf16 %v325_v29 }
   0xc   :  { %334 = vmatprep.subr.bf16.mxu0 %v369_v7 }
   0xf   :  { %335 = vmatpush3.bf16.msra.mxu0 %v370_v8 }
  0x10   :  { %336 = vmatprep.subr.bf16.mxu0 %v371_v9 }
  0x13   :  { %337 = vmatpush3.bf16.msra.mxu0 %v372_v11 }
  0x14   :  { %338 = vmatprep.subr.bf16.mxu0 %v373_v12 }
  0x17   :  { %339 = vmatpush3.bf16.msra.mxu0 %v374_v14 }
  0x18   :  { %340 = vmatprep.subr.bf16.mxu0 %v375_v16 }
  0x1b   :  { %341 = vmatpush3.bf16.msra.mxu0 %v376_v18 }
  0x1c   :  { %342 = vmatprep.subr.bf16.mxu0 %v378_v19 }
  0x1f   :  { %343 = vmatpush3.bf16.msra.mxu0 %v379_v20 }
  0x22   :  { %225 = vmatmul.mubr.bf16.vlgmr.msra.gmra.mxu0 %v381_v21 }
  0xcb   :  { %v267_v22 = vpop.f32.mrf.mxu1 }
  0xcd   :  { %v359_v23 = vpop.f32.mrf.mxu1 }
  0xcf   :  { %v270_v24 = vpop.f32.mrf.mxu1 }
  0xd1   :  { %v360_v25 = vpop.f32.mrf.mxu1 }
  0xe2   :  { %v344_v26 = vpop.f32.mrf.mxu0 }
  0xe4   :  { %v345_v28 = vpop.f32.mrf.mxu0 }
  0xe5   :  { %v346_v30 = vadd.f32 %v345_v28, %v344_v26 }
  0xe6   :  { %v347_v31 = vpop.f32.mrf.mxu0 }
  0xe7   :  { %v227_v32 = vadd.f32 %v346_v30, %v297_v27 }
  0xe8   :  { %v348_v34 = vpop.f32.mrf.mxu0 }
  0xe9   :  { %v268_v35 = vadd.f32 %v267_v22, %v227_v32  ;;  %v349_v36 = vadd.f32 %v348_v34, %v347_v31 }
  0xeb   :  { %v278_v37 = vadd.f32 %v326_v33, %v268_v35  ;;  %v230_v38 = vadd.f32 %v349_v36, %v297_v27 }
  0xed   :  { %v280_v40 = vmax.f32 %v278_v37, 0.0  ;;  %v271_v41 = vadd.f32 %v270_v24, %v230_v38 }
  0xef   :  { %v322_v42 = vpack.c.bf16 %v280_v40, %v280_v40  ;;  %v279_v43 = vadd.f32 %v327_v39, %v271_v41 }
  0xf1   :  { %291 = vst.msk [vmem:[%s491_s4] sm:$0xf] %vm290_vm2, %v322_v42  ;;  %v281_v44 = vmax.f32 %v279_v43, 0.0 }
  0xf3   :  { %v323_v45 = vpack.c.bf16 %v281_v44, %v281_v44 }
  0xf5   :  { %292 = vst.msk [vmem:[%s491_s4 + $0x4] sm:$0xf] %vm290_vm2, %v323_v45 }

// kernel: forward.36
= control target key start
LH: loop header
LB: loop body
LE: loop exit
PB: predicated region body
PF: predicated region fallthrough
CT: control target
= control target key end

     0   :  { %v372_v1 = vmov 0.0   ;;  %vm373_vm0 = vmmov 0   ;;  %vm185_vm1 = vcmask 261120   ;;  %vm281_vm2 = vcmask 257024   ;;  %s466_s1 = inlined_call_operand.vmem [shape: bf16[288,32], index: 1, kind: input, shape index: {}]   ;;  %s467_s0 = inlined_call_operand.vmem [shape: bf16[16,288], index: 0, kind: input, shape index: {}]   ;;  %s468_s2 = inlined_call_operand.vmem [shape: f32[1,32], index: 2, kind: input, shape index: {}]   ;;  %s469_s3 = inlined_call_operand.vmem [shape: bf16[16,32], index: 3, kind: output, shape index: {}]  }
   0x1   :  { %v350_v0 = vld [vmem:[%s466_s1 + $0x78] sm:$0xff]   ;;  %340 = vmatprep.subr.bf16.mxu1 %v372_v1  ;;  %344 = vmatprep.mubr.msk.bf16.mxu1 %vm373_vm0, %v372_v1  ;;  %v352_v3 = vld [vmem:[%s466_s1 + $0x70] sm:$0xff]   ;;  %v354_v5 = vld [vmem:[%s466_s1 + $0x68] sm:$0xff]  }
   0x2   :  { %v351_v2 = vld [vmem:[%s466_s1 + $0x38] sm:$0xff]   ;;  %315 = vmatprep.subr.bf16.mxu0 %v350_v0  ;;  %v353_v4 = vld [vmem:[%s466_s1 + $0x30] sm:$0xff]   ;;  %v355_v6 = vld [vmem:[%s466_s1 + $0x28] sm:$0xff]  }
   0x3   :  { %316 = vmatpush3.bf16.msra.mxu0 %v351_v2  ;;  %v356_v7 = vld [vmem:[%s466_s1 + $0x60] sm:$0xff]   ;;  %v358_v9 = vld [vmem:[%s466_s1 + $0x58] sm:$0xff]   ;;  %v364_v10 = vld [vmem:[%s466_s1 + $0x88] sm:$0xff]  }
   0x4   :  { %317 = vmatprep.subr.bf16.mxu0 %v352_v3  ;;  %v357_v8 = vld [vmem:[%s466_s1 + $0x20] sm:$0xff]   ;;  %v359_v11 = vld [vmem:[%s466_s1 + $0x18] sm:$0xff]   ;;  %v360_v12 = vld [vmem:[%s466_s1 + $0x50] sm:$0xff]   ;;  %341 = vmatpush3.bf16.msra.mxu1 %v364_v10 }
   0x5   :  { %342 = vmatprep.subr.bf16.mxu1 %v372_v1  ;;  %v367_v13 = vld [vmem:[%s466_s1 + $0x80] sm:$0xff]   ;;  %v361_v14 = vld [vmem:[%s466_s1 + $0x10] sm:$0xff]   ;;  %v362_v16 = vld [vmem:[%s466_s1 + $0x48] sm:$0xff]  }
   0x6   :  { %v370_v15 = vld [vmem:[%s467_s0 + $0x4] ss:$12 sps:$4 sm:$0xff]   ;;  %v371_v17 = vld [vmem:[%s467_s0 + $0x8] ss:$12 sps:$4 sm:$0xff]   ;;  %v368_v21 = vld [vmem:[%s467_s0] ss:$12 sps:$4 sm:$0xff]  }
   0x7   :  { %318 = vmatpush3.bf16.msra.mxu0 %v353_v4  ;;  %221 = vmatprep.mubr.bf16.mxu0 %v370_v15  ;;  %v363_v18 = vld [vmem:[%s466_s1 + $0x8] sm:$0xff]   ;;  %v365_v19 = vld [vmem:[%s466_s1 + $0x40] sm:$0xff]  }
   0x8   :  { %319 = vmatprep.subr.bf16.mxu0 %v354_v5  ;;  %343 = vmatpush3.bf16.msra.mxu1 %v367_v13  ;;  %v366_v20 = vld [vmem:[%s466_s1] sm:$0xff]  }
   0x9   :  { %v288_v27 = vld [vmem:[%s468_s2] ss:$0 sm:$0xff] }
   0xb   :  { %320 = vmatpush3.bf16.msra.mxu0 %v355_v6  ;;  %345 = vmatmul.mubr.msk.bf16.vlgmr.msra.gmra.mxu1 %vm185_vm1, %v371_v17 }
   0xc   :  { %321 = vmatprep.subr.bf16.mxu0 %v356_v7 }
   0xf   :  { %322 = vmatpush3.bf16.msra.mxu0 %v357_v8 }
  0x10   :  { %323 = vmatprep.subr.bf16.mxu0 %v358_v9 }
  0x13   :  { %324 = vmatpush3.bf16.msra.mxu0 %v359_v11 }
  0x14   :  { %325 = vmatprep.subr.bf16.mxu0 %v360_v12 }
  0x17   :  { %326 = vmatpush3.bf16.msra.mxu0 %v361_v14 }
  0x18   :  { %327 = vmatprep.subr.bf16.mxu0 %v362_v16 }
  0x1b   :  { %328 = vmatpush3.bf16.msra.mxu0 %v363_v18 }
  0x1c   :  { %329 = vmatprep.subr.bf16.mxu0 %v365_v19 }
  0x1f   :  { %330 = vmatpush3.bf16.msra.mxu0 %v366_v20 }
  0x22   :  { %222 = vmatmul.mubr.bf16.vlgmr.msra.gmra.mxu0 %v368_v21 }
  0xcb   :  { %v264_v22 = vpop.f32.mrf.mxu1 }
  0xcd   :  { %v346_v23 = vpop.f32.mrf.mxu1 }
  0xcf   :  { %v267_v24 = vpop.f32.mrf.mxu1 }
  0xd1   :  { %v347_v25 = vpop.f32.mrf.mxu1 }
  0xe2   :  { %v331_v26 = vpop.f32.mrf.mxu0 }
  0xe4   :  { %v332_v28 = vpop.f32.mrf.mxu0 }
  0xe5   :  { %v333_v29 = vadd.f32 %v332_v28, %v331_v26 }
  0xe6   :  { %v334_v30 = vpop.f32.mrf.mxu0 }
  0xe7   :  { %v224_v31 = vadd.f32 %v333_v29, %v288_v27 }
  0xe8   :  { %v335_v32 = vpop.f32.mrf.mxu0 }
  0xe9   :  { %v265_v33 = vadd.f32 %v264_v22, %v224_v31  ;;  %v336_v34 = vadd.f32 %v335_v32, %v334_v30 }
  0xeb   :  { %v271_v35 = vmax.f32 %v265_v33, 0.0  ;;  %v227_v36 = vadd.f32 %v336_v34, %v288_v27 }
  0xed   :  { %v313_v37 = vpack.c.bf16 %v271_v35, %v271_v35  ;;  %v268_v38 = vadd.f32 %v267_v24, %v227_v36 }
  0xef   :  { %282 = vst.msk [vmem:[%s469_s3] sm:$0xf] %vm281_vm2, %v313_v37  ;;  %v272_v39 = vmax.f32 %v268_v38, 0.0 }
  0xf1   :  { %v314_v40 = vpack.c.bf16 %v272_v39, %v272_v39 }
  0xf3   :  { %283 = vst.msk [vmem:[%s469_s3 + $0x4] sm:$0xf] %vm281_vm2, %v314_v40 }

// kernel: forward.38
= control target key start
LH: loop header
LB: loop body
LE: loop exit
PB: predicated region body
PF: predicated region fallthrough
CT: control target
= control target key end

     0   :  { %v372_v1 = vmov 0.0   ;;  %vm373_vm0 = vmmov 0   ;;  %vm185_vm1 = vcmask 261120   ;;  %vm281_vm2 = vcmask 519168   ;;  %s466_s1 = inlined_call_operand.vmem [shape: bf16[288,64], index: 1, kind: input, shape index: {}]   ;;  %s467_s0 = inlined_call_operand.vmem [shape: bf16[16,288], index: 0, kind: input, shape index: {}]   ;;  %s468_s2 = inlined_call_operand.vmem [shape: f32[1,64], index: 2, kind: input, shape index: {}]   ;;  %s469_s3 = inlined_call_operand.vmem [shape: bf16[16,64], index: 3, kind: output, shape index: {}]  }
   0x1   :  { %v350_v0 = vld [vmem:[%s466_s1 + $0x78] sm:$0xff]   ;;  %340 = vmatprep.subr.bf16.mxu1 %v372_v1  ;;  %344 = vmatprep.mubr.msk.bf16.mxu1 %vm373_vm0, %v372_v1  ;;  %v352_v3 = vld [vmem:[%s466_s1 + $0x70] sm:$0xff]   ;;  %v354_v5 = vld [vmem:[%s466_s1 + $0x68] sm:$0xff]  }
   0x2   :  { %v351_v2 = vld [vmem:[%s466_s1 + $0x38] sm:$0xff]   ;;  %315 = vmatprep.subr.bf16.mxu0 %v350_v0  ;;  %v353_v4 = vld [vmem:[%s466_s1 + $0x30] sm:$0xff]   ;;  %v355_v6 = vld [vmem:[%s466_s1 + $0x28] sm:$0xff]  }
   0x3   :  { %316 = vmatpush3.bf16.msra.mxu0 %v351_v2  ;;  %v356_v7 = vld [vmem:[%s466_s1 + $0x60] sm:$0xff]   ;;  %v358_v9 = vld [vmem:[%s466_s1 + $0x58] sm:$0xff]   ;;  %v364_v10 = vld [vmem:[%s466_s1 + $0x88] sm:$0xff]  }
   0x4   :  { %317 = vmatprep.subr.bf16.mxu0 %v352_v3  ;;  %v357_v8 = vld [vmem:[%s466_s1 + $0x20] sm:$0xff]   ;;  %v359_v11 = vld [vmem:[%s466_s1 + $0x18] sm:$0xff]   ;;  %v360_v12 = vld [vmem:[%s466_s1 + $0x50] sm:$0xff]   ;;  %341 = vmatpush3.bf16.msra.mxu1 %v364_v10 }
   0x5   :  { %342 = vmatprep.subr.bf16.mxu1 %v372_v1  ;;  %v367_v13 = vld [vmem:[%s466_s1 + $0x80] sm:$0xff]   ;;  %v361_v14 = vld [vmem:[%s466_s1 + $0x10] sm:$0xff]   ;;  %v362_v16 = vld [vmem:[%s466_s1 + $0x48] sm:$0xff]  }
   0x6   :  { %v370_v15 = vld [vmem:[%s467_s0 + $0x4] ss:$12 sps:$4 sm:$0xff]   ;;  %v371_v17 = vld [vmem:[%s467_s0 + $0x8] ss:$12 sps:$4 sm:$0xff]   ;;  %v368_v21 = vld [vmem:[%s467_s0] ss:$12 sps:$4 sm:$0xff]  }
   0x7   :  { %318 = vmatpush3.bf16.msra.mxu0 %v353_v4  ;;  %221 = vmatprep.mubr.bf16.mxu0 %v370_v15  ;;  %v363_v18 = vld [vmem:[%s466_s1 + $0x8] sm:$0xff]   ;;  %v365_v19 = vld [vmem:[%s466_s1 + $0x40] sm:$0xff]  }
   0x8   :  { %319 = vmatprep.subr.bf16.mxu0 %v354_v5  ;;  %343 = vmatpush3.bf16.msra.mxu1 %v367_v13  ;;  %v366_v20 = vld [vmem:[%s466_s1] sm:$0xff]  }
   0x9   :  { %v288_v27 = vld [vmem:[%s468_s2] ss:$0 sm:$0xff] }
   0xb   :  { %320 = vmatpush3.bf16.msra.mxu0 %v355_v6  ;;  %345 = vmatmul.mubr.msk.bf16.vlgmr.msra.gmra.mxu1 %vm185_vm1, %v371_v17 }
   0xc   :  { %321 = vmatprep.subr.bf16.mxu0 %v356_v7 }
   0xf   :  { %322 = vmatpush3.bf16.msra.mxu0 %v357_v8 }
  0x10   :  { %323 = vmatprep.subr.bf16.mxu0 %v358_v9 }
  0x13   :  { %324 = vmatpush3.bf16.msra.mxu0 %v359_v11 }
  0x14   :  { %325 = vmatprep.subr.bf16.mxu0 %v360_v12 }
  0x17   :  { %326 = vmatpush3.bf16.msra.mxu0 %v361_v14 }
  0x18   :  { %327 = vmatprep.subr.bf16.mxu0 %v362_v16 }
  0x1b   :  { %328 = vmatpush3.bf16.msra.mxu0 %v363_v18 }
  0x1c   :  { %329 = vmatprep.subr.bf16.mxu0 %v365_v19 }
  0x1f   :  { %330 = vmatpush3.bf16.msra.mxu0 %v366_v20 }
  0x22   :  { %222 = vmatmul.mubr.bf16.vlgmr.msra.gmra.mxu0 %v368_v21 }
  0xcb   :  { %v264_v22 = vpop.f32.mrf.mxu1 }
  0xcd   :  { %v346_v23 = vpop.f32.mrf.mxu1 }
  0xcf   :  { %v267_v24 = vpop.f32.mrf.mxu1 }
  0xd1   :  { %v347_v25 = vpop.f32.mrf.mxu1 }
  0xe2   :  { %v331_v26 = vpop.f32.mrf.mxu0 }
  0xe4   :  { %v332_v28 = vpop.f32.mrf.mxu0 }
  0xe5   :  { %v333_v29 = vadd.f32 %v332_v28, %v331_v26 }
  0xe6   :  { %v334_v30 = vpop.f32.mrf.mxu0 }
  0xe7   :  { %v224_v31 = vadd.f32 %v333_v29, %v288_v27 }
  0xe8   :  { %v335_v32 = vpop.f32.mrf.mxu0 }
  0xe9   :  { %v265_v33 = vadd.f32 %v264_v22, %v224_v31  ;;  %v336_v34 = vadd.f32 %v335_v32, %v334_v30 }
  0xeb   :  { %v271_v35 = vmax.f32 %v265_v33, 0.0  ;;  %v227_v36 = vadd.f32 %v336_v34, %v288_v27 }
  0xed   :  { %v313_v37 = vpack.c.bf16 %v271_v35, %v271_v35  ;;  %v268_v38 = vadd.f32 %v267_v24, %v227_v36 }
  0xef   :  { %282 = vst.msk [vmem:[%s469_s3] sm:$0xf] %vm281_vm2, %v313_v37  ;;  %v272_v39 = vmax.f32 %v268_v38, 0.0 }
  0xf1   :  { %v314_v40 = vpack.c.bf16 %v272_v39, %v272_v39 }
  0xf3   :  { %283 = vst.msk [vmem:[%s469_s3 + $0x4] sm:$0xf] %vm281_vm2, %v314_v40 }

// kernel: forward.39
= control target key start
LH: loop header
LB: loop body
LE: loop exit
PB: predicated region body
PF: predicated region fallthrough
CT: control target
= control target key end

     0   :  { %v130_v0 = vmov 0.0   ;;  %vm131_vm0 = vmmov 0   ;;  %vm45_vm1 = vcmask 261120   ;;  %vm98_vm2 = vcmask 519168   ;;  %s170_s1 = inlined_call_operand.vmem [shape: bf16[32,64], index: 1, kind: input, shape index: {}]   ;;  %s171_s0 = inlined_call_operand.vmem [shape: bf16[16,32], index: 0, kind: input, shape index: {}]   ;;  %s172_s2 = inlined_call_operand.vmem [shape: f32[1,64], index: 2, kind: input, shape index: {}]   ;;  %s173_s3 = inlined_call_operand.vmem [shape: bf16[16,64], index: 3, kind: output, shape index: {}]  }
   0x1   :  { %117 = vmatprep.subr.bf16.mxu0 %v130_v0  ;;  %v127_v1 = vld [vmem:[%s170_s1 + $0x8] sm:$0xff]   ;;  %121 = vmatprep.mubr.msk.bf16.mxu0 %vm131_vm0, %v130_v0  ;;  %v128_v2 = vld [vmem:[%s170_s1] sm:$0xff]  }
   0x2   :  { %118 = vmatpush3.bf16.msra.mxu0 %v127_v1  ;;  %v129_v3 = vld [vmem:[%s171_s0] sm:$0xff]  }
   0x3   :  { %119 = vmatprep.subr.bf16.mxu0 %v130_v0  ;;  %v105_v4 = vld [vmem:[%s172_s2] ss:$0 sm:$0xff] }
   0x6   :  { %120 = vmatpush3.bf16.msra.mxu0 %v128_v2 }
   0x9   :  { %122 = vmatmul.mubr.msk.bf16.vlgmr.msra.gmra.mxu0 %vm45_vm1, %v129_v3 }
  0xc9   :  { %v83_v5 = vpop.f32.mrf.mxu0 }
  0xca   :  { %v84_v6 = vadd.f32 %v105_v4, %v83_v5 }
  0xcb   :  { %v123_v7 = vpop.f32.mrf.mxu0 }
  0xcc   :  { %v112_v8 = vpack.c.bf16 %v84_v6, %v84_v6 }
  0xcd   :  { %v86_v9 = vpop.f32.mrf.mxu0 }
  0xce   :  { %99 = vst.msk [vmem:[%s173_s3] sm:$0xf] %vm98_vm2, %v112_v8  ;;  %v87_v10 = vadd.f32 %v105_v4, %v86_v9 }
  0xcf   :  { %v124_v11 = vpop.f32.mrf.mxu0 }
  0xd0   :  { %v113_v12 = vpack.c.bf16 %v87_v10, %v87_v10 }
  0xd2   :  { %100 = vst.msk [vmem:[%s173_s3 + $0x4] sm:$0xf] %vm98_vm2, %v113_v12 }

// kernel: forward.40
= control target key start
LH: loop header
LB: loop body
LE: loop exit
PB: predicated region body
PF: predicated region fallthrough
CT: control target
= control target key end

     0   :  { %v651_v33 = vmov 0.0   ;;  %vm652_vm0 = vmmov 0   ;;  %vm344_vm1 = vcmask 523264   ;;  %vm487_vm2 = vcmask 519168   ;;  %s813_s1 = inlined_call_operand.vmem [shape: bf16[576,64], index: 1, kind: input, shape index: {}]   ;;  %s814_s0 = inlined_call_operand.vmem [shape: bf16[16,576], index: 0, kind: input, shape index: {}]   ;;  %s815_s2 = inlined_call_operand.vmem [shape: f32[1,64], index: 2, kind: input, shape index: {}]   ;;  %s816_s3 = inlined_call_operand.vmem [shape: bf16[16,64], index: 3, kind: input, shape index: {}]   ;;  %s817_s4 = inlined_call_operand.vmem [shape: bf16[16,64], index: 4, kind: output, shape index: {}]  }
   0x1   :  { %v608_v0 = vld [vmem:[%s813_s1 + $0x78] sm:$0xff]   ;;  %v612_v4 = vld [vmem:[%s813_s1 + $0x70] sm:$0xff]   ;;  %v616_v8 = vld [vmem:[%s813_s1 + $0x68] sm:$0xff]  }
   0x2   :  { %v609_v1 = vld [vmem:[%s813_s1 + $0x38] sm:$0xff]   ;;  %545 = vmatprep.subr.bf16.mxu0 %v608_v0  ;;  %v613_v5 = vld [vmem:[%s813_s1 + $0x30] sm:$0xff]   ;;  %v617_v9 = vld [vmem:[%s813_s1 + $0x28] sm:$0xff]  }
   0x3   :  { %v610_v2 = vld [vmem:[%s813_s1 + $0xf8] sm:$0xff]   ;;  %546 = vmatpush3.bf16.msra.mxu0 %v609_v1  ;;  %v614_v6 = vld [vmem:[%s813_s1 + $0xf0] sm:$0xff]   ;;  %v618_v10 = vld [vmem:[%s813_s1 + $0xe8] sm:$0xff]  }
   0x4   :  { %v611_v3 = vld [vmem:[%s813_s1 + $0xb8] sm:$0xff]   ;;  %567 = vmatprep.subr.bf16.mxu1 %v610_v2  ;;  %547 = vmatprep.subr.bf16.mxu0 %v612_v4  ;;  %v615_v7 = vld [vmem:[%s813_s1 + $0xb0] sm:$0xff]   ;;  %v619_v11 = vld [vmem:[%s813_s1 + $0xa8] sm:$0xff]  }
   0x5   :  { %568 = vmatpush3.bf16.msra.mxu1 %v611_v3  ;;  %v620_v12 = vld [vmem:[%s813_s1 + $0x60] sm:$0xff]   ;;  %v624_v16 = vld [vmem:[%s813_s1 + $0x58] sm:$0xff]   ;;  %v628_v20 = vld [vmem:[%s813_s1 + $0x50] sm:$0xff]  }
   0x6   :  { %569 = vmatprep.subr.bf16.mxu1 %v614_v6  ;;  %v621_v13 = vld [vmem:[%s813_s1 + $0x20] sm:$0xff]   ;;  %v625_v17 = vld [vmem:[%s813_s1 + $0x18] sm:$0xff]   ;;  %v629_v21 = vld [vmem:[%s813_s1 + $0x10] sm:$0xff]  }
   0x7   :  { %548 = vmatpush3.bf16.msra.mxu0 %v613_v5  ;;  %v622_v14 = vld [vmem:[%s813_s1 + $0xe0] sm:$0xff]   ;;  %v626_v18 = vld [vmem:[%s813_s1 + $0xd8] sm:$0xff]   ;;  %v630_v22 = vld [vmem:[%s813_s1 + $0xd0] sm:$0xff]  }
   0x8   :  { %549 = vmatprep.subr.bf16.mxu0 %v616_v8  ;;  %v623_v15 = vld [vmem:[%s813_s1 + $0xa0] sm:$0xff]   ;;  %v627_v19 = vld [vmem:[%s813_s1 + $0x98] sm:$0xff]   ;;  %v631_v23 = vld [vmem:[%s813_s1 + $0x90] sm:$0xff]  }
   0x9   :  { %570 = vmatpush3.bf16.msra.mxu1 %v615_v7  ;;  %v632_v24 = vld [vmem:[%s813_s1 + $0x48] sm:$0xff]   ;;  %v636_v28 = vld [vmem:[%s813_s1 + $0x40] sm:$0xff]   ;;  %v646_v37 = vld [vmem:[%s813_s1 + $0x118] sm:$0xff]  }
   0xa   :  { %571 = vmatprep.subr.bf16.mxu1 %v618_v10  ;;  %v633_v25 = vld [vmem:[%s813_s1 + $0x8] sm:$0xff]   ;;  %v637_v29 = vld [vmem:[%s813_s1] sm:$0xff]   ;;  %v647_v38 = vld [vmem:[%s813_s1 + $0x110] sm:$0xff]  }
   0xb   :  { %550 = vmatpush3.bf16.msra.mxu0 %v617_v9  ;;  %v634_v26 = vld [vmem:[%s813_s1 + $0xc8] sm:$0xff]   ;;  %v638_v30 = vld [vmem:[%s813_s1 + $0xc0] sm:$0xff]  }
   0xc   :  { %551 = vmatprep.subr.bf16.mxu0 %v620_v12  ;;  %v635_v27 = vld [vmem:[%s813_s1 + $0x88] sm:$0xff]   ;;  %v639_v31 = vld [vmem:[%s814_s0] ss:$20 sps:$4 sm:$0xff]   ;;  %v641_v32 = vld [vmem:[%s814_s0 + $0x4] ss:$20 sps:$4 sm:$0xff]  }
   0xd   :  { %572 = vmatpush3.bf16.msra.mxu1 %v619_v11  ;;  %v642_v34 = vld [vmem:[%s813_s1 + $0x80] sm:$0xff]   ;;  %380 = vmatprep.mubr.bf16.mxu0 %v641_v32  ;;  %v643_v35 = vld [vmem:[%s814_s0 + $0x8] ss:$20 sps:$4 sm:$0xff]  }
   0xe   :  { %573 = vmatprep.subr.bf16.mxu1 %v622_v14  ;;  %v645_v36 = vld [vmem:[%s814_s0 + $0xc] ss:$20 sps:$4 sm:$0xff]   ;;  %v650_v41 = vld [vmem:[%s814_s0 + $0x10] ss:$20 sps:$4 sm:$0xff]  }
   0xf   :  { %552 = vmatpush3.bf16.msra.mxu0 %v621_v13  ;;  %421 = vmatprep.mubr.bf16.mxu1 %v645_v36  ;;  %v648_v39 = vld [vmem:[%s813_s1 + $0x108] sm:$0xff]   ;;  %v649_v40 = vld [vmem:[%s813_s1 + $0x100] sm:$0xff]  }
  0x10   :  { %553 = vmatprep.subr.bf16.mxu0 %v624_v16  ;;  %v494_v48 = vld [vmem:[%s815_s2] ss:$0 sm:$0xff] }
  0x11   :  { %574 = vmatpush3.bf16.msra.mxu1 %v623_v15  ;;  %v542_v55 = vld [vmem:[%s816_s3] sm:$0xff]  }
  0x12   :  { %575 = vmatprep.subr.bf16.mxu1 %v626_v18  ;;  %v543_v59 = vunpack.c.l.bf16 %v542_v55  ;;  %v544_v1 = vunpack.c.h.bf16 %v542_v55 }
  0x13   :  { %554 = vmatpush3.bf16.msra.mxu0 %v625_v17 }
  0x14   :  { %555 = vmatprep.subr.bf16.mxu0 %v628_v20 }
  0x15   :  { %576 = vmatpush3.bf16.msra.mxu1 %v627_v19 }
  0x16   :  { %577 = vmatprep.subr.bf16.mxu1 %v630_v22 }
  0x17   :  { %556 = vmatpush3.bf16.msra.mxu0 %v629_v21 }
  0x18   :  { %557 = vmatprep.subr.bf16.mxu0 %v632_v24 }
  0x19   :  { %578 = vmatpush3.bf16.msra.mxu1 %v631_v23 }
  0x1a   :  { %579 = vmatprep.subr.bf16.mxu1 %v634_v26 }
  0x1b   :  { %558 = vmatpush3.bf16.msra.mxu0 %v633_v25 }
  0x1c   :  { %559 = vmatprep.subr.bf16.mxu0 %v636_v28 }
  0x1d   :  { %580 = vmatpush3.bf16.msra.mxu1 %v635_v27 }
  0x1e   :  { %581 = vmatprep.subr.bf16.mxu1 %v638_v30 }
  0x1f   :  { %560 = vmatpush3.bf16.msra.mxu0 %v637_v29 }
  0x20   :  { %594 = vmatprep.subr.bf16.mxu0 %v651_v33 }
  0x21   :  { %582 = vmatpush3.bf16.msra.mxu1 %v642_v34 }
  0x22   :  { %381 = vmatmul.mubr.bf16.vlgmr.msra.gmra.mxu0 %v639_v31 }
  0x23   :  { %602 = vmatprep.mubr.msk.bf16.mxu0 %vm652_vm0, %v651_v33  ;;  %595 = vmatpush3.bf16.msra.mxu0 %v646_v37 }
  0x24   :  { %422 = vmatmul.mubr.bf16.vlgmr.msra.gmra.mxu1 %v643_v35  ;;  %596 = vmatprep.subr.bf16.mxu0 %v651_v33 }
  0x27   :  { %597 = vmatpush3.bf16.msra.mxu0 %v647_v38 }
  0x28   :  { %598 = vmatprep.subr.bf16.mxu0 %v651_v33 }
  0x2b   :  { %599 = vmatpush3.bf16.msra.mxu0 %v648_v39 }
  0x2c   :  { %600 = vmatprep.subr.bf16.mxu0 %v651_v33 }
  0x2f   :  { %601 = vmatpush3.bf16.msra.mxu0 %v649_v40 }
  0x32   :  { %603 = vmatmul.mubr.msk.bf16.vlgmr.msra.gmra.mxu0 %vm344_vm1, %v650_v41 }
  0xe2   :  { %v561_v42 = vpop.f32.mrf.mxu0 }
  0xe4   :  { %v562_v43 = vpop.f32.mrf.mxu0  ;;  %v583_v44 = vpop.f32.mrf.mxu1 }
  0xe5   :  { %v563_v47 = vadd.f32 %v562_v43, %v561_v42 }
  0xe6   :  { %v564_v45 = vpop.f32.mrf.mxu0  ;;  %v584_v46 = vpop.f32.mrf.mxu1 }
  0xe7   :  { %v383_v51 = vadd.f32 %v563_v47, %v494_v48  ;;  %v585_v52 = vadd.f32 %v584_v46, %v583_v44 }
  0xe8   :  { %v565_v49 = vpop.f32.mrf.mxu0  ;;  %v586_v50 = vpop.f32.mrf.mxu1 }
  0xe9   :  { %v566_v53 = vadd.f32 %v565_v49, %v564_v45  ;;  %v424_v58 = vadd.f32 %v585_v52, %v383_v51 }
  0xea   :  { %v587_v54 = vpop.f32.mrf.mxu1 }
  0xeb   :  { %v386_v56 = vadd.f32 %v566_v53, %v494_v48  ;;  %v588_v57 = vadd.f32 %v587_v54, %v586_v50 }
  0xed   :  { %v427_v0 = vadd.f32 %v588_v57, %v386_v56 }
  0xf2   :  { %v464_v60 = vpop.f32.mrf.mxu0 }
  0xf3   :  { %v465_v61 = vadd.f32 %v464_v60, %v424_v58 }
  0xf4   :  { %v604_v62 = vpop.f32.mrf.mxu0 }
  0xf5   :  { %v475_v63 = vadd.f32 %v543_v59, %v465_v61 }
  0xf6   :  { %v467_v2 = vpop.f32.mrf.mxu0 }
  0xf7   :  { %v477_v3 = vmax.f32 %v475_v63, 0.0  ;;  %v468_v4 = vadd.f32 %v467_v2, %v427_v0 }
  0xf8   :  { %v605_v5 = vpop.f32.mrf.mxu0 }
  0xf9   :  { %v539_v6 = vpack.c.bf16 %v477_v3, %v477_v3  ;;  %v476_v7 = vadd.f32 %v544_v1, %v468_v4 }
  0xfb   :  { %488 = vst.msk [vmem:[%s817_s4] sm:$0xf] %vm487_vm2, %v539_v6  ;;  %v478_v8 = vmax.f32 %v476_v7, 0.0 }
  0xfd   :  { %v540_v9 = vpack.c.bf16 %v478_v8, %v478_v8 }
  0xff   :  { %489 = vst.msk [vmem:[%s817_s4 + $0x4] sm:$0xf] %vm487_vm2, %v540_v9 }

// kernel: forward.41
= control target key start
LH: loop header
LB: loop body
LE: loop exit
PB: predicated region body
PF: predicated region fallthrough
CT: control target
= control target key end

     0   :  { %v638_v33 = vmov 0.0   ;;  %vm639_vm0 = vmmov 0   ;;  %vm341_vm1 = vcmask 523264   ;;  %vm478_vm2 = vcmask 519168   ;;  %s792_s1 = inlined_call_operand.vmem [shape: bf16[576,64], index: 1, kind: input, shape index: {}]   ;;  %s793_s0 = inlined_call_operand.vmem [shape: bf16[16,576], index: 0, kind: input, shape index: {}]   ;;  %s794_s2 = inlined_call_operand.vmem [shape: f32[1,64], index: 2, kind: input, shape index: {}]   ;;  %s795_s3 = inlined_call_operand.vmem [shape: bf16[16,64], index: 3, kind: output, shape index: {}]  }
   0x1   :  { %v595_v0 = vld [vmem:[%s792_s1 + $0x78] sm:$0xff]   ;;  %v599_v4 = vld [vmem:[%s792_s1 + $0x70] sm:$0xff]   ;;  %v603_v8 = vld [vmem:[%s792_s1 + $0x68] sm:$0xff]  }
   0x2   :  { %v596_v1 = vld [vmem:[%s792_s1 + $0x38] sm:$0xff]   ;;  %532 = vmatprep.subr.bf16.mxu0 %v595_v0  ;;  %v600_v5 = vld [vmem:[%s792_s1 + $0x30] sm:$0xff]   ;;  %v604_v9 = vld [vmem:[%s792_s1 + $0x28] sm:$0xff]  }
   0x3   :  { %v597_v2 = vld [vmem:[%s792_s1 + $0xf8] sm:$0xff]   ;;  %533 = vmatpush3.bf16.msra.mxu0 %v596_v1  ;;  %v601_v6 = vld [vmem:[%s792_s1 + $0xf0] sm:$0xff]   ;;  %v605_v10 = vld [vmem:[%s792_s1 + $0xe8] sm:$0xff]  }
   0x4   :  { %v598_v3 = vld [vmem:[%s792_s1 + $0xb8] sm:$0xff]   ;;  %554 = vmatprep.subr.bf16.mxu1 %v597_v2  ;;  %534 = vmatprep.subr.bf16.mxu0 %v599_v4  ;;  %v602_v7 = vld [vmem:[%s792_s1 + $0xb0] sm:$0xff]   ;;  %v606_v11 = vld [vmem:[%s792_s1 + $0xa8] sm:$0xff]  }
   0x5   :  { %555 = vmatpush3.bf16.msra.mxu1 %v598_v3  ;;  %v607_v12 = vld [vmem:[%s792_s1 + $0x60] sm:$0xff]   ;;  %v611_v16 = vld [vmem:[%s792_s1 + $0x58] sm:$0xff]   ;;  %v615_v20 = vld [vmem:[%s792_s1 + $0x50] sm:$0xff]  }
   0x6   :  { %556 = vmatprep.subr.bf16.mxu1 %v601_v6  ;;  %v608_v13 = vld [vmem:[%s792_s1 + $0x20] sm:$0xff]   ;;  %v612_v17 = vld [vmem:[%s792_s1 + $0x18] sm:$0xff]   ;;  %v616_v21 = vld [vmem:[%s792_s1 + $0x10] sm:$0xff]  }
   0x7   :  { %535 = vmatpush3.bf16.msra.mxu0 %v600_v5  ;;  %v609_v14 = vld [vmem:[%s792_s1 + $0xe0] sm:$0xff]   ;;  %v613_v18 = vld [vmem:[%s792_s1 + $0xd8] sm:$0xff]   ;;  %v617_v22 = vld [vmem:[%s792_s1 + $0xd0] sm:$0xff]  }
   0x8   :  { %536 = vmatprep.subr.bf16.mxu0 %v603_v8  ;;  %v610_v15 = vld [vmem:[%s792_s1 + $0xa0] sm:$0xff]   ;;  %v614_v19 = vld [vmem:[%s792_s1 + $0x98] sm:$0xff]   ;;  %v618_v23 = vld [vmem:[%s792_s1 + $0x90] sm:$0xff]  }
   0x9   :  { %557 = vmatpush3.bf16.msra.mxu1 %v602_v7  ;;  %v619_v24 = vld [vmem:[%s792_s1 + $0x48] sm:$0xff]   ;;  %v623_v28 = vld [vmem:[%s792_s1 + $0x40] sm:$0xff]   ;;  %v633_v37 = vld [vmem:[%s792_s1 + $0x118] sm:$0xff]  }
   0xa   :  { %558 = vmatprep.subr.bf16.mxu1 %v605_v10  ;;  %v620_v25 = vld [vmem:[%s792_s1 + $0x8] sm:$0xff]   ;;  %v624_v29 = vld [vmem:[%s792_s1] sm:$0xff]   ;;  %v634_v38 = vld [vmem:[%s792_s1 + $0x110] sm:$0xff]  }
   0xb   :  { %537 = vmatpush3.bf16.msra.mxu0 %v604_v9  ;;  %v621_v26 = vld [vmem:[%s792_s1 + $0xc8] sm:$0xff]   ;;  %v625_v30 = vld [vmem:[%s792_s1 + $0xc0] sm:$0xff]  }
   0xc   :  { %538 = vmatprep.subr.bf16.mxu0 %v607_v12  ;;  %v622_v27 = vld [vmem:[%s792_s1 + $0x88] sm:$0xff]   ;;  %v626_v31 = vld [vmem:[%s793_s0] ss:$20 sps:$4 sm:$0xff]   ;;  %v628_v32 = vld [vmem:[%s793_s0 + $0x4] ss:$20 sps:$4 sm:$0xff]  }
   0xd   :  { %559 = vmatpush3.bf16.msra.mxu1 %v606_v11  ;;  %v629_v34 = vld [vmem:[%s792_s1 + $0x80] sm:$0xff]   ;;  %377 = vmatprep.mubr.bf16.mxu0 %v628_v32  ;;  %v630_v35 = vld [vmem:[%s793_s0 + $0x8] ss:$20 sps:$4 sm:$0xff]  }
   0xe   :  { %560 = vmatprep.subr.bf16.mxu1 %v609_v14  ;;  %v632_v36 = vld [vmem:[%s793_s0 + $0xc] ss:$20 sps:$4 sm:$0xff]   ;;  %v637_v41 = vld [vmem:[%s793_s0 + $0x10] ss:$20 sps:$4 sm:$0xff]  }
   0xf   :  { %539 = vmatpush3.bf16.msra.mxu0 %v608_v13  ;;  %418 = vmatprep.mubr.bf16.mxu1 %v632_v36  ;;  %v635_v39 = vld [vmem:[%s792_s1 + $0x108] sm:$0xff]   ;;  %v636_v40 = vld [vmem:[%s792_s1 + $0x100] sm:$0xff]  }
  0x10   :  { %540 = vmatprep.subr.bf16.mxu0 %v611_v16  ;;  %v485_v48 = vld [vmem:[%s794_s2] ss:$0 sm:$0xff] }
  0x11   :  { %561 = vmatpush3.bf16.msra.mxu1 %v610_v15 }
  0x12   :  { %562 = vmatprep.subr.bf16.mxu1 %v613_v18 }
  0x13   :  { %541 = vmatpush3.bf16.msra.mxu0 %v612_v17 }
  0x14   :  { %542 = vmatprep.subr.bf16.mxu0 %v615_v20 }
  0x15   :  { %563 = vmatpush3.bf16.msra.mxu1 %v614_v19 }
  0x16   :  { %564 = vmatprep.subr.bf16.mxu1 %v617_v22 }
  0x17   :  { %543 = vmatpush3.bf16.msra.mxu0 %v616_v21 }
  0x18   :  { %544 = vmatprep.subr.bf16.mxu0 %v619_v24 }
  0x19   :  { %565 = vmatpush3.bf16.msra.mxu1 %v618_v23 }
  0x1a   :  { %566 = vmatprep.subr.bf16.mxu1 %v621_v26 }
  0x1b   :  { %545 = vmatpush3.bf16.msra.mxu0 %v620_v25 }
  0x1c   :  { %546 = vmatprep.subr.bf16.mxu0 %v623_v28 }
  0x1d   :  { %567 = vmatpush3.bf16.msra.mxu1 %v622_v27 }
  0x1e   :  { %568 = vmatprep.subr.bf16.mxu1 %v625_v30 }
  0x1f   :  { %547 = vmatpush3.bf16.msra.mxu0 %v624_v29 }
  0x20   :  { %581 = vmatprep.subr.bf16.mxu0 %v638_v33 }
  0x21   :  { %569 = vmatpush3.bf16.msra.mxu1 %v629_v34 }
  0x22   :  { %378 = vmatmul.mubr.bf16.vlgmr.msra.gmra.mxu0 %v626_v31 }
  0x23   :  { %589 = vmatprep.mubr.msk.bf16.mxu0 %vm639_vm0, %v638_v33  ;;  %582 = vmatpush3.bf16.msra.mxu0 %v633_v37 }
  0x24   :  { %419 = vmatmul.mubr.bf16.vlgmr.msra.gmra.mxu1 %v630_v35  ;;  %583 = vmatprep.subr.bf16.mxu0 %v638_v33 }
  0x27   :  { %584 = vmatpush3.bf16.msra.mxu0 %v634_v38 }
  0x28   :  { %585 = vmatprep.subr.bf16.mxu0 %v638_v33 }
  0x2b   :  { %586 = vmatpush3.bf16.msra.mxu0 %v635_v39 }
  0x2c   :  { %587 = vmatprep.subr.bf16.mxu0 %v638_v33 }
  0x2f   :  { %588 = vmatpush3.bf16.msra.mxu0 %v636_v40 }
  0x32   :  { %590 = vmatmul.mubr.msk.bf16.vlgmr.msra.gmra.mxu0 %vm341_vm1, %v637_v41 }
  0xe2   :  { %v548_v42 = vpop.f32.mrf.mxu0 }
  0xe4   :  { %v549_v43 = vpop.f32.mrf.mxu0  ;;  %v570_v44 = vpop.f32.mrf.mxu1 }
  0xe5   :  { %v550_v47 = vadd.f32 %v549_v43, %v548_v42 }
  0xe6   :  { %v551_v45 = vpop.f32.mrf.mxu0  ;;  %v571_v46 = vpop.f32.mrf.mxu1 }
  0xe7   :  { %v380_v51 = vadd.f32 %v550_v47, %v485_v48  ;;  %v572_v52 = vadd.f32 %v571_v46, %v570_v44 }
  0xe8   :  { %v552_v49 = vpop.f32.mrf.mxu0  ;;  %v573_v50 = vpop.f32.mrf.mxu1 }
  0xe9   :  { %v553_v53 = vadd.f32 %v552_v49, %v551_v45  ;;  %v421_v57 = vadd.f32 %v572_v52, %v380_v51 }
  0xea   :  { %v574_v54 = vpop.f32.mrf.mxu1 }
  0xeb   :  { %v383_v55 = vadd.f32 %v553_v53, %v485_v48  ;;  %v575_v56 = vadd.f32 %v574_v54, %v573_v50 }
  0xed   :  { %v424_v62 = vadd.f32 %v575_v56, %v383_v55 }
  0xf2   :  { %v461_v58 = vpop.f32.mrf.mxu0 }
  0xf3   :  { %v462_v59 = vadd.f32 %v461_v58, %v421_v57 }
  0xf4   :  { %v591_v60 = vpop.f32.mrf.mxu0 }
  0xf5   :  { %v468_v61 = vmax.f32 %v462_v59, 0.0 }
  0xf6   :  { %v464_v63 = vpop.f32.mrf.mxu0 }
  0xf7   :  { %v530_v0 = vpack.c.bf16 %v468_v61, %v468_v61  ;;  %v465_v1 = vadd.f32 %v464_v63, %v424_v62 }
  0xf8   :  { %v592_v2 = vpop.f32.mrf.mxu0 }
  0xf9   :  { %479 = vst.msk [vmem:[%s795_s3] sm:$0xf] %vm478_vm2, %v530_v0  ;;  %v469_v3 = vmax.f32 %v465_v1, 0.0 }
  0xfb   :  { %v531_v4 = vpack.c.bf16 %v469_v3, %v469_v3 }
  0xfd   :  { %480 = vst.msk [vmem:[%s795_s3 + $0x4] sm:$0xf] %vm478_vm2, %v531_v4 }

// kernel: forward.43
= control target key start
LH: loop header
LB: loop body
LE: loop exit
PB: predicated region body
PF: predicated region fallthrough
CT: control target
= control target key end

     0   :  { %v38_v1 = vlaneseq  ;;  %v192_v2 = vmov 0.0   ;;  %vm193_vm0 = vmmov 0   ;;  %s251_s0 = inlined_call_operand.vmem [shape: bf16[2,1,64], index: 0, kind: input, shape index: {}]   ;;  %s252_s1 = inlined_call_operand.vmem [shape: f32[64,10], index: 1, kind: input, shape index: {}]   ;;  %s253_s2 = inlined_call_operand.vmem [shape: f32[1,10], index: 2, kind: input, shape index: {}]   ;;  %s254_s3 = inlined_call_operand.hbm [shape: f32[2,10], index: 3, kind: output, shape index: {}]  }
   0x1   :  { %v28_v0 = vld [vmem:[%s252_s1 + $0x38] sm:$0xff]  ;;  %148 = vmatprep.subr.mxu0 %v192_v2  ;;  %v27_v3 = vld [vmem:[%s252_s1 + $0x30] sm:$0xff]  ;;  %164 = vmatprep.mubr.msk.f32.mxu0 %vm193_vm0, %v192_v2  ;;  %v26_v4 = vld [vmem:[%s252_s1 + $0x28] sm:$0xff] }
   0x2   :  { %149 = vmatpush3.msra.mxu0 %v28_v0  ;;  %v39_v5 = vshrl.u32 %v38_v1, 7  ;;  %v15_v6 = vld [vmem:[%s251_s0] sm:$0x1]  ;;  %v16_v7 = vld [vmem:[%s251_s0 + $0x1] sm:$0x1] }
   0x3   :  { %150 = vmatprep.subr.mxu0 %v192_v2 }
   0x4   :  { %8 = vsyncpa [#allocation3], 0  ;;  %151 = vmatpush3.msra.mxu0 %v27_v3  ;;  %v25_v8 = vld [vmem:[%s252_s1 + $0x20] sm:$0xff]  ;;  %v17_v9 = vunpack.c.l.bf16 %v15_v6  ;;  %v18_v10 = vunpack.c.l.bf16 %v16_v7  ;;  %v40_v11 = vsub.s32 0, %v39_v5  ;;  %v24_v12 = vld [vmem:[%s252_s1 + $0x18] sm:$0xff]  ;;  %vm46_vm1 = vcmask 1041409  }
   0x5   :  { %152 = vmatprep.subr.mxu0 %v192_v2  ;;  %v23_v13 = vld [vmem:[%s252_s1 + $0x10] sm:$0xff]  ;;  %v22_v16 = vld [vmem:[%s252_s1 + $0x8] sm:$0xff]  ;;  %v21_v17 = vld [vmem:[%s252_s1] sm:$0xff]  ;;  %vm48_vm2 = vcmask 523264   ;;  %s194_s6 = smov [#allocation2]   ;;  %vm121_vm3 = vcmask 74752  }
   0x6   :  { %153 = vmatpush3.msra.mxu0 %v26_v4  ;;  %v41_v14 = vrot.slane %v17_v9, %v40_v11  ;;  %v45_v15 = vrot.slane %v18_v10, %v40_v11  ;;  %v137_v19 = vld [vmem:[%s253_s2] ss:$0 sm:$0xff]  ;;  %s129_s7 = sshll.u32 %s194_s6, 4  ;;  %s130_s7 = int_to_ptr.vmem [resolvable:$true] %s129_s7 }
   0x7   :  { %154 = vmatprep.subr.mxu0 %v192_v2  ;;  %s170_s8 = scalar_lea.vmem %s130_s7, 32  ;;  %p175_p1 = scmp.lt.s32.totalorder %s130_s7, %s130_s7 }
   0x8   :  { %155 = vmatpush3.msra.mxu0 %v25_v8  ;;  %v47_v18 = vsel %vm46_vm1, %v45_v15, %v41_v14  ;;  %p171_p0 = scmp.ne.s32.totalorder %s130_s7, %s170_s8  ;;  %p176_p2 = scmp.lt.s32.totalorder %s170_s8, %s170_s8 }
   0x9   :  { %156 = vmatprep.subr.mxu0 %v192_v2 }
   0xa   :  { %157 = vmatpush3.msra.mxu0 %v24_v12  ;;  %p177_p3 = por %p176_p2, %p175_p1 }
   0xb   :  { %158 = vmatprep.subr.mxu0 %v192_v2 }
   0xc   :  { %159 = vmatpush3.msra.mxu0 %v23_v13  ;;  %p178_p4 = pnand %p177_p3, %p171_p0 }
   0xd   :  { %160 = vmatprep.subr.mxu0 %v192_v2 }
   0xe   :  { %161 = vmatpush3.msra.mxu0 %v22_v16 }
   0xf   :  { %162 = vmatprep.subr.mxu0 %v192_v2 }
  0x10   :  { %163 = vmatpush3.msra.mxu0 %v21_v17 }
  0x11   :  { %165 = vmatmul.mubr.msk.f32.vlgmr.msra.gmra.mxu0 %vm48_vm2, %v47_v18 }
  0xd1   :  { %v117_v20 = vpop.f32.mrf.mxu0 }
  0xd2   :  { %v118_v21 = vadd.f32 %v137_v19, %v117_v20 }
  0xd3   :  { %v166_v22 = vpop.f32.mrf.mxu0 }
  0xd4   :  { %122 = vst.msk [vmem:[#allocation2] sm:$0x3] %vm121_vm3, %v118_v21 }
  0xd5   :  { %181 = shalt.err (!%p178_p4)
}
  0xd6   :  { %132 = dma.vmem_to_hbm [thread:$0]  %s130_s7, 32, %s254_s3, [#allocation3]  }
  0xd7   :  { %190 = dma.done.wait [#allocation3], 32  }
  0xd8   :  { %191 = vsyncadd [#allocation3], 4294967264 }
  0xd9   :  { %136 = vsyncpa [#allocation3], 1 }

</bundles_post_ra>
